<compile_context>
chip_gen: v6e
topology: v6e:2x2x1
jax: 0.10.0
libtpu: 0.0.40
codegen_flags: <defaults>
</compile_context>

<pallas_src>
import numpy as np
import jax
import jax.numpy as jnp
from jax import lax
from jax.experimental import pallas as pl
from jax.experimental.pallas import tpu as pltpu

# ------------------------------ configuration ------------------------------
BATCH = 2
IN_CHANNELS = 4
IMAGE_SIZE = 16
PATCH_SIZE = 4
DIM = 32                                      # "dim"  (== LayerNorm "res")
MIX_NUM = 2
NUM_CLASSES = 10
N_PATCHES = (IMAGE_SIZE // PATCH_SIZE) ** 2   # "out_num" (token count) = 16
HID_TOK = 256                                 # mlp1 hidden width
HID_CH = 2048                                 # mlp2 hidden width
LN_EPS = 1e-5

ROWS = BATCH * N_PATCHES                      # 32 activation rows (batch folded into M)
K_PAD = 128                                   # padded patch-feature width (64 feats + bias col + zeros)
CH_CHUNK = 512                                # channel-mix lane chunk
N_CHUNKS = HID_CH // CH_CHUNK                 # 4
OUT_ROWS, OUT_LANES = 8, 128                  # lane-dense logits tile

_SQRT_2_OVER_PI = 0.7978845608028654
_INV_SQRT2 = 0.7071067811865476


# ------------------------------ in-kernel math ------------------------------
def _gelu_tanh(x):
    # tanh-form GELU: the transcendental goes to the EUP (otherwise-idle VLIW slot).
    # Max abs error vs exact GELU ~1e-3, far inside the 2e-2 test tolerance.
    return 0.5 * x * (1.0 + jnp.tanh(_SQRT_2_OVER_PI * (x + 0.044715 * x * x * x)))


# --------------------------------- kernel ----------------------------------
def _mlp_mixer_kernel(patches_ref, convw_ref,                       # resident constants
                      smalls_ref, w1_ref, b1_ref, w2_ref,           # per-block (grid-sliced)
                      w3_ref, b3_ref, w4_ref,
                      wm_ref, gc_ref, sel_ref, hb_ref,              # head constants
                      o_ref,                                        # (8, 128) logits tile
                      h_ref):                                       # VMEM scratch: carried h
    i = pl.program_id(0)

    # ---- patch embedding: Conv2d(kernel=stride=patch) == one matmul.  Conv bias is
    #      folded into the zero-padded K=128 contraction (ones column in the patches).
    @pl.when(i == 0)
    def _():
        h_ref[...] = jnp.dot(patches_ref[...], convw_ref[...],
                             preferred_element_type=jnp.float32)

    # ---- per-block packed small constants (each pre-broadcast to a (ROWS, DIM) slab)
    b2 = smalls_ref[0:ROWS, :]               # token-mix output bias
    g = smalls_ref[ROWS:2 * ROWS, :]         # LayerNorm gamma
    be = smalls_ref[2 * ROWS:3 * ROWS, :]    # LayerNorm beta
    b4 = smalls_ref[3 * ROWS:4 * ROWS, :]    # channel-mix output bias

    def layernorm(v):                        # LayerNorm over the lane axis (size DIM)
        m = jnp.mean(v, axis=-1, keepdims=True)
        c = v - m
        var = jnp.mean(c * c, axis=-1, keepdims=True)
        return c * lax.rsqrt(var + LN_EPS) * g + be

    h = h_ref[...]

    # ---- token-mixing MLP (transposed form; bf16 block-diagonal-over-batch weights
    #      process both images in a single MXU matmul per stage, f32 accumulation).
    xn = layernorm(h)                                                       # (32, 32) f32
    ht = _gelu_tanh(jnp.dot(w1_ref[...], xn.astype(jnp.bfloat16),
                            preferred_element_type=jnp.float32)
                    + b1_ref[...])                                          # (512, 32) f32
    tok = jnp.dot(w2_ref[...], ht.astype(jnp.bfloat16),
                  preferred_element_type=jnp.float32) + b2                  # (32, 32)
    x1 = xn + tok                                                           # residual from lm(x)

    # ---- channel-mixing MLP: Linear(D,2048) -> GELU -> Linear(2048,D), chunked over
    #      HID_CH so the f32 GELU intermediate never exceeds 16 vregs (no VMEM spill).
    xn2 = layernorm(x1)
    xn2_b = xn2.astype(jnp.bfloat16)
    ch = jnp.zeros((ROWS, DIM), jnp.float32)
    for c in range(N_CHUNKS):                           # static, 512-lane aligned slices
        lo = c * CH_CHUNK
        h2 = _gelu_tanh(jnp.dot(xn2_b, w3_ref[:, lo:lo + CH_CHUNK],
                                preferred_element_type=jnp.float32)
                        + b3_ref[:, lo:lo + CH_CHUNK])                      # (32, 512) f32
        ch = ch + jnp.dot(h2.astype(jnp.bfloat16), w4_ref[lo:lo + CH_CHUNK, :],
                          preferred_element_type=jnp.float32)
    h_new = xn2 + ch + b4
    h_ref[...] = h_new

    # ---- head: AvgPool1d(2) + flatten + Linear folded into matmuls (wall/mask/gc/sel),
    #      so no in-kernel reshape is needed.  Only on the last grid step; the store is
    #      one full lane-dense (8, 128) tile, real logits live in [:BATCH, :NUM_CLASSES].
    @pl.when(i == MIX_NUM - 1)
    def _():
        wall = wm_ref[0:ROWS, :]
        mask = wm_ref[ROWS:2 * ROWS, :]
        y = jnp.dot(h_new, wall, preferred_element_type=jnp.float32) * mask   # (32, 160)
        z = jnp.dot(y, gc_ref[...], preferred_element_type=jnp.float32)       # (32, 128)
        o_ref[...] = (jnp.dot(sel_ref[...], z, preferred_element_type=jnp.float32)
                      + hb_ref[...])                                           # (8, 128)


# ------------------------------ pallas wrapper ------------------------------
def _const_spec(shape):
    zeros = (0,) * len(shape)
    return pl.BlockSpec(tuple(shape), lambda i: zeros)          # resident across the grid


def _block_spec(shape):
    inner = tuple(shape[1:])
    zeros = (0,) * len(inner)
    return pl.BlockSpec((None,) + inner, lambda i: (i,) + zeros)  # one slab per mixer block


def mlp_mixer_forward(x, kp):
    patches = _extract_patches(x)                                # (32, 64) XLA layout glue
    patches_p = jnp.zeros((ROWS, K_PAD), jnp.float32)
    patches_p = patches_p.at[:, :patches.shape[1]].set(patches)
    patches_p = patches_p.at[:, patches.shape[1]].set(1.0)       # ones column -> conv bias

    args = [patches_p, kp["convw"],
            kp["smalls"], kp["w1"], kp["b1"], kp["w2"], kp["w3"], kp["b3"], kp["w4"],
            kp["head_wm"], kp["head_gc"], kp["head_sel"], kp["head_b"]]

    in_specs = [_const_spec(patches_p.shape), _const_spec(kp["convw"].shape)]
    in_specs += [_block_spec(kp[k].shape)
                 for k in ("smalls", "w1", "b1", "w2", "w3", "b3", "w4")]
    in_specs += [_const_spec(kp[k].shape)
                 for k in ("head_wm", "head_gc", "head_sel", "head_b")]

    logits_tile = pl.pallas_call(
        _mlp_mixer_kernel,
        out_shape=jax.ShapeDtypeStruct((OUT_ROWS, OUT_LANES), jnp.float32),
        grid=(MIX_NUM,),
        in_specs=in_specs,
        out_specs=_const_spec((OUT_ROWS, OUT_LANES)),
        scratch_shapes=[pltpu.VMEM((ROWS, DIM), jnp.float32)],   # h carried across grid steps
        compiler_params=pltpu.CompilerParams(
            dimension_semantics=("arbitrary",),                  # sequential block dependency
            vmem_limit_bytes=16 * 1024 * 1024,                   # footprint ~2 MiB incl. 2-deep
        ),                                                       #   per-block weight buffers
    )(*args)
    return logits_tile[:BATCH, :NUM_CLASSES]


# -------------------------------- parameters --------------------------------
def init_params(seed=0):
    key = jax.random.PRNGKey(seed)
    ks = iter(jax.random.split(key, 4 + 10 * MIX_NUM))

    def nrm(shape, scale=0.05):
        return scale * jax.random.normal(next(ks), shape, dtype=jnp.float32)

    raw = {
        "conv_w": nrm((DIM, IN_CHANNELS, PATCH_SIZE, PATCH_SIZE)),  # Conv2d weight
        "conv_b": nrm((DIM,)),
        "head_w": nrm((NUM_CLASSES, (DIM // 2) * N_PATCHES)),       # nn.Linear weight
        "head_b": nrm((NUM_CLASSES,)),
        "blocks": [],
    }
    for _ in range(MIX_NUM):
        raw["blocks"].append({
            "gamma": 1.0 + nrm((DIM,), 0.1),          # LayerNorm(res=DIM)
            "beta": nrm((DIM,), 0.1),
            "W1": nrm((HID_TOK, N_PATCHES)),          # Linear(out_num, 256).weight
            "b1": nrm((HID_TOK,)),
            "W2": nrm((N_PATCHES, HID_TOK)),          # Linear(256, out_num).weight
            "b2": nrm((N_PATCHES,)),
            "W3": nrm((HID_CH, DIM)),                 # Linear(dim, 2048).weight
            "b3": nrm((HID_CH,)),
            "W4": nrm((DIM, HID_CH)),                 # Linear(2048, dim).weight
            "b4": nrm((DIM,)),
        })
    return raw


def to_kernel_params(raw):
    cpp = IN_CHANNELS * PATCH_SIZE * PATCH_SIZE          # 64
    eye_b = jnp.eye(BATCH, dtype=jnp.float32)

    conv_wt = raw["conv_w"].reshape(DIM, cpp).T          # (64, 32)
    convw = jnp.zeros((K_PAD, DIM), jnp.float32)
    convw = convw.at[:cpp, :].set(conv_wt)
    convw = convw.at[cpp, :].set(raw["conv_b"])          # bias row matches the ones column
    kp = {"convw": convw}

    smalls, w1s, b1s, w2s, w3s, b3s, w4s = [], [], [], [], [], [], []
    for blk in raw["blocks"]:
        # small f32 constants, pre-broadcast to lane-dense (ROWS, DIM) slabs and packed
        b2bd = jnp.tile(jnp.broadcast_to(blk["b2"][:, None], (N_PATCHES, DIM)), (BATCH, 1))
        g_b = jnp.broadcast_to(blk["gamma"][None, :], (ROWS, DIM))
        be_b = jnp.broadcast_to(blk["beta"][None, :], (ROWS, DIM))
        b4_b = jnp.broadcast_to(blk["b4"][None, :], (ROWS, DIM))
        smalls.append(jnp.concatenate([b2bd, g_b, be_b, b4_b], axis=0))       # (128, 32) f32
        # token-mixing weights block-diagonal over batch, bf16
        w1s.append(jnp.kron(eye_b, blk["W1"]).astype(jnp.bfloat16))           # (512, 32)
        b1s.append(jnp.tile(jnp.broadcast_to(blk["b1"][:, None], (HID_TOK, DIM)),
                            (BATCH, 1)).astype(jnp.bfloat16))                 # (512, 32)
        w2s.append(jnp.kron(eye_b, blk["W2"]).astype(jnp.bfloat16))           # (32, 512)
        # channel-mixing weights, bf16
        w3s.append(blk["W3"].T.astype(jnp.bfloat16))                          # (32, 2048)
        b3s.append(blk["b3"].reshape(1, HID_CH))                              # (1, 2048) f32
        w4s.append(blk["W4"].T.astype(jnp.bfloat16))                          # (2048, 32)
    kp["smalls"] = jnp.stack(smalls)
    kp["w1"] = jnp.stack(w1s)
    kp["b1"] = jnp.stack(b1s)
    kp["w2"] = jnp.stack(w2s)
    kp["w3"] = jnp.stack(w3s)
    kp["b3"] = jnp.stack(b3s)
    kp["w4"] = jnp.stack(w4s)

    # Head: AvgPool1d(2) + view(B,-1) + Linear folded exactly into matmul-only form.
    # We[c, n, d] = 0.5 * head_w[c, n*(D/2) + d//2]
    half = DIM // 2
    wr = raw["head_w"].reshape(NUM_CLASSES, N_PATCHES, half)
    we = 0.5 * jnp.repeat(wr, 2, axis=2)                                      # (C, N, D)
    wall = jnp.transpose(we, (2, 1, 0)).reshape(DIM, N_PATCHES * NUM_CLASSES) # (32, 160)
    r = jnp.arange(ROWS)
    j = jnp.arange(N_PATCHES * NUM_CLASSES)
    mask = ((j[None, :] // NUM_CLASSES)
            == (r[:, None] % N_PATCHES)).astype(jnp.float32)                  # (32, 160)
    kp["head_wm"] = jnp.concatenate([wall, mask], axis=0)                     # (64, 160)
    gc = ((j[:, None] % NUM_CLASSES)
          == jnp.arange(NUM_CLASSES)[None, :]).astype(jnp.float32)            # (160, 10)
    kp["head_gc"] = (jnp.zeros((N_PATCHES * NUM_CLASSES, OUT_LANES), jnp.float32)
                     .at[:, :NUM_CLASSES].set(gc))                            # (160, 128)
    sel = ((r[None, :] // N_PATCHES)
           == jnp.arange(BATCH)[:, None]).astype(jnp.float32)                 # (2, 32)
    kp["head_sel"] = (jnp.zeros((OUT_ROWS, ROWS), jnp.float32)
                      .at[:BATCH, :].set(sel))                                # (8, 32)
    kp["head_b"] = (jnp.zeros((1, OUT_LANES), jnp.float32)
                    .at[0, :NUM_CLASSES].set(raw["head_b"]))                  # (1, 128)
    return kp


# --------------------------------- glue ----------------------------------
def _extract_patches(x):
    # (B, C, H, W) -> (B*N, C*P*P); patch order n = hp*Wp + wp, feature order (c, kh, kw)
    B, C, H, W = x.shape
    Hp, Wp = H // PATCH_SIZE, W // PATCH_SIZE
    p = x.reshape(B, C, Hp, PATCH_SIZE, Wp, PATCH_SIZE)
    p = p.transpose(0, 2, 4, 1, 3, 5)
    return p.reshape(B * Hp * Wp, C * PATCH_SIZE * PATCH_SIZE)


# --------------------------- pure-JAX reference ------------------------------
def reference_forward(x, raw):
    from jax.scipy.special import erf
    gelu = lambda v: 0.5 * v * (1.0 + erf(v * _INV_SQRT2))
    B = x.shape[0]
    patches = _extract_patches(x).reshape(B, N_PATCHES, -1)
    h = patches @ raw["conv_w"].reshape(DIM, -1).T + raw["conv_b"]
    for blk in raw["blocks"]:
        def ln(v):
            m = v.mean(-1, keepdims=True)
            var = ((v - m) ** 2).mean(-1, keepdims=True)
            return (v - m) / jnp.sqrt(var + LN_EPS) * blk["gamma"] + blk["beta"]
        xn = ln(h)
        t = jnp.swapaxes(xn, 1, 2)
        t = gelu(t @ blk["W1"].T + blk["b1"]) @ blk["W2"].T + blk["b2"]
        h = xn + jnp.swapaxes(t, 1, 2)
        xn2 = ln(h)
        m2 = gelu(xn2 @ blk["W3"].T + blk["b3"]) @ blk["W4"].T + blk["b4"]
        h = xn2 + m2
    pooled = 0.5 * (h[..., 0::2] + h[..., 1::2])          # AvgPool1d(2)
    return pooled.reshape(B, -1) @ raw["head_w"].T + raw["head_b"]


# ----------------------------------- main ------------------------------------
if __name__ == "__main__":
    raw = init_params(seed=0)
    kp = to_kernel_params(raw)

    x = jax.random.normal(jax.random.PRNGKey(0),
                          (BATCH, IN_CHANNELS, IMAGE_SIZE, IMAGE_SIZE), jnp.float32)

    out = jax.jit(mlp_mixer_forward)(x, kp)
    out = jax.block_until_ready(out)

    ref = reference_forward(x, raw)
    assert out.shape == (BATCH, NUM_CLASSES)
    np.testing.assert_allclose(np.asarray(out), np.asarray(ref), rtol=2e-2, atol=2e-2)

    print("KERNEL_OK")
</pallas_src>

<mosaic_0001>
module attributes {stable_mosaic.version = 11 : i64} {
  func.func @_mlp_mixer_kernel(%arg0: i32, %arg1: memref<32x128xf32, #tpu.memory_space<vmem>>, %arg2: memref<128x32xf32, #tpu.memory_space<vmem>>, %arg3: memref<1x128x32xf32, #tpu.memory_space<vmem>>, %arg4: memref<1x512x32xbf16, #tpu.memory_space<vmem>>, %arg5: memref<1x512x32xbf16, #tpu.memory_space<vmem>>, %arg6: memref<1x32x512xbf16, #tpu.memory_space<vmem>>, %arg7: memref<1x32x2048xbf16, #tpu.memory_space<vmem>>, %arg8: memref<1x1x2048xf32, #tpu.memory_space<vmem>>, %arg9: memref<1x2048x32xbf16, #tpu.memory_space<vmem>>, %arg10: memref<64x160xf32, #tpu.memory_space<vmem>>, %arg11: memref<160x128xf32, #tpu.memory_space<vmem>>, %arg12: memref<8x32xf32, #tpu.memory_space<vmem>>, %arg13: memref<1x128xf32, #tpu.memory_space<vmem>>, %arg14: memref<8x128xf32, #tpu.memory_space<vmem>>, %arg15: memref<32x32xf32, #tpu.memory_space<vmem>>) attributes {dimension_semantics = [#tpu.dimension_semantics<arbitrary>], iteration_bounds = array<i64: 2>, scalar_prefetch = 0 : i64, scratch_operands = 1 : i64, tpu.core_type = #tpu.core_type<tc>, window_params = [{pipeline_mode = #tpu.pipeline_mode<synchronous>, transform_indices = @transform_0, window_bounds = array<i64: 32, 128>}, {pipeline_mode = #tpu.pipeline_mode<synchronous>, transform_indices = @transform_1, window_bounds = array<i64: 128, 32>}, {transform_indices = @transform_2, window_bounds = array<i64: 1, 128, 32>}, {transform_indices = @transform_3, window_bounds = array<i64: 1, 512, 32>}, {transform_indices = @transform_4, window_bounds = array<i64: 1, 512, 32>}, {transform_indices = @transform_5, window_bounds = array<i64: 1, 32, 512>}, {transform_indices = @transform_6, window_bounds = array<i64: 1, 32, 2048>}, {transform_indices = @transform_7, window_bounds = array<i64: 1, 1, 2048>}, {transform_indices = @transform_8, window_bounds = array<i64: 1, 2048, 32>}, {pipeline_mode = #tpu.pipeline_mode<synchronous>, transform_indices = @transform_9, window_bounds = array<i64: 64, 160>}, {pipeline_mode = #tpu.pipeline_mode<synchronous>, transform_indices = @transform_10, window_bounds = array<i64: 160, 128>}, {pipeline_mode = #tpu.pipeline_mode<synchronous>, transform_indices = @transform_11, window_bounds = array<i64: 8, 32>}, {pipeline_mode = #tpu.pipeline_mode<synchronous>, transform_indices = @transform_12, window_bounds = array<i64: 1, 128>}, {pipeline_mode = #tpu.pipeline_mode<synchronous>, transform_indices = @transform_13, window_bounds = array<i64: 8, 128>}]} {
    %c0_i32 = arith.constant 0 : i32
    %0 = arith.cmpi eq, %arg0, %c0_i32 : i32
    %1 = arith.extui %0 : i1 to i32
    %c0_i32_0 = arith.constant 0 : i32
    %2 = arith.cmpi ne, %1, %c0_i32_0 : i32
    scf.if %2 {
      %c0_96 = arith.constant 0 : index
      %c0_97 = arith.constant 0 : index
      %183 = vector.load %arg1[%c0_96, %c0_97] : memref<32x128xf32, #tpu.memory_space<vmem>>, vector<32x128xf32>
      %c0_98 = arith.constant 0 : index
      %c0_99 = arith.constant 0 : index
      %184 = vector.load %arg2[%c0_98, %c0_99] : memref<128x32xf32, #tpu.memory_space<vmem>>, vector<128x32xf32>
      %cst_100 = arith.constant dense<0.000000e+00> : vector<32x32xf32>
      %185 = tpu.matmul %183, %184, %cst_100 {dimension_numbers = #tpu.dot_dimension_numbers<[1], [0], [0], [1], [0, 0, 1, 1], [], []>} : vector<32x128xf32>, vector<128x32xf32>, vector<32x32xf32> -> vector<32x32xf32>
      %c0_101 = arith.constant 0 : index
      %c0_102 = arith.constant 0 : index
      %186 = vector.load %arg15[%c0_101, %c0_102] : memref<32x32xf32, #tpu.memory_space<vmem>>, vector<32x32xf32>
      tpu.vector_store %arg15[%c0_101, %c0_102], %185 {strides = array<i32>} : memref<32x32xf32, #tpu.memory_space<vmem>>, vector<32x32xf32>,
    } else {
    }
    %c0 = arith.constant 0 : index
    %c0_1 = arith.constant 0 : index
    %c0_2 = arith.constant 0 : index
    %3 = vector.load %arg3[%c0, %c0_1, %c0_2] : memref<1x128x32xf32, #tpu.memory_space<vmem>>, vector<1x32x32xf32>
    %4 = vector.shape_cast %3 : vector<1x32x32xf32> to vector<32x32xf32>
    %c0_3 = arith.constant 0 : index
    %c32 = arith.constant 32 : index
    %c0_4 = arith.constant 0 : index
    %5 = vector.load %arg3[%c0_3, %c32, %c0_4] : memref<1x128x32xf32, #tpu.memory_space<vmem>>, vector<1x32x32xf32>
    %6 = vector.shape_cast %5 : vector<1x32x32xf32> to vector<32x32xf32>
    %c0_5 = arith.constant 0 : index
    %c64 = arith.constant 64 : index
    %c0_6 = arith.constant 0 : index
    %7 = vector.load %arg3[%c0_5, %c64, %c0_6] : memref<1x128x32xf32, #tpu.memory_space<vmem>>, vector<1x32x32xf32>
    %8 = vector.shape_cast %7 : vector<1x32x32xf32> to vector<32x32xf32>
    %c0_7 = arith.constant 0 : index
    %c96 = arith.constant 96 : index
    %c0_8 = arith.constant 0 : index
    %9 = vector.load %arg3[%c0_7, %c96, %c0_8] : memref<1x128x32xf32, #tpu.memory_space<vmem>>, vector<1x32x32xf32>
    %10 = vector.shape_cast %9 : vector<1x32x32xf32> to vector<32x32xf32>
    %c0_9 = arith.constant 0 : index
    %c0_10 = arith.constant 0 : index
    %11 = vector.load %arg15[%c0_9, %c0_10] : memref<32x32xf32, #tpu.memory_space<vmem>>, vector<32x32xf32>
    %cst = arith.constant dense<0.000000e+00> : vector<32xf32>
    %12 = vector.multi_reduction <add>, %11, %cst [1] : vector<32x32xf32> to vector<32xf32>
    %13 = vector.shape_cast %12 : vector<32xf32> to vector<32x1xf32>
    %cst_11 = arith.constant 3.200000e+01 : f32
    %14 = vector.broadcast %cst_11 : f32 to vector<32x1xf32>
    %15 = arith.divf %13, %14 : vector<32x1xf32>
    %16 = vector.broadcast %15 : vector<32x1xf32> to vector<32x32xf32>
    %17 = arith.subf %11, %16 : vector<32x32xf32>
    %18 = arith.mulf %17, %17 : vector<32x32xf32>
    %cst_12 = arith.constant dense<0.000000e+00> : vector<32xf32>
    %19 = vector.multi_reduction <add>, %18, %cst_12 [1] : vector<32x32xf32> to vector<32xf32>
    %20 = vector.shape_cast %19 : vector<32xf32> to vector<32x1xf32>
    %cst_13 = arith.constant 3.200000e+01 : f32
    %21 = vector.broadcast %cst_13 : f32 to vector<32x1xf32>
    %22 = arith.divf %20, %21 : vector<32x1xf32>
    %cst_14 = arith.constant 9.99999974E-6 : f32
    %23 = vector.broadcast %cst_14 : f32 to vector<32x1xf32>
    %24 = arith.addf %22, %23 : vector<32x1xf32>
    %25 = math.rsqrt %24 : vector<32x1xf32>
    %26 = vector.broadcast %25 : vector<32x1xf32> to vector<32x32xf32>
    %27 = arith.mulf %17, %26 : vector<32x32xf32>
    %28 = arith.mulf %27, %6 : vector<32x32xf32>
    %29 = arith.addf %28, %8 : vector<32x32xf32>
    %c0_15 = arith.constant 0 : index
    %c0_16 = arith.constant 0 : index
    %c0_17 = arith.constant 0 : index
    %30 = vector.load %arg4[%c0_15, %c0_16, %c0_17] : memref<1x512x32xbf16, #tpu.memory_space<vmem>>, vector<1x512x32xbf16>
    %31 = vector.shape_cast %30 : vector<1x512x32xbf16> to vector<512x32xbf16>
    %32 = arith.truncf %29 : vector<32x32xf32> to vector<32x32xbf16>
    %cst_18 = arith.constant dense<0.000000e+00> : vector<512x32xf32>
    %33 = tpu.matmul %31, %32, %cst_18 {dimension_numbers = #tpu.dot_dimension_numbers<[1], [0], [0], [1], [0, 0, 1, 1], [], []>} : vector<512x32xbf16>, vector<32x32xbf16>, vector<512x32xf32> -> vector<512x32xf32>
    %c0_19 = arith.constant 0 : index
    %c0_20 = arith.constant 0 : index
    %c0_21 = arith.constant 0 : index
    %34 = vector.load %arg5[%c0_19, %c0_20, %c0_21] : memref<1x512x32xbf16, #tpu.memory_space<vmem>>, vector<1x512x32xbf16>
    %35 = vector.shape_cast %34 : vector<1x512x32xbf16> to vector<512x32xbf16>
    %36 = arith.extf %35 : vector<512x32xbf16> to vector<512x32xf32>
    %37 = arith.addf %33, %36 : vector<512x32xf32>
    %cst_22 = arith.constant 5.000000e-01 : f32
    %38 = vector.broadcast %cst_22 : f32 to vector<512x32xf32>
    %39 = arith.mulf %38, %37 : vector<512x32xf32>
    %cst_23 = arith.constant 4.471500e-02 : f32
    %40 = vector.broadcast %cst_23 : f32 to vector<512x32xf32>
    %41 = arith.mulf %40, %37 : vector<512x32xf32>
    %42 = arith.mulf %41, %37 : vector<512x32xf32>
    %43 = arith.mulf %42, %37 : vector<512x32xf32>
    %44 = arith.addf %37, %43 : vector<512x32xf32>
    %cst_24 = arith.constant 0.797884583 : f32
    %45 = vector.broadcast %cst_24 : f32 to vector<512x32xf32>
    %46 = arith.mulf %45, %44 : vector<512x32xf32>
    %47 = math.tanh %46 : vector<512x32xf32>
    %cst_25 = arith.constant 1.000000e+00 : f32
    %48 = vector.broadcast %cst_25 : f32 to vector<512x32xf32>
    %49 = arith.addf %48, %47 : vector<512x32xf32>
    %50 = arith.mulf %39, %49 : vector<512x32xf32>
    %c0_26 = arith.constant 0 : index
    %c0_27 = arith.constant 0 : index
    %c0_28 = arith.constant 0 : index
    %51 = vector.load %arg6[%c0_26, %c0_27, %c0_28] : memref<1x32x512xbf16, #tpu.memory_space<vmem>>, vector<1x32x512xbf16>
    %52 = vector.shape_cast %51 : vector<1x32x512xbf16> to vector<32x512xbf16>
    %53 = arith.truncf %50 : vector<512x32xf32> to vector<512x32xbf16>
    %cst_29 = arith.constant dense<0.000000e+00> : vector<32x32xf32>
    %54 = tpu.matmul %52, %53, %cst_29 {dimension_numbers = #tpu.dot_dimension_numbers<[1], [0], [0], [1], [0, 0, 1, 1], [], []>} : vector<32x512xbf16>, vector<512x32xbf16>, vector<32x32xf32> -> vector<32x32xf32>
    %55 = arith.addf %54, %4 : vector<32x32xf32>
    %56 = arith.addf %29, %55 : vector<32x32xf32>
    %cst_30 = arith.constant dense<0.000000e+00> : vector<32xf32>
    %57 = vector.multi_reduction <add>, %56, %cst_30 [1] : vector<32x32xf32> to vector<32xf32>
    %58 = vector.shape_cast %57 : vector<32xf32> to vector<32x1xf32>
    %cst_31 = arith.constant 3.200000e+01 : f32
    %59 = vector.broadcast %cst_31 : f32 to vector<32x1xf32>
    %60 = arith.divf %58, %59 : vector<32x1xf32>
    %61 = vector.broadcast %60 : vector<32x1xf32> to vector<32x32xf32>
    %62 = arith.subf %56, %61 : vector<32x32xf32>
    %63 = arith.mulf %62, %62 : vector<32x32xf32>
    %cst_32 = arith.constant dense<0.000000e+00> : vector<32xf32>
    %64 = vector.multi_reduction <add>, %63, %cst_32 [1] : vector<32x32xf32> to vector<32xf32>
    %65 = vector.shape_cast %64 : vector<32xf32> to vector<32x1xf32>
    %cst_33 = arith.constant 3.200000e+01 : f32
    %66 = vector.broadcast %cst_33 : f32 to vector<32x1xf32>
    %67 = arith.divf %65, %66 : vector<32x1xf32>
    %cst_34 = arith.constant 9.99999974E-6 : f32
    %68 = vector.broadcast %cst_34 : f32 to vector<32x1xf32>
    %69 = arith.addf %67, %68 : vector<32x1xf32>
    %70 = math.rsqrt %69 : vector<32x1xf32>
    %71 = vector.broadcast %70 : vector<32x1xf32> to vector<32x32xf32>
    %72 = arith.mulf %62, %71 : vector<32x32xf32>
    %73 = arith.mulf %72, %6 : vector<32x32xf32>
    %74 = arith.addf %73, %8 : vector<32x32xf32>
    %75 = arith.truncf %74 : vector<32x32xf32> to vector<32x32xbf16>
    %cst_35 = arith.constant 0.000000e+00 : f32
    %76 = vector.broadcast %cst_35 : f32 to vector<32x32xf32>
    %c0_36 = arith.constant 0 : index
    %c0_37 = arith.constant 0 : index
    %c0_38 = arith.constant 0 : index
    %77 = vector.load %arg7[%c0_36, %c0_37, %c0_38] : memref<1x32x2048xbf16, #tpu.memory_space<vmem>>, vector<1x32x512xbf16>
    %78 = vector.shape_cast %77 : vector<1x32x512xbf16> to vector<32x512xbf16>
    %cst_39 = arith.constant dense<0.000000e+00> : vector<32x512xf32>
    %79 = tpu.matmul %75, %78, %cst_39 {dimension_numbers = #tpu.dot_dimension_numbers<[1], [0], [0], [1], [0, 0, 1, 1], [], []>} : vector<32x32xbf16>, vector<32x512xbf16>, vector<32x512xf32> -> vector<32x512xf32>
    %c0_40 = arith.constant 0 : index
    %c0_41 = arith.constant 0 : index
    %c0_42 = arith.constant 0 : index
    %80 = vector.load %arg8[%c0_40, %c0_41, %c0_42] : memref<1x1x2048xf32, #tpu.memory_space<vmem>>, vector<1x1x512xf32>
    %81 = vector.shape_cast %80 : vector<1x1x512xf32> to vector<1x512xf32>
    %82 = vector.broadcast %81 : vector<1x512xf32> to vector<32x512xf32>
    %83 = arith.addf %79, %82 : vector<32x512xf32>
    %cst_43 = arith.constant 5.000000e-01 : f32
    %84 = vector.broadcast %cst_43 : f32 to vector<32x512xf32>
    %85 = arith.mulf %84, %83 : vector<32x512xf32>
    %cst_44 = arith.constant 4.471500e-02 : f32
    %86 = vector.broadcast %cst_44 : f32 to vector<32x512xf32>
    %87 = arith.mulf %86, %83 : vector<32x512xf32>
    %88 = arith.mulf %87, %83 : vector<32x512xf32>
    %89 = arith.mulf %88, %83 : vector<32x512xf32>
    %90 = arith.addf %83, %89 : vector<32x512xf32>
    %cst_45 = arith.constant 0.797884583 : f32
    %91 = vector.broadcast %cst_45 : f32 to vector<32x512xf32>
    %92 = arith.mulf %91, %90 : vector<32x512xf32>
    %93 = math.tanh %92 : vector<32x512xf32>
    %cst_46 = arith.constant 1.000000e+00 : f32
    %94 = vector.broadcast %cst_46 : f32 to vector<32x512xf32>
    %95 = arith.addf %94, %93 : vector<32x512xf32>
    %96 = arith.mulf %85, %95 : vector<32x512xf32>
    %97 = arith.truncf %96 : vector<32x512xf32> to vector<32x512xbf16>
    %c0_47 = arith.constant 0 : index
    %c0_48 = arith.constant 0 : index
    %c0_49 = arith.constant 0 : index
    %98 = vector.load %arg9[%c0_47, %c0_48, %c0_49] : memref<1x2048x32xbf16, #tpu.memory_space<vmem>>, vector<1x512x32xbf16>
    %99 = vector.shape_cast %98 : vector<1x512x32xbf16> to vector<512x32xbf16>
    %cst_50 = arith.constant dense<0.000000e+00> : vector<32x32xf32>
    %100 = tpu.matmul %97, %99, %cst_50 {dimension_numbers = #tpu.dot_dimension_numbers<[1], [0], [0], [1], [0, 0, 1, 1], [], []>} : vector<32x512xbf16>, vector<512x32xbf16>, vector<32x32xf32> -> vector<32x32xf32>
    %101 = arith.addf %76, %100 : vector<32x32xf32>
    %c0_51 = arith.constant 0 : index
    %c0_52 = arith.constant 0 : index
    %c512 = arith.constant 512 : index
    %102 = vector.load %arg7[%c0_51, %c0_52, %c512] : memref<1x32x2048xbf16, #tpu.memory_space<vmem>>, vector<1x32x512xbf16>
    %103 = vector.shape_cast %102 : vector<1x32x512xbf16> to vector<32x512xbf16>
    %cst_53 = arith.constant dense<0.000000e+00> : vector<32x512xf32>
    %104 = tpu.matmul %75, %103, %cst_53 {dimension_numbers = #tpu.dot_dimension_numbers<[1], [0], [0], [1], [0, 0, 1, 1], [], []>} : vector<32x32xbf16>, vector<32x512xbf16>, vector<32x512xf32> -> vector<32x512xf32>
    %c0_54 = arith.constant 0 : index
    %c0_55 = arith.constant 0 : index
    %c512_56 = arith.constant 512 : index
    %105 = vector.load %arg8[%c0_54, %c0_55, %c512_56] : memref<1x1x2048xf32, #tpu.memory_space<vmem>>, vector<1x1x512xf32>
    %106 = vector.shape_cast %105 : vector<1x1x512xf32> to vector<1x512xf32>
    %107 = vector.broadcast %106 : vector<1x512xf32> to vector<32x512xf32>
    %108 = arith.addf %104, %107 : vector<32x512xf32>
    %cst_57 = arith.constant 5.000000e-01 : f32
    %109 = vector.broadcast %cst_57 : f32 to vector<32x512xf32>
    %110 = arith.mulf %109, %108 : vector<32x512xf32>
    %cst_58 = arith.constant 4.471500e-02 : f32
    %111 = vector.broadcast %cst_58 : f32 to vector<32x512xf32>
    %112 = arith.mulf %111, %108 : vector<32x512xf32>
    %113 = arith.mulf %112, %108 : vector<32x512xf32>
    %114 = arith.mulf %113, %108 : vector<32x512xf32>
    %115 = arith.addf %108, %114 : vector<32x512xf32>
    %cst_59 = arith.constant 0.797884583 : f32
    %116 = vector.broadcast %cst_59 : f32 to vector<32x512xf32>
    %117 = arith.mulf %116, %115 : vector<32x512xf32>
    %118 = math.tanh %117 : vector<32x512xf32>
    %cst_60 = arith.constant 1.000000e+00 : f32
    %119 = vector.broadcast %cst_60 : f32 to vector<32x512xf32>
    %120 = arith.addf %119, %118 : vector<32x512xf32>
    %121 = arith.mulf %110, %120 : vector<32x512xf32>
    %122 = arith.truncf %121 : vector<32x512xf32> to vector<32x512xbf16>
    %c0_61 = arith.constant 0 : index
    %c512_62 = arith.constant 512 : index
    %c0_63 = arith.constant 0 : index
    %123 = vector.load %arg9[%c0_61, %c512_62, %c0_63] : memref<1x2048x32xbf16, #tpu.memory_space<vmem>>, vector<1x512x32xbf16>
    %124 = vector.shape_cast %123 : vector<1x512x32xbf16> to vector<512x32xbf16>
    %cst_64 = arith.constant dense<0.000000e+00> : vector<32x32xf32>
    %125 = tpu.matmul %122, %124, %cst_64 {dimension_numbers = #tpu.dot_dimension_numbers<[1], [0], [0], [1], [0, 0, 1, 1], [], []>} : vector<32x512xbf16>, vector<512x32xbf16>, vector<32x32xf32> -> vector<32x32xf32>
    %126 = arith.addf %101, %125 : vector<32x32xf32>
    %c0_65 = arith.constant 0 : index
    %c0_66 = arith.constant 0 : index
    %c1024 = arith.constant 1024 : index
    %127 = vector.load %arg7[%c0_65, %c0_66, %c1024] : memref<1x32x2048xbf16, #tpu.memory_space<vmem>>, vector<1x32x512xbf16>
    %128 = vector.shape_cast %127 : vector<1x32x512xbf16> to vector<32x512xbf16>
    %cst_67 = arith.constant dense<0.000000e+00> : vector<32x512xf32>
    %129 = tpu.matmul %75, %128, %cst_67 {dimension_numbers = #tpu.dot_dimension_numbers<[1], [0], [0], [1], [0, 0, 1, 1], [], []>} : vector<32x32xbf16>, vector<32x512xbf16>, vector<32x512xf32> -> vector<32x512xf32>
    %c0_68 = arith.constant 0 : index
    %c0_69 = arith.constant 0 : index
    %c1024_70 = arith.constant 1024 : index
    %130 = vector.load %arg8[%c0_68, %c0_69, %c1024_70] : memref<1x1x2048xf32, #tpu.memory_space<vmem>>, vector<1x1x512xf32>
    %131 = vector.shape_cast %130 : vector<1x1x512xf32> to vector<1x512xf32>
    %132 = vector.broadcast %131 : vector<1x512xf32> to vector<32x512xf32>
    %133 = arith.addf %129, %132 : vector<32x512xf32>
    %cst_71 = arith.constant 5.000000e-01 : f32
    %134 = vector.broadcast %cst_71 : f32 to vector<32x512xf32>
    %135 = arith.mulf %134, %133 : vector<32x512xf32>
    %cst_72 = arith.constant 4.471500e-02 : f32
    %136 = vector.broadcast %cst_72 : f32 to vector<32x512xf32>
    %137 = arith.mulf %136, %133 : vector<32x512xf32>
    %138 = arith.mulf %137, %133 : vector<32x512xf32>
    %139 = arith.mulf %138, %133 : vector<32x512xf32>
    %140 = arith.addf %133, %139 : vector<32x512xf32>
    %cst_73 = arith.constant 0.797884583 : f32
    %141 = vector.broadcast %cst_73 : f32 to vector<32x512xf32>
    %142 = arith.mulf %141, %140 : vector<32x512xf32>
    %143 = math.tanh %142 : vector<32x512xf32>
    %cst_74 = arith.constant 1.000000e+00 : f32
    %144 = vector.broadcast %cst_74 : f32 to vector<32x512xf32>
    %145 = arith.addf %144, %143 : vector<32x512xf32>
    %146 = arith.mulf %135, %145 : vector<32x512xf32>
    %147 = arith.truncf %146 : vector<32x512xf32> to vector<32x512xbf16>
    %c0_75 = arith.constant 0 : index
    %c1024_76 = arith.constant 1024 : index
    %c0_77 = arith.constant 0 : index
    %148 = vector.load %arg9[%c0_75, %c1024_76, %c0_77] : memref<1x2048x32xbf16, #tpu.memory_space<vmem>>, vector<1x512x32xbf16>
    %149 = vector.shape_cast %148 : vector<1x512x32xbf16> to vector<512x32xbf16>
    %cst_78 = arith.constant dense<0.000000e+00> : vector<32x32xf32>
    %150 = tpu.matmul %147, %149, %cst_78 {dimension_numbers = #tpu.dot_dimension_numbers<[1], [0], [0], [1], [0, 0, 1, 1], [], []>} : vector<32x512xbf16>, vector<512x32xbf16>, vector<32x32xf32> -> vector<32x32xf32>
    %151 = arith.addf %126, %150 : vector<32x32xf32>
    %c0_79 = arith.constant 0 : index
    %c0_80 = arith.constant 0 : index
    %c1536 = arith.constant 1536 : index
    %152 = vector.load %arg7[%c0_79, %c0_80, %c1536] : memref<1x32x2048xbf16, #tpu.memory_space<vmem>>, vector<1x32x512xbf16>
    %153 = vector.shape_cast %152 : vector<1x32x512xbf16> to vector<32x512xbf16>
    %cst_81 = arith.constant dense<0.000000e+00> : vector<32x512xf32>
    %154 = tpu.matmul %75, %153, %cst_81 {dimension_numbers = #tpu.dot_dimension_numbers<[1], [0], [0], [1], [0, 0, 1, 1], [], []>} : vector<32x32xbf16>, vector<32x512xbf16>, vector<32x512xf32> -> vector<32x512xf32>
    %c0_82 = arith.constant 0 : index
    %c0_83 = arith.constant 0 : index
    %c1536_84 = arith.constant 1536 : index
    %155 = vector.load %arg8[%c0_82, %c0_83, %c1536_84] : memref<1x1x2048xf32, #tpu.memory_space<vmem>>, vector<1x1x512xf32>
    %156 = vector.shape_cast %155 : vector<1x1x512xf32> to vector<1x512xf32>
    %157 = vector.broadcast %156 : vector<1x512xf32> to vector<32x512xf32>
    %158 = arith.addf %154, %157 : vector<32x512xf32>
    %cst_85 = arith.constant 5.000000e-01 : f32
    %159 = vector.broadcast %cst_85 : f32 to vector<32x512xf32>
    %160 = arith.mulf %159, %158 : vector<32x512xf32>
    %cst_86 = arith.constant 4.471500e-02 : f32
    %161 = vector.broadcast %cst_86 : f32 to vector<32x512xf32>
    %162 = arith.mulf %161, %158 : vector<32x512xf32>
    %163 = arith.mulf %162, %158 : vector<32x512xf32>
    %164 = arith.mulf %163, %158 : vector<32x512xf32>
    %165 = arith.addf %158, %164 : vector<32x512xf32>
    %cst_87 = arith.constant 0.797884583 : f32
    %166 = vector.broadcast %cst_87 : f32 to vector<32x512xf32>
    %167 = arith.mulf %166, %165 : vector<32x512xf32>
    %168 = math.tanh %167 : vector<32x512xf32>
    %cst_88 = arith.constant 1.000000e+00 : f32
    %169 = vector.broadcast %cst_88 : f32 to vector<32x512xf32>
    %170 = arith.addf %169, %168 : vector<32x512xf32>
    %171 = arith.mulf %160, %170 : vector<32x512xf32>
    %172 = arith.truncf %171 : vector<32x512xf32> to vector<32x512xbf16>
    %c0_89 = arith.constant 0 : index
    %c1536_90 = arith.constant 1536 : index
    %c0_91 = arith.constant 0 : index
    %173 = vector.load %arg9[%c0_89, %c1536_90, %c0_91] : memref<1x2048x32xbf16, #tpu.memory_space<vmem>>, vector<1x512x32xbf16>
    %174 = vector.shape_cast %173 : vector<1x512x32xbf16> to vector<512x32xbf16>
    %cst_92 = arith.constant dense<0.000000e+00> : vector<32x32xf32>
    %175 = tpu.matmul %172, %174, %cst_92 {dimension_numbers = #tpu.dot_dimension_numbers<[1], [0], [0], [1], [0, 0, 1, 1], [], []>} : vector<32x512xbf16>, vector<512x32xbf16>, vector<32x32xf32> -> vector<32x32xf32>
    %176 = arith.addf %151, %175 : vector<32x32xf32>
    %177 = arith.addf %74, %176 : vector<32x32xf32>
    %178 = arith.addf %177, %10 : vector<32x32xf32>
    %c0_93 = arith.constant 0 : index
    %c0_94 = arith.constant 0 : index
    %179 = vector.load %arg15[%c0_93, %c0_94] : memref<32x32xf32, #tpu.memory_space<vmem>>, vector<32x32xf32>
    tpu.vector_store %arg15[%c0_93, %c0_94], %178 {strides = array<i32>} : memref<32x32xf32, #tpu.memory_space<vmem>>, vector<32x32xf32>,
    %c1_i32 = arith.constant 1 : i32
    %180 = arith.cmpi eq, %arg0, %c1_i32 : i32
    %181 = arith.extui %180 : i1 to i32
    %c0_i32_95 = arith.constant 0 : i32
    %182 = arith.cmpi ne, %181, %c0_i32_95 : i32
    scf.if %182 {
      %c0_96 = arith.constant 0 : index
      %c0_97 = arith.constant 0 : index
      %183 = vector.load %arg10[%c0_96, %c0_97] : memref<64x160xf32, #tpu.memory_space<vmem>>, vector<32x160xf32>
      %c32_98 = arith.constant 32 : index
      %c0_99 = arith.constant 0 : index
      %184 = vector.load %arg10[%c32_98, %c0_99] : memref<64x160xf32, #tpu.memory_space<vmem>>, vector<32x160xf32>
      %cst_100 = arith.constant dense<0.000000e+00> : vector<32x160xf32>
      %185 = tpu.matmul %178, %183, %cst_100 {dimension_numbers = #tpu.dot_dimension_numbers<[1], [0], [0], [1], [0, 0, 1, 1], [], []>} : vector<32x32xf32>, vector<32x160xf32>, vector<32x160xf32> -> vector<32x160xf32>
      %186 = arith.mulf %185, %184 : vector<32x160xf32>
      %c0_101 = arith.constant 0 : index
      %c0_102 = arith.constant 0 : index
      %187 = vector.load %arg11[%c0_101, %c0_102] : memref<160x128xf32, #tpu.memory_space<vmem>>, vector<160x128xf32>
      %cst_103 = arith.constant dense<0.000000e+00> : vector<32x128xf32>
      %188 = tpu.matmul %186, %187, %cst_103 {dimension_numbers = #tpu.dot_dimension_numbers<[1], [0], [0], [1], [0, 0, 1, 1], [], []>} : vector<32x160xf32>, vector<160x128xf32>, vector<32x128xf32> -> vector<32x128xf32>
      %c0_104 = arith.constant 0 : index
      %c0_105 = arith.constant 0 : index
      %189 = vector.load %arg12[%c0_104, %c0_105] : memref<8x32xf32, #tpu.memory_space<vmem>>, vector<8x32xf32>
      %cst_106 = arith.constant dense<0.000000e+00> : vector<8x128xf32>
      %190 = tpu.matmul %189, %188, %cst_106 {dimension_numbers = #tpu.dot_dimension_numbers<[1], [0], [0], [1], [0, 0, 1, 1], [], []>} : vector<8x32xf32>, vector<32x128xf32>, vector<8x128xf32> -> vector<8x128xf32>
      %c0_107 = arith.constant 0 : index
      %c0_108 = arith.constant 0 : index
      %191 = vector.load %arg13[%c0_107, %c0_108] : memref<1x128xf32, #tpu.memory_space<vmem>>, vector<1x128xf32>
      %192 = vector.broadcast %191 : vector<1x128xf32> to vector<8x128xf32>
      %193 = arith.addf %190, %192 : vector<8x128xf32>
      %c0_109 = arith.constant 0 : index
      %c0_110 = arith.constant 0 : index
      %194 = vector.load %arg14[%c0_109, %c0_110] : memref<8x128xf32, #tpu.memory_space<vmem>>, vector<8x128xf32>
      tpu.vector_store %arg14[%c0_109, %c0_110], %193 {strides = array<i32>} : memref<8x128xf32, #tpu.memory_space<vmem>>, vector<8x128xf32>,
    } else {
    }
    return
  }
  func.func @transform_0(%arg0: i32) -> (i32, i32) {
    %c0_i32 = arith.constant 0 : i32
    %c0_i32_0 = arith.constant 0 : i32
    %c0_i32_1 = arith.constant 0 : i32
    return %c0_i32, %c0_i32_0 : i32, i32
  }
  func.func @transform_1(%arg0: i32) -> (i32, i32) {
    %c0_i32 = arith.constant 0 : i32
    %c0_i32_0 = arith.constant 0 : i32
    %c0_i32_1 = arith.constant 0 : i32
    return %c0_i32, %c0_i32_0 : i32, i32
  }
  func.func @transform_2(%arg0: i32) -> (i32, i32, i32) {
    %c0_i32 = arith.constant 0 : i32
    %c0_i32_0 = arith.constant 0 : i32
    %c0_i32_1 = arith.constant 0 : i32
    return %arg0, %c0_i32, %c0_i32_0 : i32, i32, i32
  }
  func.func @transform_3(%arg0: i32) -> (i32, i32, i32) {
    %c0_i32 = arith.constant 0 : i32
    %c0_i32_0 = arith.constant 0 : i32
    %c0_i32_1 = arith.constant 0 : i32
    return %arg0, %c0_i32, %c0_i32_0 : i32, i32, i32
  }
  func.func @transform_4(%arg0: i32) -> (i32, i32, i32) {
    %c0_i32 = arith.constant 0 : i32
    %c0_i32_0 = arith.constant 0 : i32
    %c0_i32_1 = arith.constant 0 : i32
    return %arg0, %c0_i32, %c0_i32_0 : i32, i32, i32
  }
  func.func @transform_5(%arg0: i32) -> (i32, i32, i32) {
    %c0_i32 = arith.constant 0 : i32
    %c0_i32_0 = arith.constant 0 : i32
    %c0_i32_1 = arith.constant 0 : i32
    return %arg0, %c0_i32, %c0_i32_0 : i32, i32, i32
  }
  func.func @transform_6(%arg0: i32) -> (i32, i32, i32) {
    %c0_i32 = arith.constant 0 : i32
    %c0_i32_0 = arith.constant 0 : i32
    %c0_i32_1 = arith.constant 0 : i32
    return %arg0, %c0_i32, %c0_i32_0 : i32, i32, i32
  }
  func.func @transform_7(%arg0: i32) -> (i32, i32, i32) {
    %c0_i32 = arith.constant 0 : i32
    %c0_i32_0 = arith.constant 0 : i32
    %c0_i32_1 = arith.constant 0 : i32
    return %arg0, %c0_i32, %c0_i32_0 : i32, i32, i32
  }
  func.func @transform_8(%arg0: i32) -> (i32, i32, i32) {
    %c0_i32 = arith.constant 0 : i32
    %c0_i32_0 = arith.constant 0 : i32
    %c0_i32_1 = arith.constant 0 : i32
    return %arg0, %c0_i32, %c0_i32_0 : i32, i32, i32
  }
  func.func @transform_9(%arg0: i32) -> (i32, i32) {
    %c0_i32 = arith.constant 0 : i32
    %c0_i32_0 = arith.constant 0 : i32
    %c0_i32_1 = arith.constant 0 : i32
    return %c0_i32, %c0_i32_0 : i32, i32
  }
  func.func @transform_10(%arg0: i32) -> (i32, i32) {
    %c0_i32 = arith.constant 0 : i32
    %c0_i32_0 = arith.constant 0 : i32
    %c0_i32_1 = arith.constant 0 : i32
    return %c0_i32, %c0_i32_0 : i32, i32
  }
  func.func @transform_11(%arg0: i32) -> (i32, i32) {
    %c0_i32 = arith.constant 0 : i32
    %c0_i32_0 = arith.constant 0 : i32
    %c0_i32_1 = arith.constant 0 : i32
    return %c0_i32, %c0_i32_0 : i32, i32
  }
  func.func @transform_12(%arg0: i32) -> (i32, i32) {
    %c0_i32 = arith.constant 0 : i32
    %c0_i32_0 = arith.constant 0 : i32
    %c0_i32_1 = arith.constant 0 : i32
    return %c0_i32, %c0_i32_0 : i32, i32
  }
  func.func @transform_13(%arg0: i32) -> (i32, i32) {
    %c0_i32 = arith.constant 0 : i32
    %c0_i32_0 = arith.constant 0 : i32
    %c0_i32_1 = arith.constant 0 : i32
    return %c0_i32, %c0_i32_0 : i32, i32
  }
}

</mosaic_0001>

<bundles_post_ra>
// kernel: mlp_mixer_forward.1
= control target key start
LH: loop header
LB: loop body
LE: loop exit
PB: predicated region body
PF: predicated region fallthrough
CT: control target
= control target key end

     0   :  { %s6957_s25 = smov 0   ;;  %s9256_s0 = inlined_call_operand.vmem [shape: f32[32,128], index: 0, kind: input, shape index: {}]   ;;  %s9257_s1 = inlined_call_operand.vmem [shape: f32[128,32], index: 1, kind: input, shape index: {}]   ;;  %s9258_s2 = inlined_call_operand.vmem [shape: f32[2,128,32], index: 2, kind: input, shape index: {}]   ;;  %s9259_s3 = inlined_call_operand.vmem [shape: bf16[2,512,32], index: 3, kind: input, shape index: {}]   ;;  %s9260_s4 = inlined_call_operand.vmem [shape: bf16[2,512,32], index: 4, kind: input, shape index: {}]   ;;  %s9261_s5 = inlined_call_operand.vmem [shape: bf16[2,32,512], index: 5, kind: input, shape index: {}]   ;;  %s9262_s6 = inlined_call_operand.vmem [shape: bf16[2,32,2048], index: 6, kind: input, shape index: {}]   ;;  %s9263_s7 = inlined_call_operand.vmem [shape: f32[2,1,2048], index: 7, kind: input, shape index: {}]   ;;  %s9264_s8 = inlined_call_operand.vmem [shape: bf16[2,2048,32], index: 8, kind: input, shape index: {}]   ;;  %s9265_s9 = inlined_call_operand.vmem [shape: f32[64,160], index: 9, kind: input, shape index: {}]   ;;  %s9266_s10 = inlined_call_operand.vmem [shape: f32[160,128], index: 10, kind: input, shape index: {}]   ;;  %s9267_s11 = inlined_call_operand.vmem [shape: f32[8,32], index: 11, kind: input, shape index: {}]   ;;  %s9268_s12 = inlined_call_operand.vmem [shape: f32[1,128], index: 12, kind: input, shape index: {}]   ;;  %s9269_s13 = inlined_call_operand.vmem [shape: f32[8,128], index: 13, kind: output, shape index: {}]  }
   0x1   :  { %9330 = sst [smem:[#allocation56_spill]] %s9258_s2 }
   0x2   :  { %9331 = sst [smem:[#allocation57_spill]] %s9259_s3 }
   0x3   :  { %9332 = sst [smem:[#allocation58_spill]] %s9260_s4 }
   0x4   :  { %9333 = sst [smem:[#allocation59_spill]] %s9269_s13 }
   0x5 LB: > { %9334 = sst [smem:[#allocation3_spill]] %s6882_s25  ;;  %s6963_s26 = sadd.s32 4294967295, %s6882_s25   ;;  %s6882_s25 = sphi %s6957_s25, %s23_s25  }
   0x6   : > { %p5484_p0 = scmp.ge.s32.totalorder %s6882_s25, 1  ;;  %p441_p1 = scmp.lt.s32.totalorder %s6882_s25, 3 }
   0x8   : > { %p442_p2 = pnand %p5484_p0, %p441_p1 }
   0xa   : > { %445 = sbr.rel (%p442_p2) target bundleno = 3152 (0xc50), region = 72 }
   0xf   : > { %p509_p3 = scmp.lt.s32.totalorder %s6963_s26, 1  ;;  %s9335_s2 = sld [smem:[#allocation56_spill]] }
  0x10   : > { %s9336_s3 = sld [smem:[#allocation57_spill]]  ;;  %p5498_p4 = scmp.ne.s32.totalorder %s6963_s26, 0 }
  0x11   : > { %s510_s27 = scalar_select %p509_p3, %s6963_s26, 1 }
  0x12   : > { %s9337_s4 = sld [smem:[#allocation58_spill]] }
  0x13   : > { %s5760_s28 = sshll.u32 %s510_s27, 7  ;;  %s5761_s29 = sshll.u32 %s510_s27, 8 }
  0x14   : > { %s5763_s22 = sshll.u32 %s510_s27, 6  ;;  %s5495_s14 = sshll.u32 %s510_s27, 4 }
  0x15   : > { %s6972_s15 = scalar_lea.vmem %s9335_s2, %s5760_s28  ;;  %s6987_s25 = scalar_lea.vmem %s9261_s5, %s5763_s22 }
  0x16   : > { %s6977_s18 = scalar_lea.vmem %s9336_s3, %s5761_s29  ;;  %s6992_s28 = scalar_lea.vmem %s9262_s6, %s5761_s29 }
  0x17   : > { %s5765_s16 = sshll.u32 %s510_s27, 10  ;;  %s6997_s3 = scalar_lea.vmem %s9263_s7, %s5495_s14 }
  0x18   : > { %s6982_s21 = scalar_lea.vmem %s9337_s4, %s5761_s29  ;;  %s7002_s4 = scalar_lea.vmem %s9264_s8, %s5765_s16 }
  0x19   : > { %547 = sbr.rel (%p5498_p4) target bundleno = 260 (0x104), region = 76 }
  0x1e   : > { %v567_v0 = vld [vmem:[%s9257_s1 + $0x78] sm:$0xff]  ;;  %v566_v1 = vld [vmem:[%s9257_s1 + $0x70] sm:$0xff]  ;;  %v565_v2 = vld [vmem:[%s9257_s1 + $0x68] sm:$0xff]  ;;  %vm653_vm0 = vcmask 261120  }
  0x1f   : > { %6264 = vmatprep.subr.mxu0 %v567_v0  ;;  %6381 = vmatprep.subr.mxu1 %v567_v0  ;;  %v564_v3 = vld [vmem:[%s9257_s1 + $0x60] sm:$0xff]  ;;  %v563_v4 = vld [vmem:[%s9257_s1 + $0x58] sm:$0xff]  ;;  %v562_v5 = vld [vmem:[%s9257_s1 + $0x50] sm:$0xff] }
  0x20   : > { %6265 = vmatpush3.msra.mxu0 %v567_v0  ;;  %6397 = vmatpush3.msra.mxu1 %v567_v0  ;;  %v561_v6 = vld [vmem:[%s9257_s1 + $0x48] sm:$0xff]  ;;  %v560_v7 = vld [vmem:[%s9257_s1 + $0x40] sm:$0xff]  ;;  %v559_v8 = vld [vmem:[%s9257_s1 + $0x38] sm:$0xff] }
  0x21   : > { %6266 = vmatprep.subr.mxu0 %v566_v1  ;;  %6382 = vmatprep.subr.mxu1 %v566_v1  ;;  %v558_v9 = vld [vmem:[%s9257_s1 + $0x30] sm:$0xff]  ;;  %v557_v10 = vld [vmem:[%s9257_s1 + $0x28] sm:$0xff]  ;;  %v556_v11 = vld [vmem:[%s9257_s1 + $0x20] sm:$0xff] }
  0x22   : > { %6267 = vmatpush3.msra.mxu0 %v566_v1  ;;  %6398 = vmatpush3.msra.mxu1 %v566_v1  ;;  %v555_v12 = vld [vmem:[%s9257_s1 + $0x18] sm:$0xff]  ;;  %v554_v13 = vld [vmem:[%s9257_s1 + $0x10] sm:$0xff]  ;;  %v553_v14 = vld [vmem:[%s9257_s1 + $0x8] sm:$0xff] }
  0x23   : > { %6268 = vmatprep.subr.mxu0 %v565_v2  ;;  %6383 = vmatprep.subr.mxu1 %v565_v2  ;;  %v552_v15 = vld [vmem:[%s9257_s1] sm:$0xff]  ;;  %v550_v17 = vld [vmem:[%s9256_s0 + $0x10] sm:$0xff]  ;;  %v549_v18 = vld [vmem:[%s9256_s0 + $0x8] sm:$0xff] }
  0x24   : > { %6269 = vmatpush3.msra.mxu0 %v565_v2  ;;  %6399 = vmatpush3.msra.mxu1 %v565_v2  ;;  %v548_v16 = vld [vmem:[%s9256_s0] sm:$0xff]  ;;  %v551_v19 = vld [vmem:[%s9256_s0 + $0x18] sm:$0xff] }
  0x25   : > { %6270 = vmatprep.subr.mxu0 %v564_v3  ;;  %6384 = vmatprep.subr.mxu1 %v564_v3 }
  0x26   : > { %6271 = vmatpush3.msra.mxu0 %v564_v3  ;;  %6400 = vmatpush3.msra.mxu1 %v564_v3 }
  0x27   : > { %6272 = vmatprep.subr.mxu0 %v563_v4  ;;  %6385 = vmatprep.subr.mxu1 %v563_v4 }
  0x28   : > { %6273 = vmatpush3.msra.mxu0 %v563_v4  ;;  %6401 = vmatpush3.msra.mxu1 %v563_v4 }
  0x29   : > { %6274 = vmatprep.subr.mxu0 %v562_v5  ;;  %6386 = vmatprep.subr.mxu1 %v562_v5 }
  0x2a   : > { %6275 = vmatpush3.msra.mxu0 %v562_v5  ;;  %6402 = vmatpush3.msra.mxu1 %v562_v5 }
  0x2b   : > { %6276 = vmatprep.subr.mxu0 %v561_v6  ;;  %6387 = vmatprep.subr.mxu1 %v561_v6 }
  0x2c   : > { %6277 = vmatpush3.msra.mxu0 %v561_v6  ;;  %6403 = vmatpush3.msra.mxu1 %v561_v6 }
  0x2d   : > { %6278 = vmatprep.subr.mxu0 %v560_v7  ;;  %6388 = vmatprep.subr.mxu1 %v560_v7 }
  0x2e   : > { %6279 = vmatpush3.msra.mxu0 %v560_v7  ;;  %6404 = vmatpush3.msra.mxu1 %v560_v7 }
  0x2f   : > { %6280 = vmatprep.subr.mxu0 %v559_v8  ;;  %6389 = vmatprep.subr.mxu1 %v559_v8 }
  0x30   : > { %6281 = vmatpush3.msra.mxu0 %v559_v8  ;;  %6405 = vmatpush3.msra.mxu1 %v559_v8 }
  0x31   : > { %6282 = vmatprep.subr.mxu0 %v558_v9  ;;  %6390 = vmatprep.subr.mxu1 %v558_v9 }
  0x32   : > { %6283 = vmatpush3.msra.mxu0 %v558_v9  ;;  %6406 = vmatpush3.msra.mxu1 %v558_v9 }
  0x33   : > { %6284 = vmatprep.subr.mxu0 %v557_v10  ;;  %6391 = vmatprep.subr.mxu1 %v557_v10 }
  0x34   : > { %6285 = vmatpush3.msra.mxu0 %v557_v10  ;;  %6407 = vmatpush3.msra.mxu1 %v557_v10 }
  0x35   : > { %6286 = vmatprep.subr.mxu0 %v556_v11  ;;  %6392 = vmatprep.subr.mxu1 %v556_v11 }
  0x36   : > { %6287 = vmatpush3.msra.mxu0 %v556_v11  ;;  %6408 = vmatpush3.msra.mxu1 %v556_v11 }
  0x37   : > { %6288 = vmatprep.subr.mxu0 %v555_v12  ;;  %6393 = vmatprep.subr.mxu1 %v555_v12 }
  0x38   : > { %6289 = vmatpush3.msra.mxu0 %v555_v12  ;;  %6409 = vmatpush3.msra.mxu1 %v555_v12 }
  0x39   : > { %6290 = vmatprep.subr.mxu0 %v554_v13  ;;  %6394 = vmatprep.subr.mxu1 %v554_v13 }
  0x3a   : > { %6291 = vmatpush3.msra.mxu0 %v554_v13  ;;  %6410 = vmatpush3.msra.mxu1 %v554_v13 }
  0x3b   : > { %6292 = vmatprep.subr.mxu0 %v553_v14  ;;  %6395 = vmatprep.subr.mxu1 %v553_v14 }
  0x3c   : > { %6293 = vmatpush3.msra.mxu0 %v553_v14  ;;  %6411 = vmatpush3.msra.mxu1 %v553_v14 }
  0x3d   : > { %6294 = vmatprep.subr.mxu0 %v552_v15  ;;  %6396 = vmatprep.subr.mxu1 %v552_v15 }
  0x3e   : > { %6295 = vmatpush3.msra.mxu0 %v552_v15  ;;  %6412 = vmatpush3.msra.mxu1 %v552_v15 }
  0x3f   : > { %6296 = vmatprep.mubr.f32.mxu0 %v548_v16  ;;  %6299 = vmatprep.mubr.f32.mxu1 %v550_v17 }
  0x40   : > { %6297 = vmatmul.mubr.f32.vlgmr.msra.gmra.mxu0 %v549_v18  ;;  %6300 = vmatmul.mubr.f32.vlgmr.msra.gmra.mxu1 %v551_v19 }
 0x100   : > { %v6298_v20 = vpop.f32.mrf.mxu0  ;;  %v6301_v21 = vpop.f32.mrf.mxu1 }
 0x101   : > { %655 = vst.msk [vmem:[#allocation2 + $0x8] sm:$0xff] %vm653_vm0, %v6298_v20  ;;  %657 = vst.msk [vmem:[#allocation2 + $0x18] sm:$0xff] %vm653_vm0, %v6301_v21 }
 0x102   : > { %v634_v22 = vpop.f32.mrf.mxu0  ;;  %v644_v23 = vpop.f32.mrf.mxu1 }
 0x103   : > { %654 = vst.msk [vmem:[#allocation2] sm:$0xff] %vm653_vm0, %v634_v22  ;;  %656 = vst.msk [vmem:[#allocation2 + $0x10] sm:$0xff] %vm653_vm0, %v644_v23 }
 0x104 PF: > { %vm678_vm1 = vcmask 261120   ;;  %v6424_v52 = vld [vmem:[%s6977_s18] sm:$0xff]   ;;  %v664_v3 = vld [vmem:[%s6972_s15 + $0x30] sm:$0xff]  ;;  %v665_v6 = vld [vmem:[%s6972_s15 + $0x38] sm:$0xff]  ;;  %p5747_p5 = scmp.ne.s32.totalorder %s6963_s26, 1 }
 0x105   : > { %6306 = vmatprep.mubr.msk.bf16.mxu0 %vm678_vm1, %v6424_v52  ;;  %v662_v10 = vld [vmem:[%s6972_s15 + $0x20] sm:$0xff]  ;;  %v668_v11 = vld [vmem:[%s6972_s15 + $0x50] sm:$0xff]  ;;  %v669_v12 = vld [vmem:[%s6972_s15 + $0x58] sm:$0xff]  ;;  %s9532_s14 = sld [smem:[#allocation59_spill]] (!%p5747_p5) }
 0x106   : > { %v663_v15 = vld [vmem:[%s6972_s15 + $0x28] sm:$0xff]  ;;  %v666_v20 = vld [vmem:[%s6972_s15 + $0x40] sm:$0xff]  ;;  %v6450_v52 = vld [vmem:[%s6977_s18 + $0xd0] sm:$0xff]  }
 0x107   : > { %v667_v21 = vld [vmem:[%s6972_s15 + $0x48] sm:$0xff] }
 0x108   : > { %v677_v25 = vld [vmem:[#allocation2 + $0x18] sm:$0xff]  ;;  %v675_v30 = vld [vmem:[#allocation2 + $0x8] sm:$0xff] }
 0x109   : > { %v688_v28 = vsel %vm678_vm1, %v677_v25, 0.0  ;;  %v682_v31 = vsel %vm678_vm1, %v675_v30, 0.0 }
 0x10a   : > { %v676_v24 = vld [vmem:[#allocation2 + $0x10] sm:$0xff]  ;;  %v674_v26 = vld [vmem:[#allocation2] sm:$0xff] }
 0x10b   : > { %v685_v27 = vsel %vm678_vm1, %v676_v24, 0.0  ;;  %v679_v29 = vsel %vm678_vm1, %v674_v26, 0.0 }
 0x10c   : > { %686 = vadd.xlane.f32.xlu0 %v685_v27  ;;  %680 = vadd.xlane.f32.xlu1 %v679_v29  ;;  %v6425_v27 = vld [vmem:[%s6977_s18 + $0x8] sm:$0xff]   ;;  %v6427_v29 = vld [vmem:[%s6977_s18 + $0x18] sm:$0xff]  }
 0x110   : > { %689 = vadd.xlane.f32.xlu0 %v688_v28  ;;  %683 = vadd.xlane.f32.xlu1 %v682_v31  ;;  %v6426_v28 = vld [vmem:[%s6977_s18 + $0x10] sm:$0xff]   ;;  %v6429_v31 = vld [vmem:[%s6977_s18 + $0x28] sm:$0xff]  }
 0x195   : > { %v687_v32 = vpop.xlane.xlu0 %686  ;;  %v681_v33 = vpop.xlane.xlu1 %680 }
 0x196   : > { %v694_v34 = vmul.f32 0.03125, %v687_v32  ;;  %v692_v35 = vmul.f32 0.03125, %v681_v33  ;;  %v6430_v32 = vld [vmem:[%s6977_s18 + $0x30] sm:$0xff]   ;;  %v6431_v33 = vld [vmem:[%s6977_s18 + $0x38] sm:$0xff]  }
 0x198   : > { %v698_v36 = vsub.f32 %v676_v24, %v694_v34  ;;  %v696_v37 = vsub.f32 %v674_v26, %v692_v35  ;;  %v6432_v34 = vld [vmem:[%s6977_s18 + $0x40] sm:$0xff]   ;;  %v6433_v35 = vld [vmem:[%s6977_s18 + $0x48] sm:$0xff]  }
 0x199   : > { %v690_v38 = vpop.xlane.xlu0 %689  ;;  %v684_v39 = vpop.xlane.xlu1 %683 }
 0x19a   : > { %v695_v40 = vmul.f32 0.03125, %v690_v38  ;;  %v702_v41 = vmul.f32 %v698_v36, %v698_v36  ;;  %v693_v42 = vmul.f32 0.03125, %v684_v39  ;;  %v700_v43 = vmul.f32 %v696_v37, %v696_v37  ;;  %v6436_v38 = vld [vmem:[%s6977_s18 + $0x60] sm:$0xff]   ;;  %v6437_v39 = vld [vmem:[%s6977_s18 + $0x68] sm:$0xff]  }
 0x19c   : > { %v699_v44 = vsub.f32 %v677_v25, %v695_v40  ;;  %v710_v45 = vsel %vm678_vm1, %v702_v41, 0.0  ;;  %v697_v46 = vsub.f32 %v675_v30, %v693_v42  ;;  %v704_v48 = vsel %vm678_vm1, %v700_v43, 0.0  ;;  %v6428_v30 = vld [vmem:[%s6977_s18 + $0x20] sm:$0xff]   ;;  %v6438_v40 = vld [vmem:[%s6977_s18 + $0x70] sm:$0xff]   ;;  %v6439_v41 = vld [vmem:[%s6977_s18 + $0x78] sm:$0xff]  }
 0x19d   : > { %711 = vadd.xlane.f32.xlu0 %v710_v45  ;;  %v6440_v42 = vld [vmem:[%s6977_s18 + $0x80] sm:$0xff]   ;;  %v6441_v43 = vld [vmem:[%s6977_s18 + $0x88] sm:$0xff]   ;;  %v6443_v45 = vld [vmem:[%s6977_s18 + $0x98] sm:$0xff]  }
 0x19e   : > { %v703_v47 = vmul.f32 %v699_v44, %v699_v44  ;;  %v701_v49 = vmul.f32 %v697_v46, %v697_v46 }
 0x1a0   : > { %v713_v50 = vsel %vm678_vm1, %v703_v47, 0.0  ;;  %v707_v51 = vsel %vm678_vm1, %v701_v49, 0.0  ;;  %v6445_v47 = vld [vmem:[%s6977_s18 + $0xa8] sm:$0xff]   ;;  %v6447_v49 = vld [vmem:[%s6977_s18 + $0xb8] sm:$0xff]  }
 0x1a1   : > { %714 = vadd.xlane.f32.xlu1 %v713_v50  ;;  %705 = vadd.xlane.f32.xlu0 %v704_v48  ;;  %v6446_v48 = vld [vmem:[%s6977_s18 + $0xb0] sm:$0xff]   ;;  %v6448_v50 = vld [vmem:[%s6977_s18 + $0xc0] sm:$0xff]  }
 0x1a5   : > { %708 = vadd.xlane.f32.xlu1 %v707_v51  ;;  %v6449_v51 = vld [vmem:[%s6977_s18 + $0xc8] sm:$0xff]  }
 0x226   : > { %v712_v53 = vpop.xlane.xlu0 %711 }
 0x227   : > { %v718_v54 = vmul.f32 0.03125, %v712_v53  ;;  %v6451_v53 = vld [vmem:[%s6977_s18 + $0xd8] sm:$0xff]  }
 0x229   : > { %v722_v55 = vadd.f32 1e-05, %v718_v54  ;;  %v6452_v54 = vld [vmem:[%s6977_s18 + $0xe0] sm:$0xff]  }
 0x22a   : > { %v706_v56 = vpop.xlane.xlu0 %705  ;;  %v715_v57 = vpop.xlane.xlu1 %714 }
 0x22b   : > { %6596 = vrsqrt.f32 %v722_v55  ;;  %v716_v58 = vmul.f32 0.03125, %v706_v56  ;;  %v719_v59 = vmul.f32 0.03125, %v715_v57  ;;  %v6453_v55 = vld [vmem:[%s6977_s18 + $0xe8] sm:$0xff]   ;;  %v6454_v56 = vld [vmem:[%s6977_s18 + $0xf0] sm:$0xff]   ;;  %v6455_v57 = vld [vmem:[%s6977_s18 + $0xf8] sm:$0xff]  }
 0x22d   : > { %v720_v60 = vadd.f32 1e-05, %v716_v58  ;;  %v723_v61 = vadd.f32 1e-05, %v719_v59  ;;  %v7158_v58 = vld [vmem:[%s6982_s21 + $0x8] sm:$0xff]   ;;  %v7161_v59 = vld [vmem:[%s6982_s21] sm:$0xff]  }
 0x22e   : > { %v709_v62 = vpop.xlane.xlu1 %708 }
 0x22f   : > { %6598 = vrsqrt.f32 %v720_v60  ;;  %v717_v63 = vmul.f32 0.03125, %v709_v62  ;;  %v7164_v60 = vld [vmem:[%s6982_s21 + $0x18] sm:$0xff]   ;;  %v7170_v62 = vld [vmem:[%s6982_s21 + $0x28] sm:$0xff]  }
 0x230   : > { %6600 = vrsqrt.f32 %v723_v61  ;;  %v7167_v61 = vld [vmem:[%s6982_s21 + $0x10] sm:$0xff]  }
 0x231   : > { %v721_v0 = vadd.f32 1e-05, %v717_v63  ;;  %v5772_v63 = vunpack.c.l.bf16 %v7158_v58 }
 0x233   : > { %6602 = vrsqrt.f32 %v721_v0  ;;  %v7174_v0 = vld [vmem:[%s6982_s21 + $0x20] sm:$0xff]  }
 0x238   : > { %v6597_v1 = vpop.eup %6596 }
 0x239   : > { %v730_v2 = vmul.f32 %v6597_v1, %v698_v36  ;;  %v6434_v36 = vld [vmem:[%s6977_s18 + $0x50] sm:$0xff]   ;;  %v7177_v1 = vld [vmem:[%s6982_s21 + $0x38] sm:$0xff]  }
 0x23b   : > { %v734_v9 = vmul.f32 %v730_v2, %v664_v3  ;;  %v5768_v2 = vunpack.c.l.bf16 %v7161_v59  ;;  %v5773_v3 = vunpack.c.h.bf16 %v7158_v58  ;;  %v7288_v58 = vld [vmem:[%s6982_s21 + $0xd8] sm:$0xff]  }
 0x23c   : > { %v6599_v4 = vpop.eup %6598 }
 0x23d   : > { %v6601_v5 = vpop.eup %6600  ;;  %v728_v7 = vmul.f32 %v6599_v4, %v696_v37  ;;  %v7081_v18 = vadd.f32 %v734_v9, %v668_v11  ;;  %v6435_v37 = vld [vmem:[%s6977_s18 + $0x58] sm:$0xff]   ;;  %v5769_v4 = vunpack.c.h.bf16 %v7161_v59  ;;  %v5781_v9 = vunpack.c.h.bf16 %v7164_v60 }
 0x23e   : > { %v731_v8 = vmul.f32 %v6601_v5, %v699_v44  ;;  %v6442_v44 = vld [vmem:[%s6977_s18 + $0x90] sm:$0xff]   ;;  %v5780_v5 = vunpack.c.l.bf16 %v7164_v60  ;;  %v5788_v11 = vunpack.c.l.bf16 %v7170_v62 }
 0x23f   : > { %v732_v17 = vmul.f32 %v728_v7, %v662_v10  ;;  %9338 = vst [vmem:[#allocation4_spill] sm:$0xff] %v7081_v18  ;;  %v7187_v7 = vld [vmem:[%s6982_s21 + $0x48] sm:$0xff]   ;;  %v5777_v10 = vunpack.c.h.bf16 %v7167_v61 }
 0x240   : > { %v6603_v13 = vpop.eup %6602  ;;  %v735_v14 = vmul.f32 %v731_v8, %v665_v6  ;;  %v7184_v6 = vld [vmem:[%s6982_s21 + $0x30] sm:$0xff]   ;;  %v5776_v8 = vunpack.c.l.bf16 %v7167_v61 }
 0x241   : > { %v729_v16 = vmul.f32 %v6603_v13, %v697_v46  ;;  %v7089_v24 = vadd.f32 %v732_v17, %v666_v20  ;;  %v6444_v46 = vld [vmem:[%s6977_s18 + $0xa0] sm:$0xff]   ;;  %v7197_v13 = vld [vmem:[%s6982_s21 + $0x58] sm:$0xff]   ;;  %v7204_v20 = vld [vmem:[%s6982_s21 + $0x50] sm:$0xff]  }
 0x242   : > { %v7083_v19 = vadd.f32 %v735_v14, %v669_v12  ;;  %v7194_v12 = vld [vmem:[%s6982_s21 + $0x40] sm:$0xff]   ;;  %v5784_v14 = vunpack.c.l.bf16 %v7174_v0 }
 0x243   : > { %v733_v22 = vmul.f32 %v729_v16, %v663_v15  ;;  %9340 = vst [vmem:[#allocation6_spill] sm:$0xff] %v7089_v24 }
 0x244   : > { %9339 = vst [vmem:[#allocation5_spill] sm:$0xff] %v7083_v19  ;;  %v805_v23 = vpack.c.bf16 %v7083_v19, %v7081_v18 }
 0x245   : > { %v7091_v25 = vadd.f32 %v733_v22, %v667_v21  ;;  %v7207_v21 = vld [vmem:[%s6982_s21 + $0x68] sm:$0xff]  }
 0x246   : > { %6302 = vmatprep.subr.bf16.mxu0 %v805_v23 }
 0x247   : > { %9341 = vst [vmem:[#allocation7_spill] sm:$0xff] %v7091_v25  ;;  %6303 = vmatpush3.bf16.msra.mxu0 %v805_v23  ;;  %v804_v26 = vpack.c.bf16 %v7091_v25, %v7089_v24  ;;  %v9362_v24 = vunpack.c.h.bf16 %v7194_v12 }
 0x249   : > { %6304 = vmatprep.subr.bf16.mxu0 %v804_v26 }
 0x24b   : > { %6305 = vmatpush3.bf16.msra.mxu0 %v804_v26 }
 0x24e   : > { %6307 = vmatmul.mubr.msk.bf16.vlgmr.msra.gmra.mxu0 %vm678_vm1, %v6425_v27 }
 0x24f   : > { %6310 = vmatprep.mubr.msk.bf16.mxu0 %vm678_vm1, %v6426_v28  ;;  %v7214_v28 = vld [vmem:[%s6982_s21 + $0x60] sm:$0xff]  }
 0x256   : > { %6311 = vmatmul.mubr.msk.bf16.gmra.mxu0 %vm678_vm1, %v6427_v29  ;;  %v7217_v29 = vld [vmem:[%s6982_s21 + $0x78] sm:$0xff]  }
 0x257   : > { %6314 = vmatprep.mubr.msk.bf16.mxu0 %vm678_vm1, %v6428_v30 }
 0x25e   : > { %6315 = vmatmul.mubr.msk.bf16.gmra.mxu0 %vm678_vm1, %v6429_v31 }
 0x25f   : > { %6318 = vmatprep.mubr.msk.bf16.mxu0 %vm678_vm1, %v6430_v32 }
 0x266   : > { %6319 = vmatmul.mubr.msk.bf16.gmra.mxu0 %vm678_vm1, %v6431_v33 }
 0x267   : > { %6322 = vmatprep.mubr.msk.bf16.mxu0 %vm678_vm1, %v6432_v34  ;;  %v7224_v34 = vld [vmem:[%s6982_s21 + $0x70] sm:$0xff]  }
 0x26e   : > { %6323 = vmatmul.mubr.msk.bf16.gmra.mxu0 %vm678_vm1, %v6433_v35 }
 0x26f   : > { %6326 = vmatprep.mubr.msk.bf16.mxu0 %vm678_vm1, %v6434_v36 }
 0x276   : > { %6327 = vmatmul.mubr.msk.bf16.gmra.mxu0 %vm678_vm1, %v6435_v37 }
 0x277   : > { %6330 = vmatprep.mubr.msk.bf16.mxu0 %vm678_vm1, %v6436_v38  ;;  %v7281_v38 = vld [vmem:[%s6982_s21 + $0xc0] sm:$0xff]  }
 0x27e   : > { %6331 = vmatmul.mubr.msk.bf16.gmra.mxu0 %vm678_vm1, %v6437_v39  ;;  %v7231_v39 = vld [vmem:[%s6982_s21 + $0x88] sm:$0xff]  }
 0x27f   : > { %6334 = vmatprep.mubr.msk.bf16.mxu0 %vm678_vm1, %v6438_v40  ;;  %v7234_v40 = vld [vmem:[%s6982_s21 + $0x80] sm:$0xff]  }
 0x286   : > { %6335 = vmatmul.mubr.msk.bf16.gmra.mxu0 %vm678_vm1, %v6439_v41 }
 0x287   : > { %6338 = vmatprep.mubr.msk.bf16.mxu0 %vm678_vm1, %v6440_v42  ;;  %v7278_v42 = vld [vmem:[%s6982_s21 + $0xc8] sm:$0xff]  }
 0x28e   : > { %6339 = vmatmul.mubr.msk.bf16.gmra.mxu0 %vm678_vm1, %v6441_v43 }
 0x28f   : > { %6342 = vmatprep.mubr.msk.bf16.mxu0 %vm678_vm1, %v6442_v44  ;;  %v7267_v44 = vld [vmem:[%s6982_s21 + $0xb0] sm:$0xff]  }
 0x296   : > { %6343 = vmatmul.mubr.msk.bf16.gmra.mxu0 %vm678_vm1, %v6443_v45  ;;  %v7264_v45 = vld [vmem:[%s6982_s21 + $0xb8] sm:$0xff]  }
 0x297   : > { %6346 = vmatprep.mubr.msk.bf16.mxu0 %vm678_vm1, %v6444_v46  ;;  %v7241_v46 = vld [vmem:[%s6982_s21 + $0x98] sm:$0xff]  }
 0x29e   : > { %6347 = vmatmul.mubr.msk.bf16.gmra.mxu0 %vm678_vm1, %v6445_v47  ;;  %v7244_v47 = vld [vmem:[%s6982_s21 + $0x90] sm:$0xff]  }
 0x29f   : > { %6350 = vmatprep.mubr.msk.bf16.mxu0 %vm678_vm1, %v6446_v48 }
 0x2a6   : > { %6351 = vmatmul.mubr.msk.bf16.gmra.mxu0 %vm678_vm1, %v6447_v49 }
 0x2a7   : > { %6354 = vmatprep.mubr.msk.bf16.mxu0 %vm678_vm1, %v6448_v50 }
 0x2ae   : > { %6355 = vmatmul.mubr.msk.bf16.gmra.mxu0 %vm678_vm1, %v6449_v51 }
 0x2af   : > { %6358 = vmatprep.mubr.msk.bf16.mxu0 %vm678_vm1, %v6450_v52  ;;  %v7250_v52 = vld [vmem:[%s6982_s21 + $0xa8] sm:$0xff]  }
 0x2b6   : > { %6359 = vmatmul.mubr.msk.bf16.gmra.mxu0 %vm678_vm1, %v6451_v53  ;;  %v7253_v53 = vld [vmem:[%s6982_s21 + $0xa0] sm:$0xff]  }
 0x2b7   : > { %6362 = vmatprep.mubr.msk.bf16.mxu0 %vm678_vm1, %v6452_v54 }
 0x2be   : > { %6363 = vmatmul.mubr.msk.bf16.gmra.mxu0 %vm678_vm1, %v6453_v55 }
 0x2bf   : > { %6366 = vmatprep.mubr.msk.bf16.mxu0 %vm678_vm1, %v6454_v56 }
 0x2c6   : > { %6367 = vmatmul.mubr.msk.bf16.gmra.mxu0 %vm678_vm1, %v6455_v57 }
 0x30e   : > { %v6308_v41 = vpop.f32.mrf.mxu0 }
 0x30f   : > { %v1233_v48 = vadd.f32 %v6308_v41, %v5772_v63 }
 0x310   : > { %v1224_v54 = vpop.f32.mrf.mxu0 }
 0x311   : > { %v1545_v41 = vmul.f32 0.044715, %v1233_v48  ;;  %v7259_v49 = vadd.f32 %v5768_v2, %v1224_v54  ;;  %v7318_v32 = vmul.f32 0.5, %v1233_v48 }
 0x312   : > { %v6309_v55 = vpop.f32.mrf.mxu0 }
 0x313   : > { %v1609_v54 = vmul.f32 %v1545_v41, %v1233_v48  ;;  %v1236_v51 = vadd.f32 %v6309_v55, %v5773_v3  ;;  %v1543_v56 = vmul.f32 0.044715, %v7259_v49  ;;  %v7291_v3 = vld [vmem:[%s6982_s21 + $0xd0] sm:$0xff]   ;;  %9343 = vst [vmem:[#allocation9_spill] sm:$0xff] %v7318_v32  ;;  %v7323_v27 = vmul.f32 0.5, %v7259_v49 }
 0x314   : > { %v1227_v37 = vpop.f32.mrf.mxu0 }
 0x315   : > { %v1673_v55 = vmul.f32 %v1609_v54, %v1233_v48  ;;  %v1546_v43 = vmul.f32 0.044715, %v1236_v51  ;;  %v7295_v50 = vadd.f32 %v5769_v4, %v1227_v37  ;;  %v7307_v4 = vld [vmem:[%s6982_s21 + $0xe8] sm:$0xff]   ;;  %v7310_v37 = vld [vmem:[%s6982_s21 + $0xe0] sm:$0xff]   ;;  %v1607_v63 = vmul.f32 %v1543_v56, %v7259_v49  ;;  %9344 = vst [vmem:[#allocation10_spill] sm:$0xff] %v7323_v27 }
 0x316   : > { %v6312_v36 = vpop.f32.mrf.mxu0  ;;  %9342 = vst [vmem:[#allocation8_spill] sm:$0xff] %v7310_v37  ;;  %v7327_v23 = vmul.f32 0.5, %v1236_v51 }
 0x317   : > { %v1610_v33 = vmul.f32 %v1546_v43, %v1236_v51  ;;  %v1249_v54 = vadd.f32 %v6312_v36, %v5780_v5  ;;  %v1544_v57 = vmul.f32 0.044715, %v7295_v50  ;;  %v1737_v35 = vadd.f32 %v1673_v55, %v1233_v48 }
 0x318   : > { %v1240_v2 = vpop.f32.mrf.mxu0  ;;  %9345 = vst [vmem:[#allocation11_spill] sm:$0xff] %v7327_v23  ;;  %v7332_v30 = vmul.f32 0.5, %v7295_v50 }
 0x319   : > { %v1549_v43 = vmul.f32 0.044715, %v1249_v54  ;;  %v1241_v5 = vadd.f32 %v5776_v8, %v1240_v2  ;;  %v1674_v59 = vmul.f32 %v1610_v33, %v1236_v51  ;;  %v1671_v8 = vmul.f32 %v1607_v63, %v7259_v49 }
 0x31a   : > { %v6313_v31 = vpop.f32.mrf.mxu0  ;;  %v1608_v48 = vmul.f32 %v1544_v57, %v7295_v50  ;;  %v1801_v2 = vmul.f32 0.7978846, %v1737_v35  ;;  %9346 = vst [vmem:[#allocation12_spill] sm:$0xff] %v7332_v30  ;;  %v7336_v60 = vmul.f32 0.5, %v1249_v54 }
 0x31b   : > { %v1613_v26 = vmul.f32 %v1549_v43, %v1249_v54  ;;  %v1547_v41 = vmul.f32 0.044715, %v1241_v5  ;;  %v1252_v55 = vadd.f32 %v6313_v31, %v5781_v9  ;;  %v1738_v63 = vadd.f32 %v1674_v59, %v1236_v51 }
 0x31c   : > { %v1243_v33 = vpop.f32.mrf.mxu0  ;;  %6604 = vtanh.f32 %v1801_v2 }
 0x31d   : > { %v1677_v56 = vmul.f32 %v1613_v26, %v1249_v54  ;;  %v1611_v36 = vmul.f32 %v1547_v41, %v1241_v5  ;;  %v1550_v22 = vmul.f32 0.044715, %v1252_v55  ;;  %v1244_v43 = vadd.f32 %v5777_v10, %v1243_v33 }
 0x31e   : > { %v6316_v17 = vpop.f32.mrf.mxu0  ;;  %v1672_v26 = vmul.f32 %v1608_v48, %v7295_v50  ;;  %v7345_v10 = vmul.f32 0.5, %v1241_v5  ;;  %v7360_v18 = vmul.f32 0.5, %v1252_v55 }
 0x31f   : > { %v1675_v57 = vmul.f32 %v1611_v36, %v1241_v5  ;;  %v1614_v16 = vmul.f32 %v1550_v22, %v1252_v55  ;;  %v1548_v35 = vmul.f32 0.044715, %v1244_v43  ;;  %v7342_v15 = vadd.f32 %v6316_v17, %v5788_v11 }
 0x320   : > { %v1256_v41 = vpop.f32.mrf.mxu0  ;;  %v1741_v61 = vadd.f32 %v1677_v56, %v1249_v54  ;;  %v1802_v17 = vmul.f32 0.7978846, %v1738_v63  ;;  %v1735_v36 = vadd.f32 %v1671_v8, %v7259_v49 }
 0x321   : > { %v1678_v33 = vmul.f32 %v1614_v16, %v1252_v55  ;;  %v1612_v9 = vmul.f32 %v1548_v35, %v1244_v43  ;;  %v1553_v31 = vmul.f32 0.044715, %v7342_v15  ;;  %v7350_v22 = vadd.f32 %v5784_v14, %v1256_v41  ;;  %v6458_v35 = vld [vmem:[%s6987_s25 + $0x4] ss:$16 sps:$4 sm:$0xff]  }
 0x322   : > { %v6317_v51 = vpop.f32.mrf.mxu0  ;;  %v1805_v59 = vmul.f32 0.7978846, %v1741_v61  ;;  %v1739_v11 = vadd.f32 %v1675_v57, %v1241_v5  ;;  %v9347_v16 = vunpack.c.h.bf16 %v7170_v62  ;;  %v7363_v5 = vadd.f32 %v1672_v26, %v7295_v50  ;;  %2167 = vmatprep.mubr.bf16.mxu1 %v6458_v35  ;;  %v7390_v35 = vld [vmem:[%s6982_s21 + $0xf8] sm:$0xff]  }
 0x323   : > { %v1676_v48 = vmul.f32 %v1612_v9, %v1244_v43  ;;  %v1617_v54 = vmul.f32 %v1553_v31, %v7342_v15  ;;  %v1551_v56 = vmul.f32 0.044715, %v7350_v22  ;;  %v1742_v14 = vadd.f32 %v1678_v33, %v1252_v55  ;;  %9353 = vst [vmem:[#allocation15_spill] sm:$0xff] %v7390_v35 }
 0x324   : > { %v7357_v2 = vadd.f32 %v6317_v51, %v9347_v16  ;;  %v1259_v19 = vpop.f32.mrf.mxu0  ;;  %6606 = vtanh.f32 %v1805_v59  ;;  %9348 = vst [vmem:[#allocation13_spill] sm:$0xff] %v7363_v5  ;;  %v9349_v31 = vunpack.c.h.bf16 %v7174_v0  ;;  %v1803_v55 = vmul.f32 0.7978846, %v1739_v11 }
 0x325   : > { %v1681_v49 = vmul.f32 %v1617_v54, %v7342_v15  ;;  %v1615_v8 = vmul.f32 %v1551_v56, %v7350_v22  ;;  %v1806_v57 = vmul.f32 0.7978846, %v1742_v14  ;;  %v1740_v41 = vadd.f32 %v1676_v48, %v1244_v43 }
 0x326   : > { %v1554_v9 = vmul.f32 0.044715, %v7357_v2  ;;  %v7370_v62 = vadd.f32 %v9349_v31, %v1259_v19  ;;  %v6320_v63 = vpop.f32.mrf.mxu0  ;;  %6608 = vtanh.f32 %v1802_v17  ;;  %v9350_v33 = vunpack.c.l.bf16 %v7177_v1 }
 0x327   : > { %v1679_v50 = vmul.f32 %v1615_v8, %v7350_v22  ;;  %v1745_v19 = vadd.f32 %v1681_v49, %v7342_v15  ;;  %6610 = vtanh.f32 %v1806_v57  ;;  %v1804_v59 = vmul.f32 0.7978846, %v1740_v41 }
 0x328   : > { %v1618_v26 = vmul.f32 %v1554_v9, %v7357_v2  ;;  %v1552_v61 = vmul.f32 0.044715, %v7370_v62  ;;  %v7377_v51 = vadd.f32 %v6320_v63, %v9350_v33  ;;  %v1272_v0 = vpop.f32.mrf.mxu0  ;;  %v7380_v54 = vmul.f32 0.7978846, %v1735_v36 }
 0x329   : > { %v9352_v56 = vunpack.c.l.bf16 %v7184_v6  ;;  %v1809_v8 = vmul.f32 0.7978846, %v1745_v19  ;;  %v1743_v49 = vadd.f32 %v1679_v50, %v7350_v22  ;;  %v7393_v9 = vmul.f32 0.5, %v1244_v43  ;;  %v7404_v50 = vpop.eup %6604 }
 0x32a   : > { %9351 = vst [vmem:[#allocation14_spill] sm:$0xff] %v7380_v54  ;;  %v1682_v11 = vmul.f32 %v1618_v26, %v7357_v2  ;;  %v1616_v17 = vmul.f32 %v1552_v61, %v7370_v62  ;;  %v1557_v48 = vmul.f32 0.044715, %v7377_v51  ;;  %v6321_v14 = vpop.f32.mrf.mxu0  ;;  %6612 = vtanh.f32 %v1803_v55 }
 0x32b   : > { %v7387_v16 = vadd.f32 %v9352_v56, %v1272_v0  ;;  %v9354_v57 = vunpack.c.h.bf16 %v7177_v1  ;;  %6614 = vtanh.f32 %v1809_v8  ;;  %v1807_v33 = vmul.f32 0.7978846, %v1743_v49 }
 0x32c   : > { %v1680_v36 = vmul.f32 %v1616_v17, %v7370_v62  ;;  %v1621_v31 = vmul.f32 %v1557_v48, %v7377_v51  ;;  %v1275_v26 = vpop.f32.mrf.mxu0  ;;  %v1746_v61 = vadd.f32 %v1682_v11, %v7357_v2  ;;  %v9355_v19 = vunpack.c.h.bf16 %v7184_v6 }
 0x32d   : > { %v1555_v63 = vmul.f32 0.044715, %v7387_v16  ;;  %v7400_v41 = vadd.f32 %v6321_v14, %v9354_v57  ;;  %6616 = vtanh.f32 %v1804_v59  ;;  %v7415_v14 = vld [vmem:[%s6982_s21 + $0xf0] sm:$0xff]   ;;  %v9357_v6 = vunpack.c.l.bf16 %v7187_v7 }
 0x32e   : > { %v7410_v17 = vadd.f32 %v9355_v19, %v1275_v26  ;;  %v6324_v1 = vpop.f32.mrf.mxu0  ;;  %v1685_v48 = vmul.f32 %v1621_v31, %v7377_v51  ;;  %v1810_v56 = vmul.f32 0.7978846, %v1746_v61  ;;  %v1744_v11 = vadd.f32 %v1680_v36, %v7370_v62  ;;  %9356 = vst [vmem:[#allocation16_spill] sm:$0xff] %v7415_v14 }
 0x32f   : > { %v1619_v55 = vmul.f32 %v1555_v63, %v7387_v16  ;;  %v1558_v0 = vmul.f32 0.044715, %v7400_v41  ;;  %6618 = vtanh.f32 %v1807_v33  ;;  %v7422_v57 = vadd.f32 %v6324_v1, %v9357_v6 }
 0x330   : > { %v1556_v63 = vmul.f32 0.044715, %v7410_v17  ;;  %v1288_v59 = vpop.f32.mrf.mxu0  ;;  %v1749_v26 = vadd.f32 %v1685_v48, %v7377_v51  ;;  %v7426_v31 = vmul.f32 0.5, %v7342_v15  ;;  %6620 = vtanh.f32 %v1810_v56 }
 0x331   : > { %v1683_v8 = vmul.f32 %v1619_v55, %v7387_v16  ;;  %v1622_v49 = vmul.f32 %v1558_v0, %v7400_v41  ;;  %v1808_v36 = vmul.f32 0.7978846, %v1744_v11  ;;  %v6607_v61 = vpop.eup %6606  ;;  %v9358_v55 = vunpack.c.l.bf16 %v7194_v12 }
 0x332   : > { %v1620_v33 = vmul.f32 %v1556_v63, %v7410_v17  ;;  %v6325_v6 = vpop.f32.mrf.mxu0  ;;  %v1813_v43 = vmul.f32 0.7978846, %v1749_v26  ;;  %v7437_v15 = vmul.f32 0.5, %v7350_v22  ;;  %v1561_v63 = vmul.f32 0.044715, %v7422_v57 }
 0x333   : > { %v7431_v0 = vadd.f32 %v9358_v55, %v1288_v59  ;;  %v1686_v19 = vmul.f32 %v1622_v49, %v7400_v41  ;;  %v1747_v48 = vadd.f32 %v1683_v8, %v7387_v16  ;;  %6622 = vtanh.f32 %v1808_v36  ;;  %v7439_v56 = vpop.eup %6608 }
 0x334   : > { %9360 = vst [vmem:[#allocation18_spill] sm:$0xff] %v7439_v56  ;;  %v1684_v11 = vmul.f32 %v1620_v33, %v7410_v17  ;;  %v9361_v59 = vunpack.c.h.bf16 %v7187_v7  ;;  %v1933_v49 = vadd.f32 1.0, %v6607_v61  ;;  %v1291_v26 = vpop.f32.mrf.mxu0  ;;  %6624 = vtanh.f32 %v1813_v43  ;;  %v6611_v25 = vpop.eup %6610 }
 0x335   : > { %9359 = vst [vmem:[#allocation17_spill] sm:$0xff] %v7431_v0  ;;  %v1559_v1 = vmul.f32 0.044715, %v7431_v0  ;;  %v1750_v8 = vadd.f32 %v1686_v19, %v7400_v41  ;;  %v1811_v22 = vmul.f32 0.7978846, %v1747_v48  ;;  %v7452_v33 = vadd.f32 %v9362_v24, %v1291_v26 }
 0x336   : > { %v7445_v55 = vadd.f32 %v6325_v6, %v9361_v59  ;;  %v7455_v30 = vmul.f32 0.5, %v7357_v2  ;;  %v7458_v7 = vmul.f32 0.5, %v7370_v62  ;;  %v6328_v61 = vpop.f32.mrf.mxu0  ;;  %v1748_v59 = vadd.f32 %v1684_v11, %v7410_v17 }
 0x337   : > { %9363 = vst [vmem:[#allocation19_spill] sm:$0xff] %v7452_v33  ;;  %v1814_v6 = vmul.f32 0.7978846, %v1750_v8  ;;  %6626 = vtanh.f32 %v1811_v22  ;;  %v1934_v43 = vadd.f32 1.0, %v6611_v25  ;;  %v6613_v19 = vpop.eup %6612  ;;  %v1625_v48 = vmul.f32 %v1561_v63, %v7422_v57 }
 0x338   : > { %v1562_v36 = vmul.f32 0.044715, %v7445_v55  ;;  %v1560_v27 = vmul.f32 0.044715, %v7452_v33  ;;  %v9364_v24 = vunpack.c.l.bf16 %v7197_v13  ;;  %v7468_v2 = vmul.f32 %v1933_v49, %v7336_v60  ;;  %v1304_v26 = vpop.f32.mrf.mxu0  ;;  %v6615_v25 = vpop.eup %6614 }
 0x339   : > { %v1623_v62 = vmul.f32 %v1559_v1, %v7431_v0  ;;  %6628 = vtanh.f32 %v1814_v6  ;;  %v1812_v8 = vmul.f32 0.7978846, %v1748_v59  ;;  %v7472_v11 = vmul.f32 %v1934_v43, %v7360_v18 }
 0x33a   : > { %v7465_v12 = vadd.f32 %v6328_v61, %v9364_v24  ;;  %9365 = vst [vmem:[#allocation20_spill] sm:$0xff] %v7468_v2  ;;  %v1626_v63 = vmul.f32 %v1562_v36, %v7445_v55  ;;  %v9367_v54 = vunpack.c.l.bf16 %v7204_v20  ;;  %v7481_v60 = vmul.f32 0.5, %v7377_v51  ;;  %v6617_v49 = vpop.eup %6616  ;;  %v6329_v6 = vpop.f32.mrf.mxu0 }
 0x33b   : > { %9366 = vst [vmem:[#allocation21_spill] sm:$0xff] %v7472_v11  ;;  %v1624_v1 = vmul.f32 %v1560_v27, %v7452_v33  ;;  %v7485_v59 = vmul.f32 0.5, %v7387_v16  ;;  %6630 = vtanh.f32 %v1812_v8  ;;  %v7495_v51 = vmul.f32 0.5, %v7400_v41 }
 0x33c   : > { %v1565_v22 = vmul.f32 0.044715, %v7465_v12  ;;  %v7478_v61 = vadd.f32 %v9367_v54, %v1304_v26  ;;  %v6619_v36 = vpop.eup %6618  ;;  %v9368_v54 = vunpack.c.h.bf16 %v7197_v13  ;;  %v1937_v26 = vadd.f32 1.0, %v6615_v25  ;;  %v1307_v18 = vpop.f32.mrf.mxu0 }
 0x33d   : > { %v7498_v27 = vmul.f32 %v1625_v48, %v7422_v57  ;;  %v7501_v16 = vmul.f32 %v1623_v62, %v7431_v0  ;;  %v7505_v2 = vmul.f32 0.5, %v7410_v17  ;;  %v6621_v11 = vpop.eup %6620  ;;  %v7508_v13 = vmul.f32 %v1626_v63, %v7445_v55 }
 0x33e   : > { %v1563_v43 = vmul.f32 0.044715, %v7478_v61  ;;  %v7492_v24 = vadd.f32 %v6329_v6, %v9368_v54  ;;  %v1629_v8 = vmul.f32 %v1565_v22, %v7465_v12  ;;  %v9370_v41 = vunpack.c.h.bf16 %v7204_v20  ;;  %v6332_v5 = vpop.f32.mrf.mxu0 }
 0x33f   : > { %9369 = vst [vmem:[#allocation22_spill] sm:$0xff] %v7501_v16  ;;  %v1935_v25 = vadd.f32 1.0, %v6619_v36  ;;  %v1931_v48 = vadd.f32 1.0, %v6613_v19  ;;  %v7515_v54 = vmul.f32 %v1624_v1, %v7452_v33  ;;  %v7520_v17 = vmul.f32 0.5, %v7465_v12 }
 0x340   : > { %v7512_v6 = vadd.f32 %v9370_v41, %v1307_v18  ;;  %v1627_v62 = vmul.f32 %v1563_v43, %v7478_v61  ;;  %v1566_v22 = vmul.f32 0.044715, %v7492_v24  ;;  %v6623_v14 = vpop.eup %6622  ;;  %v9373_v20 = vunpack.c.l.bf16 %v7207_v21  ;;  %v1320_v43 = vpop.f32.mrf.mxu0 }
 0x341   : > { %9371 = vst [vmem:[#allocation23_spill] sm:$0xff] %v7515_v54  ;;  %9372 = vst [vmem:[#allocation24_spill] sm:$0xff] %v7520_v17  ;;  %v7526_v36 = vmul.f32 %v1937_v26, %v7426_v31  ;;  %v7529_v19 = vmul.f32 0.5, %v7478_v61  ;;  %v1693_v1 = vmul.f32 %v1629_v8, %v7465_v12  ;;  %v1938_v41 = vadd.f32 1.0, %v6621_v11  ;;  %v6625_v17 = vpop.eup %6624 }
 0x342   : > { %v1564_v63 = vmul.f32 0.044715, %v7512_v6  ;;  %v1329_v18 = vadd.f32 %v6332_v5, %v9373_v20  ;;  %v1936_v35 = vadd.f32 1.0, %v6623_v14  ;;  %v7532_v54 = vadd.f32 1.0, %v6617_v49  ;;  %v6333_v14 = vpop.f32.mrf.mxu0 }
 0x343   : > { %9374 = vst [vmem:[#allocation25_spill] sm:$0xff] %v7529_v19  ;;  %v9375_v16 = vunpack.c.l.bf16 %v7214_v28  ;;  %v7539_v5 = vmul.f32 %v1935_v25, %v7437_v15  ;;  %v7542_v31 = vmul.f32 0.5, %v7492_v24  ;;  %v7545_v26 = vmul.f32 %v1627_v62, %v7478_v61 }
 0x344   : > { %v1569_v33 = vmul.f32 0.044715, %v1329_v18  ;;  %v1630_v11 = vmul.f32 %v1566_v22, %v7492_v24  ;;  %v7549_v49 = vmul.f32 %v1936_v35, %v7458_v7  ;;  %v7552_v8 = vmul.f32 %v1931_v48, %v7345_v10  ;;  %v1323_v62 = vpop.f32.mrf.mxu0 }
 0x345   : > { %v7536_v0 = vadd.f32 %v9375_v16, %v1320_v43  ;;  %9376 = vst [vmem:[#allocation26_spill] sm:$0xff] %v7539_v5  ;;  %9377 = vst [vmem:[#allocation27_spill] sm:$0xff] %v7542_v31  ;;  %v6627_v16 = vpop.eup %6626  ;;  %v1628_v20 = vmul.f32 %v1564_v63, %v7512_v6  ;;  %v9380_v43 = vunpack.c.h.bf16 %v7207_v21  ;;  %v1941_v31 = vadd.f32 1.0, %v6625_v17 }
 0x346   : > { %9378 = vst [vmem:[#allocation28_spill] sm:$0xff] %v7549_v49  ;;  %9379 = vst [vmem:[#allocation29_spill] sm:$0xff] %v7552_v8  ;;  %v1633_v15 = vmul.f32 %v1569_v33, %v1329_v18  ;;  %v1939_v32 = vadd.f32 1.0, %v6627_v16  ;;  %v7559_v22 = vmul.f32 %v1938_v41, %v7455_v30  ;;  %v6629_v10 = vpop.eup %6628  ;;  %v9381_v63 = vunpack.c.h.bf16 %v7214_v28 }
 0x347   : > { %v1567_v25 = vmul.f32 0.044715, %v7536_v0  ;;  %v1332_v19 = vadd.f32 %v6333_v14, %v9380_v43  ;;  %v7568_v23 = vadd.f32 %v1693_v1, %v7465_v12  ;;  %v1694_v21 = vmul.f32 %v1630_v11, %v7492_v24  ;;  %v6336_v14 = vpop.f32.mrf.mxu0 }
 0x348   : > { %v1697_v7 = vmul.f32 %v1633_v15, %v1329_v18  ;;  %v7565_v33 = vadd.f32 %v9381_v63, %v1323_v62  ;;  %v1942_v30 = vadd.f32 1.0, %v6629_v10  ;;  %v7573_v41 = vmul.f32 0.5, %v7512_v6  ;;  %v6631_v16 = vpop.eup %6630 }
 0x349   : > { %v1570_v48 = vmul.f32 0.044715, %v1332_v19  ;;  %v1631_v17 = vmul.f32 %v1567_v25, %v7536_v0  ;;  %v7576_v15 = vmul.f32 %v1628_v20, %v7512_v6  ;;  %v9383_v28 = vunpack.c.l.bf16 %v7217_v29  ;;  %v1336_v1 = vpop.f32.mrf.mxu0 }
 0x34a   : > { %9382 = vst [vmem:[#allocation30_spill] sm:$0xff] %v7573_v41  ;;  %v7580_v63 = vmul.f32 0.5, %v1329_v18  ;;  %v1568_v12 = vmul.f32 0.044715, %v7565_v33  ;;  %v7584_v11 = vmul.f32 %v1941_v31, %v7481_v60  ;;  %v7587_v25 = vmul.f32 %v1939_v32, %v7485_v59 }
 0x34b   : > { %v1634_v43 = vmul.f32 %v1570_v48, %v1332_v19  ;;  %v1345_v62 = vadd.f32 %v6336_v14, %v9383_v28  ;;  %v1761_v10 = vadd.f32 %v1697_v7, %v1329_v18  ;;  %v9384_v20 = vunpack.c.l.bf16 %v7224_v34  ;;  %v6337_v28 = vpop.f32.mrf.mxu0 }
 0x34c   : > { %v7592_v5 = vmul.f32 %v1942_v30, %v7495_v51  ;;  %v1695_v14 = vmul.f32 %v1631_v17, %v7536_v0  ;;  %v1940_v49 = vadd.f32 1.0, %v6631_v16  ;;  %v7595_v8 = vmul.f32 0.5, %v1332_v19 }
 0x34d   : > { %v1698_v35 = vmul.f32 %v1634_v43, %v1332_v19  ;;  %v1573_v41 = vmul.f32 0.044715, %v1345_v62  ;;  %v1337_v48 = vadd.f32 %v9384_v20, %v1336_v1  ;;  %v1825_v60 = vmul.f32 0.7978846, %v1761_v10  ;;  %v1339_v1 = vpop.f32.mrf.mxu0 }
 0x34e   : > { %v9385_v32 = vunpack.c.h.bf16 %v7217_v29  ;;  %v7600_v7 = vadd.f32 %v1694_v21, %v7492_v24  ;;  %v1632_v43 = vmul.f32 %v1568_v12, %v7565_v33  ;;  %v7603_v51 = vmul.f32 0.5, %v1345_v62 }
 0x34f   : > { %v1571_v31 = vmul.f32 0.044715, %v1337_v48  ;;  %v1637_v18 = vmul.f32 %v1573_v41, %v1345_v62  ;;  %v1762_v30 = vadd.f32 %v1698_v35, %v1332_v19  ;;  %6632 = vtanh.f32 %v1825_v60 }
 0x350   : > { %v1348_v59 = vadd.f32 %v6337_v28, %v9385_v32  ;;  %v9386_v20 = vunpack.c.h.bf16 %v7224_v34  ;;  %v6340_v28 = vpop.f32.mrf.mxu0  ;;  %v7610_v24 = vmul.f32 %v1940_v49, %v7505_v2  ;;  %v1759_v12 = vadd.f32 %v1695_v14, %v7536_v0 }
 0x351   : > { %v1635_v17 = vmul.f32 %v1571_v31, %v1337_v48  ;;  %v1701_v41 = vmul.f32 %v1637_v18, %v1345_v62  ;;  %v1826_v21 = vmul.f32 0.7978846, %v1762_v30  ;;  %v9387_v19 = vunpack.c.l.bf16 %v7231_v39 }
 0x352   : > { %v1574_v16 = vmul.f32 0.044715, %v1348_v59  ;;  %v1340_v10 = vadd.f32 %v9386_v20, %v1339_v1  ;;  %v1696_v34 = vmul.f32 %v1632_v43, %v7565_v33  ;;  %v1352_v31 = vpop.f32.mrf.mxu0  ;;  %v7618_v20 = vmul.f32 0.5, %v1337_v48 }
 0x353   : > { %v1699_v32 = vmul.f32 %v1635_v17, %v1337_v48  ;;  %v7615_v35 = vadd.f32 %v6340_v28, %v9387_v19  ;;  %v1765_v1 = vadd.f32 %v1701_v41, %v1345_v62  ;;  %6634 = vtanh.f32 %v1826_v21 }
 0x354   : > { %v1572_v56 = vmul.f32 0.044715, %v1340_v10  ;;  %v1638_v60 = vmul.f32 %v1574_v16, %v1348_v59  ;;  %v9389_v49 = vunpack.c.l.bf16 %v7234_v40  ;;  %v6341_v17 = vpop.f32.mrf.mxu0  ;;  %v1823_v43 = vmul.f32 0.7978846, %v1759_v12 }
 0x355   : > { %9388 = vst [vmem:[#allocation31_spill] sm:$0xff] %v7615_v35  ;;  %v1577_v2 = vmul.f32 0.044715, %v7615_v35  ;;  %v1829_v29 = vmul.f32 0.7978846, %v1765_v1  ;;  %v1763_v28 = vadd.f32 %v1699_v32, %v1337_v48  ;;  %v7636_v48 = vadd.f32 %v1696_v34, %v7565_v33 }
 0x356   : > { %v1636_v18 = vmul.f32 %v1572_v56, %v1340_v10  ;;  %v7623_v14 = vadd.f32 %v9389_v49, %v1352_v31  ;;  %v1702_v30 = vmul.f32 %v1638_v60, %v1348_v59  ;;  %v9391_v56 = vunpack.c.h.bf16 %v7231_v39  ;;  %v1355_v37 = vpop.f32.mrf.mxu0 }
 0x357   : > { %v1641_v62 = vmul.f32 %v1577_v2, %v7615_v35  ;;  %v7633_v31 = vmul.f32 0.5, %v1348_v59  ;;  %6636 = vtanh.f32 %v1829_v29 }
 0x358   : > { %9390 = vst [vmem:[#allocation32_spill] sm:$0xff] %v7623_v14  ;;  %v1700_v19 = vmul.f32 %v1636_v18, %v1340_v10  ;;  %v1575_v41 = vmul.f32 0.044715, %v7623_v14  ;;  %v7631_v21 = vadd.f32 %v6341_v17, %v9391_v56  ;;  %v1766_v60 = vadd.f32 %v1702_v30, %v1348_v59  ;;  %v6344_v39 = vpop.f32.mrf.mxu0 }
 0x359   : > { %v1705_v32 = vmul.f32 %v1641_v62, %v7615_v35  ;;  %v9393_v18 = vunpack.c.h.bf16 %v7234_v40  ;;  %v1827_v56 = vmul.f32 0.7978846, %v1763_v28  ;;  %6638 = vtanh.f32 %v1823_v43 }
 0x35a   : > { %9392 = vst [vmem:[#allocation33_spill] sm:$0xff] %v7631_v21  ;;  %v1639_v12 = vmul.f32 %v1575_v41, %v7623_v14  ;;  %v1578_v1 = vmul.f32 0.044715, %v7631_v21  ;;  %v1830_v49 = vmul.f32 0.7978846, %v1766_v60  ;;  %v1764_v17 = vadd.f32 %v1700_v19, %v1340_v10  ;;  %v1368_v40 = vpop.f32.mrf.mxu0 }
 0x35b   : > { %v7643_v2 = vadd.f32 %v9393_v18, %v1355_v37  ;;  %v1769_v59 = vadd.f32 %v1705_v32, %v7615_v35  ;;  %v9395_v62 = vunpack.c.l.bf16 %v7241_v46  ;;  %v7653_v37 = vmul.f32 0.5, %v1340_v10 }
 0x35c   : > { %v1703_v29 = vmul.f32 %v1639_v12, %v7623_v14  ;;  %v1642_v34 = vmul.f32 %v1578_v1, %v7631_v21  ;;  %6640 = vtanh.f32 %v1830_v49  ;;  %v1828_v60 = vmul.f32 0.7978846, %v1764_v17  ;;  %v6633_v19 = vpop.eup %6632 }
 0x35d   : > { %9394 = vst [vmem:[#allocation34_spill] sm:$0xff] %v7643_v2  ;;  %v1576_v30 = vmul.f32 0.044715, %v7643_v2  ;;  %v7651_v41 = vadd.f32 %v6344_v39, %v9395_v62  ;;  %v1833_v28 = vmul.f32 0.7978846, %v1769_v59  ;;  %v9396_v18 = vunpack.c.l.bf16 %v7244_v47  ;;  %v6345_v39 = vpop.f32.mrf.mxu0 }
 0x35e   : > { %v1767_v43 = vadd.f32 %v1703_v29, %v7623_v14  ;;  %v1706_v32 = vmul.f32 %v1642_v34, %v7631_v21  ;;  %6642 = vtanh.f32 %v1827_v56  ;;  %v1953_v49 = vadd.f32 1.0, %v6633_v19 }
 0x35f   : > { %v1640_v12 = vmul.f32 %v1576_v30, %v7643_v2  ;;  %v1581_v1 = vmul.f32 0.044715, %v7651_v41  ;;  %v7661_v16 = vadd.f32 %v9396_v18, %v1368_v40  ;;  %6644 = vtanh.f32 %v1828_v60  ;;  %v1371_v40 = vpop.f32.mrf.mxu0 }
 0x360   : > { %v1831_v10 = vmul.f32 0.7978846, %v1767_v43  ;;  %v1770_v17 = vadd.f32 %v1706_v32, %v7631_v21  ;;  %6646 = vtanh.f32 %v1833_v28  ;;  %v9398_v30 = vunpack.c.h.bf16 %v7241_v46  ;;  %v6635_v18 = vpop.eup %6634 }
 0x361   : > { %9397 = vst [vmem:[#allocation35_spill] sm:$0xff] %v7661_v16  ;;  %v1704_v59 = vmul.f32 %v1640_v12, %v7643_v2  ;;  %v1645_v29 = vmul.f32 %v1581_v1, %v7651_v41  ;;  %v1579_v34 = vmul.f32 0.044715, %v7661_v16  ;;  %v9400_v19 = vunpack.c.h.bf16 %v7244_v47  ;;  %v6348_v12 = vpop.f32.mrf.mxu0 }
 0x362   : > { %v7669_v62 = vadd.f32 %v6345_v39, %v9398_v30  ;;  %v1834_v14 = vmul.f32 0.7978846, %v1770_v17  ;;  %v7677_v60 = vmul.f32 %v1953_v49, %v7580_v63  ;;  %6648 = vtanh.f32 %v1831_v10 }
 0x363   : > { %v1768_v56 = vadd.f32 %v1704_v59, %v7643_v2  ;;  %v7674_v43 = vadd.f32 %v9400_v19, %v1371_v40  ;;  %v1709_v28 = vmul.f32 %v1645_v29, %v7651_v41  ;;  %v1643_v32 = vmul.f32 %v1579_v34, %v7661_v16  ;;  %v1384_v29 = vpop.f32.mrf.mxu0 }
 0x364   : > { %9399 = vst [vmem:[#allocation36_spill] sm:$0xff] %v7669_v62  ;;  %v1582_v46 = vmul.f32 0.044715, %v7669_v62  ;;  %v9402_v17 = vunpack.c.l.bf16 %v7250_v52  ;;  %v1954_v47 = vadd.f32 1.0, %v6635_v18  ;;  %6650 = vtanh.f32 %v1834_v14  ;;  %v6637_v34 = vpop.eup %6636 }
 0x365   : > { %9401 = vst [vmem:[#allocation37_spill] sm:$0xff] %v7674_v43  ;;  %v1832_v1 = vmul.f32 0.7978846, %v1768_v56  ;;  %v1580_v39 = vmul.f32 0.044715, %v7674_v43  ;;  %v1773_v63 = vadd.f32 %v1709_v28, %v7651_v41  ;;  %v1707_v49 = vmul.f32 %v1643_v32, %v7661_v16  ;;  %v6349_v28 = vpop.f32.mrf.mxu0 }
 0x366   : > { %v7685_v59 = vadd.f32 %v6348_v12, %v9402_v17  ;;  %v1646_v10 = vmul.f32 %v1582_v46, %v7669_v62  ;;  %v9403_v56 = vunpack.c.l.bf16 %v7253_v53  ;;  %v1957_v32 = vadd.f32 1.0, %v6637_v34  ;;  %v7698_v17 = vpop.eup %6638 }
 0x367   : > { %6652 = vtanh.f32 %v1832_v1  ;;  %v1644_v30 = vmul.f32 %v1580_v39, %v7674_v43  ;;  %v1837_v12 = vmul.f32 0.7978846, %v1773_v63  ;;  %v1771_v14 = vadd.f32 %v1707_v49, %v7661_v16 }
 0x368   : > { %v1585_v40 = vmul.f32 0.044715, %v7685_v59  ;;  %v7694_v19 = vadd.f32 %v9403_v56, %v1384_v29  ;;  %v1710_v18 = vmul.f32 %v1646_v10, %v7669_v62  ;;  %v9404_v2 = vunpack.c.h.bf16 %v7250_v52  ;;  %v1387_v29 = vpop.f32.mrf.mxu0 }
 0x369   : > { %v1708_v46 = vmul.f32 %v1644_v30, %v7674_v43  ;;  %6654 = vtanh.f32 %v1837_v12  ;;  %v1835_v63 = vmul.f32 0.7978846, %v1771_v14  ;;  %v7709_v10 = vmul.f32 %v1954_v47, %v7595_v8  ;;  %v6641_v34 = vpop.eup %6640 }
 0x36a   : > { %v1649_v1 = vmul.f32 %v1585_v40, %v7685_v59  ;;  %v1583_v39 = vmul.f32 0.044715, %v7694_v19  ;;  %v7705_v21 = vadd.f32 %v6349_v28, %v9404_v2  ;;  %v1774_v49 = vadd.f32 %v1710_v18, %v7669_v62  ;;  %v6352_v14 = vpop.f32.mrf.mxu0 }
 0x36b   : > { %v1772_v56 = vadd.f32 %v1708_v46, %v7674_v43  ;;  %v9405_v2 = vunpack.c.h.bf16 %v7253_v53  ;;  %v1958_v18 = vadd.f32 1.0, %v6641_v34  ;;  %v2021_v28 = vmul.f32 %v1957_v32, %v7603_v51  ;;  %v6643_v8 = vpop.eup %6642 }
 0x36c   : > { %v1713_v30 = vmul.f32 %v1649_v1, %v7685_v59  ;;  %v1647_v40 = vmul.f32 %v1583_v39, %v7694_v19  ;;  %v1586_v35 = vmul.f32 0.044715, %v7705_v21  ;;  %v1838_v52 = vmul.f32 0.7978846, %v1774_v49  ;;  %v6645_v39 = vpop.eup %6644 }
 0x36d   : > { %v7717_v12 = vadd.f32 %v9405_v2, %v1387_v29  ;;  %v1836_v47 = vmul.f32 0.7978846, %v1772_v56  ;;  %6656 = vtanh.f32 %v1835_v63  ;;  %v9406_v53 = vunpack.c.l.bf16 %v7264_v45  ;;  %v1400_v2 = vpop.f32.mrf.mxu0  ;;  %v7729_v51 = vpop.eup %6646 }
 0x36e   : > { %v1777_v16 = vadd.f32 %v1713_v30, %v7685_v59  ;;  %v1711_v46 = vmul.f32 %v1647_v40, %v7694_v19  ;;  %v1650_v1 = vmul.f32 %v1586_v35, %v7705_v21  ;;  %v2022_v34 = vmul.f32 %v1958_v18, %v7633_v31  ;;  %9407 = vst [vmem:[#allocation38_spill] sm:$0xff] %v7729_v51 }
 0x36f   : > { %v1584_v49 = vmul.f32 0.044715, %v7717_v12  ;;  %v7726_v29 = vadd.f32 %v6352_v14, %v9406_v53  ;;  %6658 = vtanh.f32 %v1838_v52  ;;  %v9408_v40 = vunpack.c.l.bf16 %v7267_v44  ;;  %v6353_v14 = vpop.f32.mrf.mxu0  ;;  %v7739_v62 = vpop.eup %6648 }
 0x370   : > { %v1841_v32 = vmul.f32 0.7978846, %v1777_v16  ;;  %v1775_v56 = vadd.f32 %v1711_v46, %v7694_v19  ;;  %v1714_v30 = vmul.f32 %v1650_v1, %v7705_v21  ;;  %v2078_v53 = vpack.c.bf16 %v2022_v34, %v2021_v28  ;;  %9409 = vst [vmem:[#allocation39_spill] sm:$0xff] %v7739_v62 }
 0x371   : > { %v1648_v35 = vmul.f32 %v1584_v49, %v7717_v12  ;;  %v1589_v63 = vmul.f32 0.044715, %v7726_v29  ;;  %v7737_v43 = vadd.f32 %v9408_v40, %v1400_v2  ;;  %6660 = vtanh.f32 %v1836_v47  ;;  %v1403_v2 = vpop.f32.mrf.mxu0  ;;  %v7749_v28 = vpop.eup %6650 }
 0x372   : > { %v1839_v31 = vmul.f32 0.7978846, %v1775_v56  ;;  %v1778_v16 = vadd.f32 %v1714_v30, %v7705_v21  ;;  %v9410_v52 = vunpack.c.h.bf16 %v7264_v45  ;;  %5979 = vmatprep.subr.bf16.mxu1 %v2078_v53  ;;  %v1955_v40 = vadd.f32 1.0, %v6643_v8  ;;  %9411 = vst [vmem:[#allocation40_spill] sm:$0xff] %v7749_v28  ;;  %v9453_v28 = vld [vmem:[#allocation15_spill] sm:$0xff] }
 0x373   : > { %v1712_v46 = vmul.f32 %v1648_v35, %v7717_v12  ;;  %v1653_v1 = vmul.f32 %v1589_v63, %v7726_v29  ;;  %v1587_v49 = vmul.f32 0.044715, %v7737_v43  ;;  %6662 = vtanh.f32 %v1841_v32  ;;  %v6356_v53 = vpop.f32.mrf.mxu0 }
 0x374   : > { %v7744_v18 = vadd.f32 %v6353_v14, %v9410_v52  ;;  %v1842_v47 = vmul.f32 0.7978846, %v1778_v16  ;;  %v9412_v56 = vunpack.c.h.bf16 %v7267_v44  ;;  %v9413_v30 = vpack.c.bf16 %v7592_v5, %v7584_v11  ;;  %v7759_v35 = vpop.eup %6652 }
 0x375   : > { %9414 = vst [vmem:[#allocation41_spill] sm:$0xff] %v7759_v35  ;;  %v1776_v63 = vadd.f32 %v1712_v46, %v7717_v12  ;;  %v1717_v8 = vmul.f32 %v1653_v1, %v7726_v29  ;;  %v1651_v14 = vmul.f32 %v1587_v49, %v7737_v43  ;;  %v1956_v32 = vadd.f32 1.0, %v6645_v39 }
 0x376   : > { %v1590_v34 = vmul.f32 0.044715, %v7744_v18  ;;  %v7754_v45 = vadd.f32 %v9412_v56, %v1403_v2  ;;  %5980 = vmatpush3.bf16.msra.mxu1 %v9413_v30  ;;  %6664 = vtanh.f32 %v1839_v31  ;;  %v2019_v52 = vmul.f32 %v1955_v40, %v7618_v20  ;;  %v1416_v56 = vpop.f32.mrf.mxu0  ;;  %v7770_v1 = vpop.eup %6654 }
 0x377   : > { %v1840_v2 = vmul.f32 0.7978846, %v1776_v63  ;;  %v1781_v5 = vadd.f32 %v1717_v8, %v7726_v29  ;;  %v1715_v11 = vmul.f32 %v1651_v14, %v7737_v43  ;;  %v2020_v46 = vmul.f32 %v1956_v32, %v7653_v37  ;;  %9415 = vst [vmem:[#allocation42_spill] sm:$0xff] %v7770_v1 }
 0x378   : > { %v1654_v16 = vmul.f32 %v1590_v34, %v7744_v18  ;;  %v1588_v44 = vmul.f32 0.044715, %v7754_v45  ;;  %6666 = vtanh.f32 %v1842_v47  ;;  %v9416_v49 = vunpack.c.l.bf16 %v7278_v42  ;;  %v6357_v37 = vpop.f32.mrf.mxu0 }
 0x379   : > { %v1845_v20 = vmul.f32 0.7978846, %v1781_v5  ;;  %v1779_v40 = vadd.f32 %v1715_v11, %v7737_v43  ;;  %v2077_v30 = vpack.c.bf16 %v2020_v46, %v2019_v52  ;;  %v9418_v63 = vunpack.c.l.bf16 %v7281_v38 }
 0x37a   : > { %v1718_v39 = vmul.f32 %v1654_v16, %v7744_v18  ;;  %v1652_v31 = vmul.f32 %v1588_v44, %v7754_v45  ;;  %v7776_v34 = vadd.f32 %v6356_v53, %v9416_v49  ;;  %6668 = vtanh.f32 %v1840_v2  ;;  %v1419_v11 = vpop.f32.mrf.mxu0  ;;  %v7793_v46 = vpop.eup %6656 }
 0x37b   : > { %v7781_v8 = vadd.f32 %v9418_v63, %v1416_v56  ;;  %v1824_v32 = vmul.f32 0.7978846, %v7636_v48  ;;  %v1843_v16 = vmul.f32 0.7978846, %v1779_v40  ;;  %5981 = vmatprep.subr.bf16.mxu1 %v2077_v30  ;;  %v2076_v44 = vpack.c.bf16 %v7709_v10, %v7677_v60  ;;  %9422 = vst [vmem:[#allocation46_spill] sm:$0xff] %v7793_v46 }
 0x37c   : > { %9417 = vst [vmem:[#allocation43_spill] sm:$0xff] %v7776_v34  ;;  %v1782_v47 = vadd.f32 %v1718_v39, %v7744_v18  ;;  %v1716_v14 = vmul.f32 %v1652_v31, %v7754_v45  ;;  %v1593_v53 = vmul.f32 0.044715, %v7776_v34  ;;  %v9420_v52 = vunpack.c.h.bf16 %v7278_v42  ;;  %v7800_v31 = vpop.eup %6658  ;;  %v6360_v49 = vpop.f32.mrf.mxu0 }
 0x37d   : > { %9419 = vst [vmem:[#allocation44_spill] sm:$0xff] %v7781_v8  ;;  %6670 = vtanh.f32 %v1845_v20  ;;  %v9423_v48 = vpack.c.bf16 %v7610_v24, %v7587_v25  ;;  %v1821_v39 = vmul.f32 0.7978846, %v7568_v23  ;;  %9424 = vst [vmem:[#allocation47_spill] sm:$0xff] %v7800_v31  ;;  %v1591_v42 = vmul.f32 0.044715, %v7781_v8 }
 0x37e   : > { %v7791_v5 = vadd.f32 %v6357_v37, %v9420_v52  ;;  %v1846_v2 = vmul.f32 0.7978846, %v1782_v47  ;;  %v1780_v56 = vadd.f32 %v1716_v14, %v7754_v45  ;;  %6672 = vtanh.f32 %v1843_v16  ;;  %v7813_v40 = vpop.eup %6660  ;;  %v1432_v37 = vpop.f32.mrf.mxu0 }
 0x37f   : > { %5982 = vmatpush3.bf16.msra.mxu1 %v9423_v48  ;;  %v9425_v60 = vunpack.c.h.bf16 %v7281_v38  ;;  %v1755_v20 = vadd.f32 %v7545_v26, %v7478_v61  ;;  %v2068_v23 = vpack.c.bf16 %v7559_v22, %v7526_v36  ;;  %v1822_v24 = vmul.f32 0.7978846, %v7600_v7  ;;  %9427 = vst [vmem:[#allocation49_spill] sm:$0xff] %v7813_v40 }
 0x380   : > { %9421 = vst [vmem:[#allocation45_spill] sm:$0xff] %v7791_v5  ;;  %5983 = vmatprep.subr.bf16.mxu1 %v2076_v44  ;;  %6674 = vtanh.f32 %v1846_v2  ;;  %v1594_v25 = vmul.f32 0.044715, %v7791_v5  ;;  %v1844_v30 = vmul.f32 0.7978846, %v1780_v56  ;;  %v1657_v63 = vmul.f32 %v1593_v53, %v7776_v34  ;;  %v7828_v14 = vpop.eup %6662  ;;  %v6361_v16 = vpop.f32.mrf.mxu0 }
 0x381   : > { %v7805_v10 = vadd.f32 %v9425_v60, %v1419_v11  ;;  %v1503_v38 = vmul.f32 0.5, %v7536_v0  ;;  %6676 = vtanh.f32 %v1824_v32  ;;  %v9428_v61 = vunpack.c.l.bf16 %v7288_v58 }
 0x382   : > { %v9429_v36 = vunpack.c.l.bf16 %v7291_v3  ;;  %v1756_v7 = vadd.f32 %v7576_v15, %v7512_v6  ;;  %v1655_v0 = vmul.f32 %v1591_v42, %v7781_v8  ;;  %v1951_v32 = vadd.f32 1.0, %v7698_v17  ;;  %v1435_v17 = vpop.f32.mrf.mxu0 }
 0x383   : > { %9426 = vst [vmem:[#allocation48_spill] sm:$0xff] %v7805_v10  ;;  %v1592_v47 = vmul.f32 0.044715, %v7805_v10  ;;  %5984 = vmatpush3.bf16.msra.mxu1 %v2068_v23  ;;  %v7820_v26 = vadd.f32 %v6360_v49, %v9428_v61  ;;  %6678 = vtanh.f32 %v1821_v39  ;;  %v1819_v53 = vmul.f32 0.7978846, %v1755_v20  ;;  %v7838_v56 = vpop.eup %6664 }
 0x384   : > { %v7824_v22 = vadd.f32 %v9429_v36, %v1432_v37  ;;  %v1658_v44 = vmul.f32 %v1594_v25, %v7791_v5  ;;  %6680 = vtanh.f32 %v1822_v24  ;;  %v9431_v11 = vunpack.c.h.bf16 %v7288_v58 }
 0x385   : > { %v1597_v52 = vmul.f32 0.044715, %v7820_v26  ;;  %v7841_v6 = vmul.f32 %v1657_v63, %v7776_v34  ;;  %v1504_v15 = vmul.f32 0.5, %v7565_v33  ;;  %v1820_v48 = vmul.f32 0.7978846, %v1756_v7  ;;  %v7850_v49 = vpop.eup %6666  ;;  %v6364_v33 = vpop.f32.mrf.mxu0 }
 0x386   : > { %9430 = vst [vmem:[#allocation50_spill] sm:$0xff] %v7824_v22  ;;  %v7836_v2 = vadd.f32 %v6361_v16, %v9431_v11  ;;  %6682 = vtanh.f32 %v1819_v53  ;;  %v1656_v39 = vmul.f32 %v1592_v47, %v7805_v10  ;;  %v1595_v42 = vmul.f32 0.044715, %v7824_v22 }
 0x387   : > { %9432 = vst [vmem:[#allocation51_spill] sm:$0xff] %v7841_v6  ;;  %6684 = vtanh.f32 %v1844_v30  ;;  %v9433_v60 = vunpack.c.h.bf16 %v7291_v3  ;;  %v7853_v20 = vmul.f32 %v1655_v0, %v7781_v8  ;;  %v7855_v25 = vmul.f32 %v1951_v32, %v1503_v38  ;;  %v7867_v37 = vpop.eup %6668  ;;  %v1448_v61 = vpop.f32.mrf.mxu0  ;;  %v9439_v32 = vld [vmem:[#allocation8_spill] sm:$0xff] }
 0x388   : > { %6686 = vtanh.f32 %v1820_v48  ;;  %v7859_v23 = vmul.f32 %v7532_v54, %v7393_v9  ;;  %v7862_v24 = vmul.f32 %v1658_v44, %v7791_v5  ;;  %v1661_v3 = vmul.f32 %v1597_v52, %v7820_v26  ;;  %v9441_v44 = vld [vmem:[#allocation18_spill] sm:$0xff] }
 0x389   : > { %v7848_v58 = vadd.f32 %v9433_v60, %v1435_v17  ;;  %9435 = vst [vmem:[#allocation53_spill] sm:$0xff] %v7853_v20  ;;  %v1598_v30 = vmul.f32 0.044715, %v7836_v2  ;;  %v9437_v38 = vunpack.c.l.bf16 %v7307_v4  ;;  %v1753_v9 = vadd.f32 %v7498_v27, %v7422_v57  ;;  %v9442_v17 = vld [vmem:[#allocation29_spill] sm:$0xff] }
 0x38a   : > { %9436 = vst [vmem:[#allocation54_spill] sm:$0xff] %v7862_v24  ;;  %v1754_v54 = vadd.f32 %v7508_v13, %v7445_v55  ;;  %v1929_v36 = vadd.f32 1.0, %v7404_v50  ;;  %v7879_v7 = vmul.f32 %v1656_v39, %v7805_v10  ;;  %v1659_v0 = vmul.f32 %v1595_v42, %v7824_v22  ;;  %v7887_v11 = vpop.eup %6670  ;;  %v6365_v39 = vpop.f32.mrf.mxu0 }
 0x38b   : > { %9434 = vst [vmem:[#allocation52_spill] sm:$0xff] %v7848_v58  ;;  %v1596_v63 = vmul.f32 0.044715, %v7848_v58  ;;  %v7871_v47 = vadd.f32 %v6364_v33, %v9437_v38  ;;  %v9440_v16 = vunpack.c.l.bf16 %v9439_v32  ;;  %v1930_v52 = vadd.f32 1.0, %v9441_v44  ;;  %v7894_v60 = vpop.eup %6672 }
 0x38c   : > { %9438 = vst [vmem:[#allocation55_spill] sm:$0xff] %v7879_v7  ;;  %v7892_v13 = vmul.f32 0.5, %v7422_v57  ;;  %v1817_v50 = vmul.f32 0.7978846, %v1753_v9  ;;  %v1818_v48 = vmul.f32 0.7978846, %v1754_v54  ;;  %v1662_v42 = vmul.f32 %v1598_v30, %v7836_v2  ;;  %v1451_v9 = vpop.f32.mrf.mxu0 }
 0x38d   : > { %v7884_v53 = vadd.f32 %v9440_v16, %v1448_v61  ;;  %v1660_v33 = vmul.f32 %v1596_v63, %v7848_v58  ;;  %v1601_v38 = vmul.f32 0.044715, %v7871_v47  ;;  %v9443_v61 = vld [vmem:[#allocation11_spill] sm:$0xff]  ;;  %v7902_v44 = vpop.eup %6674  ;;  %v7905_v27 = vmul.f32 %v1661_v3, %v7820_v26  ;;  %v9444_v54 = vld [vmem:[#allocation9_spill] sm:$0xff] }
 0x38e   : > { %v7900_v16 = vmul.f32 %v1930_v52, %v9443_v61  ;;  %v7908_v57 = vmul.f32 0.5, %v7445_v55  ;;  %6688 = vtanh.f32 %v1817_v50  ;;  %v7911_v35 = vmul.f32 %v1929_v36, %v9444_v54  ;;  %v6677_v30 = vpop.eup %6676  ;;  %v9448_v50 = vld [vmem:[#allocation17_spill] sm:$0xff]  ;;  %v9449_v54 = vld [vmem:[#allocation22_spill] sm:$0xff] }
 0x38f   : > { %v7914_v63 = vmul.f32 %v1659_v0, %v7824_v22  ;;  %v1599_v52 = vmul.f32 0.044715, %v7884_v53  ;;  %6690 = vtanh.f32 %v1818_v48  ;;  %v9446_v61 = vunpack.c.h.bf16 %v7307_v4  ;;  %v6368_v0 = vpop.f32.mrf.mxu0 }
 0x390   : > { %v1952_v3 = vadd.f32 1.0, %v6677_v30  ;;  %v9447_v55 = vunpack.c.h.bf16 %v9439_v32  ;;  %v1751_v10 = vadd.f32 %v9449_v54, %v9448_v50  ;;  %v6679_v20 = vpop.eup %6678  ;;  %v7930_v8 = vmul.f32 %v1662_v42, %v7836_v2  ;;  %v9452_v32 = vld [vmem:[#allocation23_spill] sm:$0xff] }
 0x391   : > { %9445 = vst [vmem:[#allocation8_spill] sm:$0xff] %v7914_v63  ;;  %v7919_v62 = vadd.f32 %v6365_v39, %v9446_v61  ;;  %v7933_v4 = vmul.f32 %v1660_v33, %v7848_v58  ;;  %v1665_v48 = vmul.f32 %v1601_v38, %v7871_v47  ;;  %v9451_v39 = vld [vmem:[#allocation19_spill] sm:$0xff]  ;;  %v6681_v30 = vpop.eup %6680  ;;  %v9454_v51 = vunpack.c.l.bf16 %v9453_v28  ;;  %v1464_v24 = vpop.f32.mrf.mxu0  ;;  %v9458_v58 = vld [vmem:[#allocation16_spill] sm:$0xff] }
 0x392   : > { %v7923_v7 = vadd.f32 %v9447_v55, %v1451_v9  ;;  %v1752_v9 = vadd.f32 %v9452_v32, %v9451_v39  ;;  %v2016_v61 = vmul.f32 %v1952_v3, %v1504_v15  ;;  %v1949_v55 = vadd.f32 1.0, %v6679_v20  ;;  %v9455_v3 = vld [vmem:[#allocation24_spill] sm:$0xff] }
 0x393   : > { %9450 = vst [vmem:[#allocation18_spill] sm:$0xff] %v7933_v4  ;;  %v1815_v36 = vmul.f32 0.7978846, %v1751_v10  ;;  %v1473_v54 = vadd.f32 %v6368_v0, %v9454_v51  ;;  %v6683_v5 = vpop.eup %6682  ;;  %v1950_v6 = vadd.f32 1.0, %v6681_v30  ;;  %v1663_v42 = vmul.f32 %v1599_v52, %v7884_v53  ;;  %v6369_v10 = vpop.f32.mrf.mxu0  ;;  %v9456_v0 = vld [vmem:[#allocation27_spill] sm:$0xff]  ;;  %v9457_v4 = vld [vmem:[#allocation25_spill] sm:$0xff] }
 0x394   : > { %v1602_v33 = vmul.f32 0.044715, %v7919_v62  ;;  %v1816_v34 = vmul.f32 0.7978846, %v1752_v9  ;;  %v7942_v40 = vpop.eup %6684  ;;  %v2075_v38 = vpack.c.bf16 %v2016_v61, %v7855_v25  ;;  %v1947_v32 = vadd.f32 1.0, %v6683_v5  ;;  %v9460_v5 = vld [vmem:[#allocation13_spill] sm:$0xff] }
 0x395   : > { %v1600_v15 = vmul.f32 0.044715, %v7923_v7  ;;  %6692 = vtanh.f32 %v1815_v36  ;;  %v6687_v20 = vpop.eup %6686  ;;  %v2013_v51 = vmul.f32 %v1949_v55, %v9455_v3  ;;  %v2014_v46 = vmul.f32 %v1950_v6, %v9456_v0  ;;  %v9461_v61 = vld [vmem:[#allocation28_spill] sm:$0xff]  ;;  %v9462_v36 = vld [vmem:[#allocation26_spill] sm:$0xff]  ;;  %v1467_v6 = vpop.f32.mrf.mxu0 }
 0x396   : > { %6694 = vtanh.f32 %v1816_v34  ;;  %v1605_v30 = vmul.f32 0.044715, %v1473_v54  ;;  %5985 = vmatprep.subr.bf16.mxu1 %v2075_v38  ;;  %v1948_v52 = vadd.f32 1.0, %v6687_v20  ;;  %v2011_v9 = vmul.f32 %v1947_v32, %v9457_v4  ;;  %v9464_v3 = vld [vmem:[#allocation14_spill] sm:$0xff] }
 0x397   : > { %v9459_v63 = vunpack.c.l.bf16 %v9458_v58  ;;  %v1800_v25 = vmul.f32 0.7978846, %v9460_v5  ;;  %v9463_v31 = vpack.c.bf16 %v9461_v61, %v9462_v36  ;;  %v2074_v1 = vpack.c.bf16 %v2014_v46, %v2013_v51  ;;  %v9465_v38 = vld [vmem:[#allocation30_spill] sm:$0xff]  ;;  %v9467_v61 = vld [vmem:[#allocation20_spill] sm:$0xff] }
 0x398   : > { %v1669_v55 = vmul.f32 %v1605_v30, %v1473_v54  ;;  %6696 = vtanh.f32 %v9464_v3  ;;  %v5893_v34 = vunpack.c.h.bf16 %v9453_v28  ;;  %v2012_v20 = vmul.f32 %v1948_v52, %v9465_v38  ;;  %v9466_v52 = vld [vmem:[#allocation21_spill] sm:$0xff] }
 0x399   : > { %v7951_v22 = vadd.f32 %v9459_v63, %v1464_v24  ;;  %5986 = vmatpush3.bf16.msra.mxu1 %v9463_v31  ;;  %6698 = vtanh.f32 %v1800_v25  ;;  %v5889_v24 = vunpack.c.h.bf16 %v9458_v58  ;;  %v1666_v63 = vmul.f32 %v1602_v33, %v7919_v62 }
 0x39a   : > { %5987 = vmatprep.subr.bf16.mxu1 %v2074_v1  ;;  %v1495_v32 = vmul.f32 0.5, %v9448_v50  ;;  %v1733_v31 = vmul.f32 %v1669_v55, %v1473_v54  ;;  %v1476_v46 = vadd.f32 %v6369_v10, %v5893_v34  ;;  %v2073_v51 = vpack.c.bf16 %v2012_v20, %v2011_v9 }
 0x39b   : > { %v1603_v4 = vmul.f32 0.044715, %v7951_v22  ;;  %v1664_v0 = vmul.f32 %v1600_v15, %v7923_v7  ;;  %v1468_v30 = vadd.f32 %v5889_v24, %v1467_v6  ;;  %v6689_v5 = vpop.eup %6688  ;;  %v9468_v36 = vpack.c.bf16 %v9466_v52, %v9467_v61 }
 0x39c   : > { %v1729_v58 = vmul.f32 %v1665_v48, %v7871_v47  ;;  %v1496_v1 = vmul.f32 0.5, %v9451_v39  ;;  %v1606_v33 = vmul.f32 0.044715, %v1476_v46  ;;  %v1797_v25 = vadd.f32 %v1733_v31, %v1473_v54  ;;  %v6691_v50 = vpop.eup %6690 }
 0x39d   : > { %v1667_v28 = vmul.f32 %v1603_v4, %v7951_v22  ;;  %5988 = vmatpush3.bf16.msra.mxu1 %v9468_v36  ;;  %v7972_v10 = vmul.f32 %v1663_v42, %v7884_v53  ;;  %v1945_v15 = vadd.f32 1.0, %v6689_v5  ;;  %v1604_v55 = vmul.f32 0.044715, %v1468_v30 }
 0x39e   : > { %5989 = vmatprep.subr.bf16.mxu1 %v2073_v51  ;;  %v1946_v3 = vadd.f32 1.0, %v6691_v50  ;;  %v1730_v34 = vmul.f32 %v1666_v63, %v7919_v62  ;;  %v1670_v6 = vmul.f32 %v1606_v33, %v1476_v46  ;;  %v1861_v38 = vmul.f32 0.7978846, %v1797_v25 }
 0x39f   : > { %v1731_v9 = vmul.f32 %v1667_v28, %v7951_v22  ;;  %v7977_v48 = vmul.f32 %v1664_v0, %v7923_v7  ;;  %v1668_v39 = vmul.f32 %v1604_v55, %v1468_v30  ;;  %v7979_v20 = vmul.f32 0.5, %v1473_v54 }
 0x3a0   : > { %v1973_v4 = vadd.f32 1.0, %v7887_v11  ;;  %v9469_v42 = vpack.c.bf16 %v7859_v23, %v9442_v17  ;;  %v2009_v24 = vmul.f32 %v1945_v15, %v7892_v13  ;;  %v2010_v31 = vmul.f32 %v1946_v3, %v7908_v57 }
 0x3a1   : > { %v1734_v51 = vmul.f32 %v1670_v6, %v1476_v46  ;;  %v1974_v63 = vadd.f32 1.0, %v7902_v44  ;;  %v1732_v28 = vmul.f32 %v1668_v39, %v1468_v30  ;;  %6700 = vtanh.f32 %v1861_v38 }
 0x3a2   : > { %5990 = vmatpush3.bf16.msra.mxu1 %v9469_v42  ;;  %v1525_v0 = vmul.f32 0.5, %v7726_v29  ;;  %v1795_v54 = vadd.f32 %v1731_v9, %v7951_v22  ;;  %v6693_v5 = vpop.eup %6692  ;;  %v2072_v52 = vpack.c.bf16 %v2010_v31, %v2009_v24  ;;  %v7990_v11 = vmul.f32 0.5, %v1476_v46 }
 0x3a3   : > { %v1798_v61 = vadd.f32 %v1734_v51, %v1476_v46  ;;  %v1526_v23 = vmul.f32 0.5, %v7744_v18  ;;  %v6695_v17 = vpop.eup %6694  ;;  %v1943_v13 = vadd.f32 1.0, %v6693_v5  ;;  %v1796_v57 = vadd.f32 %v1732_v28, %v1468_v30 }
 0x3a4   : > { %v7993_v36 = vmul.f32 %v1973_v4, %v1525_v0  ;;  %v1859_v33 = vmul.f32 0.7978846, %v1795_v54  ;;  %5991 = vmatprep.subr.bf16.mxu1 %v2072_v52  ;;  %v1944_v44 = vadd.f32 1.0, %v6695_v17  ;;  %v7998_v29 = vmul.f32 0.5, %v7951_v22  ;;  %v6456_v54 = vld [vmem:[%s6987_s25] ss:$16 sps:$4 sm:$0xff]  }
 0x3a5   : > { %v1862_v25 = vmul.f32 0.7978846, %v1798_v61  ;;  %v7995_v50 = vmul.f32 %v1974_v63, %v1526_v23  ;;  %v6697_v15 = vpop.eup %6696  ;;  %v9470_v46 = vpack.c.bf16 %v7900_v16, %v7911_v35  ;;  %v1860_v18 = vmul.f32 0.7978846, %v1796_v57  ;;  %v6459_v17 = vld [vmem:[%s6987_s25 + $0x24] ss:$16 sps:$4 sm:$0xff]  }
 0x3a6   : > { %6702 = vtanh.f32 %v1859_v33  ;;  %v1971_v9 = vadd.f32 1.0, %v7894_v60  ;;  %v1972_v55 = vadd.f32 1.0, %v7942_v40  ;;  %v6699_v3 = vpop.eup %6698  ;;  %v2007_v6 = vmul.f32 %v1943_v13, %v1495_v32  ;;  %v9471_v40 = vld [vmem:[#allocation10_spill] sm:$0xff]  ;;  %v9472_v32 = vld [vmem:[#allocation12_spill] sm:$0xff] }
 0x3a7   : > { %5992 = vmatpush3.bf16.msra.mxu1 %v9470_v46  ;;  %v2008_v38 = vmul.f32 %v1944_v44, %v1496_v1  ;;  %v1927_v39 = vadd.f32 1.0, %v6697_v15  ;;  %6704 = vtanh.f32 %v1862_v25  ;;  %v1928_v4 = vadd.f32 1.0, %v6699_v3  ;;  %v9473_v46 = vld [vmem:[#allocation42_spill] sm:$0xff] }
 0x3a8   : > { %6706 = vtanh.f32 %v1860_v18  ;;  %v1524_v22 = vmul.f32 0.5, %v7754_v45  ;;  %v1793_v42 = vadd.f32 %v1729_v58, %v7871_v47  ;;  %v8007_v35 = vmul.f32 0.5, %v1468_v30 }
 0x3a9   : > { %v2071_v24 = vpack.c.bf16 %v2008_v38, %v2007_v6  ;;  %v1523_v16 = vmul.f32 0.5, %v7737_v43  ;;  %v1794_v60 = vadd.f32 %v1730_v34, %v7919_v62  ;;  %v1991_v31 = vmul.f32 %v1927_v39, %v9471_v40  ;;  %v9475_v6 = vld [vmem:[#allocation47_spill] sm:$0xff]  ;;  %v9478_v40 = vld [vmem:[#allocation52_spill] sm:$0xff] }
 0x3aa   : > { %v1992_v1 = vmul.f32 %v1928_v4, %v9472_v32  ;;  %v8013_v51 = vmul.f32 %v1972_v55, %v1524_v22  ;;  %v1857_v63 = vmul.f32 0.7978846, %v1793_v42  ;;  %v2086_v45 = vpack.c.bf16 %v7995_v50, %v7993_v36  ;;  %v9476_v4 = vld [vmem:[#allocation50_spill] sm:$0xff]  ;;  %v9490_v50 = vld [vmem:[#allocation33_spill] sm:$0xff] }
 0x3ab   : > { %5993 = vmatprep.subr.bf16.mxu1 %v2071_v24  ;;  %v8017_v58 = vmul.f32 %v1971_v9, %v1523_v16  ;;  %v1858_v30 = vmul.f32 0.7978846, %v1794_v60  ;;  %v1969_v28 = vadd.f32 1.0, %v7828_v14  ;;  %v1970_v34 = vadd.f32 1.0, %v7850_v49  ;;  %v6461_v60 = vld [vmem:[%s6987_s25 + $0x20] ss:$16 sps:$4 sm:$0xff]  }
 0x3ac   : > { %v2063_v43 = vpack.c.bf16 %v1992_v1, %v1991_v31  ;;  %6708 = vtanh.f32 %v1857_v63  ;;  %v1791_v0 = vadd.f32 %v7972_v10, %v7884_v53  ;;  %v8025_v5 = vmul.f32 0.5, %v7871_v47  ;;  %v9479_v31 = vld [vmem:[#allocation18_spill] sm:$0xff] }
 0x3ad   : > { %6710 = vtanh.f32 %v1858_v30  ;;  %v1521_v52 = vmul.f32 0.5, %v7685_v59  ;;  %v1792_v61 = vadd.f32 %v7977_v48, %v7923_v7  ;;  %v2085_v14 = vpack.c.bf16 %v8013_v51, %v8017_v58 }
 0x3ae   : > { %5994 = vmatpush3.bf16.msra.mxu1 %v2063_v43  ;;  %v8033_v23 = vmul.f32 0.5, %v7919_v62  ;;  %v1522_v49 = vmul.f32 0.5, %v7705_v21  ;;  %v1855_v10 = vmul.f32 0.7978846, %v1791_v0  ;;  %v6701_v13 = vpop.eup %6700  ;;  %v8040_v57 = vmul.f32 0.5, %v7884_v53 }
 0x3af   : > { %v8037_v47 = vmul.f32 %v1969_v28, %v1521_v52  ;;  %v8043_v59 = vmul.f32 0.5, %v7923_v7  ;;  %v1856_v48 = vmul.f32 0.7978846, %v1792_v61  ;;  %v1519_v62 = vmul.f32 0.5, %v7694_v19  ;;  %v6464_v28 = vld [vmem:[%s6987_s25 + $0xc] ss:$16 sps:$4 sm:$0xff]  }
 0x3b0   : > { %v8045_v33 = vmul.f32 %v1970_v34, %v1522_v49  ;;  %6712 = vtanh.f32 %v1855_v10  ;;  %v8049_v44 = vmul.f32 0.5, %v7717_v12  ;;  %v1967_v21 = vadd.f32 1.0, %v7838_v56  ;;  %v9474_v56 = vld [vmem:[#allocation36_spill] sm:$0xff]  ;;  %v9480_v61 = vld [vmem:[#allocation35_spill] sm:$0xff]  ;;  %v9481_v10 = vld [vmem:[#allocation46_spill] sm:$0xff] }
 0x3b1   : > { %2168 = vmatmul.mubr.bf16.vlgmr.msra.gmra.mxu1 %v6456_v54  ;;  %6714 = vtanh.f32 %v1856_v48  ;;  %v1789_v53 = vadd.f32 %v7905_v27, %v7820_v26  ;;  %v1790_v7 = vadd.f32 %v7930_v8, %v7836_v2  ;;  %v1989_v25 = vadd.f32 1.0, %v6701_v13  ;;  %v9482_v48 = vld [vmem:[#allocation37_spill] sm:$0xff] }
 0x3b2   : > { %v8057_v15 = vadd.f32 1.0, %v7867_v37  ;;  %2175 = vmatprep.mubr.bf16.mxu1 %v6459_v17  ;;  %v1517_v19 = vmul.f32 0.5, %v7651_v41  ;;  %v1965_v12 = vadd.f32 1.0, %v9473_v46  ;;  %v1518_v3 = vmul.f32 0.5, %v9474_v56  ;;  %v9477_v41 = vld [vmem:[#allocation8_spill] sm:$0xff] }
 0x3b3   : > { %v6703_v18 = vpop.eup %6702  ;;  %v1853_v9 = vmul.f32 0.7978846, %v1789_v53  ;;  %v1854_v55 = vmul.f32 0.7978846, %v1790_v7  ;;  %v1966_v27 = vadd.f32 1.0, %v9475_v6  ;;  %v2084_v37 = vpack.c.bf16 %v8045_v33, %v8037_v47  ;;  %v9487_v6 = vld [vmem:[#allocation54_spill] sm:$0xff] }
 0x3b4   : > { %v6705_v38 = vpop.eup %6704  ;;  %v1987_v8 = vadd.f32 1.0, %v6703_v18  ;;  %v8065_v39 = vmul.f32 %v1965_v12, %v1517_v19  ;;  %v1787_v22 = vadd.f32 %v9477_v41, %v9476_v4  ;;  %v1788_v32 = vadd.f32 %v9479_v31, %v9478_v40 }
 0x3b5   : > { %v6707_v42 = vpop.eup %6706  ;;  %v1990_v24 = vadd.f32 1.0, %v6705_v38  ;;  %6716 = vtanh.f32 %v1853_v9  ;;  %v8069_v16 = vmul.f32 %v1966_v27, %v1518_v3  ;;  %v2053_v1 = vmul.f32 %v1989_v25, %v7979_v20  ;;  %v9484_v9 = vld [vmem:[#allocation43_spill] sm:$0xff]  ;;  %v9486_v3 = vld [vmem:[#allocation45_spill] sm:$0xff] }
 0x3b6   : > { %v1988_v63 = vadd.f32 1.0, %v6707_v42  ;;  %6718 = vtanh.f32 %v1854_v55  ;;  %v1851_v30 = vmul.f32 0.7978846, %v1787_v22  ;;  %v2051_v34 = vmul.f32 %v1987_v8, %v7998_v29  ;;  %v9485_v55 = vld [vmem:[#allocation51_spill] sm:$0xff]  ;;  %v9489_v22 = vld [vmem:[#allocation38_spill] sm:$0xff] }
 0x3b7   : > { %v2054_v43 = vmul.f32 %v1990_v24, %v7990_v11  ;;  %v2082_v0 = vpack.c.bf16 %v8069_v16, %v8065_v39  ;;  %v1852_v54 = vmul.f32 0.7978846, %v1788_v32  ;;  %v1515_v49 = vmul.f32 0.5, %v9480_v61  ;;  %v9483_v11 = vld [vmem:[#allocation49_spill] sm:$0xff]  ;;  %v9488_v8 = vld [vmem:[#allocation31_spill] sm:$0xff]  ;;  %v9494_v61 = vld [vmem:[#allocation48_spill] sm:$0xff] }
 0x3b8   : > { %v2052_v52 = vmul.f32 %v1988_v63, %v8007_v35  ;;  %6720 = vtanh.f32 %v1851_v30  ;;  %v1963_v17 = vadd.f32 1.0, %v9481_v10  ;;  %v1516_v53 = vmul.f32 0.5, %v9482_v48 }
 0x3b9   : > { %v6709_v20 = vpop.eup %6708  ;;  %v2094_v13 = vpack.c.bf16 %v2054_v43, %v2053_v1  ;;  %2176 = vmatmul.mubr.bf16.gmra.mxu1 %v6461_v60  ;;  %6722 = vtanh.f32 %v1852_v54  ;;  %v1964_v7 = vadd.f32 1.0, %v9483_v11  ;;  %v1533_v46 = vmul.f32 0.5, %v7820_v26  ;;  %v9492_v54 = vld [vmem:[#allocation44_spill] sm:$0xff]  ;;  %v9499_v11 = vld [vmem:[#allocation41_spill] sm:$0xff] }
 0x3ba   : > { %v6711_v29 = vpop.eup %6710  ;;  %v2093_v25 = vpack.c.bf16 %v2052_v52, %v2051_v34  ;;  %v1985_v19 = vadd.f32 1.0, %v6709_v20  ;;  %v8086_v12 = vmul.f32 %v1963_v17, %v1515_v49  ;;  %2216 = vmatprep.mubr.bf16.mxu1 %v6464_v28  ;;  %v1785_v56 = vadd.f32 %v9485_v55, %v9484_v9  ;;  %v9493_v52 = vld [vmem:[#allocation53_spill] sm:$0xff]  ;;  %v9495_v49 = vld [vmem:[#allocation55_spill] sm:$0xff]  ;;  %v9496_v17 = vld [vmem:[#allocation32_spill] sm:$0xff] }
 0x3bb   : > { %6007 = vmatprep.subr.bf16.mxu1 %v2094_v13  ;;  %v1986_v35 = vadd.f32 1.0, %v6711_v29  ;;  %v8088_v18 = vmul.f32 %v1964_v7, %v1516_v53  ;;  %v1786_v27 = vadd.f32 %v9487_v6, %v9486_v3  ;;  %v2031_v26 = vmul.f32 %v1967_v21, %v1519_v62  ;;  %v9497_v13 = vld [vmem:[#allocation34_spill] sm:$0xff] }
 0x3bc   : > { %6008 = vmatpush3.bf16.msra.mxu1 %v2086_v45  ;;  %v2049_v38 = vmul.f32 %v1985_v19, %v8025_v5  ;;  %v1513_v41 = vmul.f32 0.5, %v9488_v8  ;;  %v1961_v42 = vadd.f32 1.0, %v9489_v22  ;;  %v1849_v32 = vmul.f32 0.7978846, %v1785_v56  ;;  %v9491_v5 = vld [vmem:[#allocation40_spill] sm:$0xff] }
 0x3bd   : > { %v6713_v24 = vpop.eup %6712  ;;  %6009 = vmatprep.subr.bf16.mxu1 %v2093_v25  ;;  %v2050_v60 = vmul.f32 %v1986_v35, %v8033_v23  ;;  %v2081_v31 = vpack.c.bf16 %v8088_v18, %v8086_v12  ;;  %v1850_v1 = vmul.f32 0.7978846, %v1786_v27  ;;  %v2032_v36 = vmul.f32 %v8057_v15, %v8049_v44 }
 0x3be   : > { %v6715_v63 = vpop.eup %6714  ;;  %v1983_v30 = vadd.f32 1.0, %v6713_v24  ;;  %v1514_v45 = vmul.f32 0.5, %v9490_v50  ;;  %v1962_v62 = vadd.f32 1.0, %v9491_v5  ;;  %6724 = vtanh.f32 %v1849_v32 }
 0x3bf   : > { %v2092_v21 = vpack.c.bf16 %v2050_v60, %v2049_v38  ;;  %v1984_v28 = vadd.f32 1.0, %v6715_v63  ;;  %v8107_v43 = vmul.f32 %v1961_v42, %v1513_v41  ;;  %6726 = vtanh.f32 %v1850_v1 }
 0x3c0   : > { %6010 = vmatpush3.bf16.msra.mxu1 %v2085_v14  ;;  %v2047_v23 = vmul.f32 %v1983_v30, %v8040_v57  ;;  %v2026_v34 = vmul.f32 %v1962_v62, %v1514_v45  ;;  %v1783_v44 = vadd.f32 %v9493_v52, %v9492_v54  ;;  %v1784_v10 = vadd.f32 %v9495_v49, %v9494_v61  ;;  %v9498_v14 = vld [vmem:[#allocation39_spill] sm:$0xff] }
 0x3c1   : > { %6011 = vmatprep.subr.bf16.mxu1 %v2092_v21  ;;  %v2048_v15 = vmul.f32 %v1984_v28, %v8043_v59  ;;  %v1511_v20 = vmul.f32 0.5, %v9496_v17  ;;  %v1512_v48 = vmul.f32 0.5, %v9497_v13  ;;  %v1959_v57 = vadd.f32 1.0, %v9498_v14  ;;  %v6465_v21 = vld [vmem:[%s6987_s25 + $0x2c] ss:$16 sps:$4 sm:$0xff]  }
 0x3c2   : > { %v6717_v53 = vpop.eup %6716  ;;  %v2080_v51 = vpack.c.bf16 %v2026_v34, %v8107_v43  ;;  %v1847_v58 = vmul.f32 0.7978846, %v1783_v44  ;;  %v1960_v7 = vadd.f32 1.0, %v9499_v11  ;;  %v1534_v19 = vmul.f32 0.5, %v7836_v2  ;;  %v6467_v28 = vld [vmem:[%s6987_s25 + $0x28] ss:$16 sps:$4 sm:$0xff]  }
 0x3c3   : > { %v6719_v29 = vpop.eup %6718  ;;  %v2091_v25 = vpack.c.bf16 %v2048_v15, %v2047_v23  ;;  %v1981_v59 = vadd.f32 1.0, %v6717_v53  ;;  %v1848_v12 = vmul.f32 0.7978846, %v1784_v10  ;;  %v2023_v18 = vmul.f32 %v1959_v57, %v1511_v20  ;;  %v658_v10 = vld [vmem:[%s6972_s15] sm:$0xff] }
 0x3c4   : > { %6012 = vmatpush3.bf16.msra.mxu1 %v2084_v37  ;;  %v1982_v35 = vadd.f32 1.0, %v6719_v29  ;;  %6728 = vtanh.f32 %v1847_v58  ;;  %v2024_v55 = vmul.f32 %v1960_v7, %v1512_v48  ;;  %v2083_v6 = vpack.c.bf16 %v2032_v36, %v2031_v26 }
 0x3c5   : > { %v6721_v56 = vpop.eup %6720  ;;  %6013 = vmatprep.subr.bf16.mxu1 %v2091_v25  ;;  %6730 = vtanh.f32 %v1848_v12  ;;  %v2045_v38 = vmul.f32 %v1981_v59, %v1533_v46  ;;  %v1531_v2 = vmul.f32 0.5, %v9476_v4  ;;  %v1532_v42 = vmul.f32 0.5, %v9478_v40  ;;  %v9500_v25 = vld [vmem:[#allocation6_spill] sm:$0xff] }
 0x3c6   : > { %v6723_v27 = vpop.eup %6722  ;;  %v2046_v8 = vmul.f32 %v1982_v35, %v1534_v19  ;;  %v1979_v41 = vadd.f32 1.0, %v6721_v56  ;;  %v2079_v22 = vpack.c.bf16 %v2024_v55, %v2023_v18  ;;  %v1529_v1 = vmul.f32 0.5, %v9484_v9  ;;  %v660_v59 = vld [vmem:[%s6972_s15 + $0x10] sm:$0xff] }
 0x3c7   : > { %v1980_v24 = vadd.f32 1.0, %v6723_v27  ;;  %v1530_v4 = vmul.f32 0.5, %v9486_v3  ;;  %v1527_v39 = vmul.f32 0.5, %v9492_v54  ;;  %v1528_v16 = vmul.f32 0.5, %v9494_v61 }
 0x3c8   : > { %6014 = vmatpush3.bf16.msra.mxu1 %v2083_v6  ;;  %v2090_v47 = vpack.c.bf16 %v2046_v8, %v2045_v38  ;;  %v2043_v33 = vmul.f32 %v1979_v41, %v1531_v2  ;;  %v9501_v38 = vld [vmem:[#allocation7_spill] sm:$0xff] }
 0x3c9   : > { %v2044_v37 = vmul.f32 %v1980_v24, %v1532_v42  ;;  %v661_v41 = vld [vmem:[%s6972_s15 + $0x18] sm:$0xff] }
 0x3ca   : > { %6015 = vmatprep.subr.bf16.mxu1 %v2090_v47 }
 0x3cb   : > { %v2089_v60 = vpack.c.bf16 %v2044_v37, %v2043_v33  ;;  %v6725_v32 = vpop.eup %6724  ;;  %v9502_v37 = vld [vmem:[#allocation4_spill] sm:$0xff] }
 0x3cc   : > { %6016 = vmatpush3.bf16.msra.mxu1 %v2082_v0  ;;  %v6727_v46 = vpop.eup %6726  ;;  %v1977_v26 = vadd.f32 1.0, %v6725_v32 }
 0x3cd   : > { %6017 = vmatprep.subr.bf16.mxu1 %v2089_v60  ;;  %v1978_v40 = vadd.f32 1.0, %v6727_v46 }
 0x3ce   : > { %v2041_v63 = vmul.f32 %v1977_v26, %v1529_v1  ;;  %v9503_v26 = vld [vmem:[#allocation5_spill] sm:$0xff] }
 0x3cf   : > { %v2042_v30 = vmul.f32 %v1978_v40, %v1530_v4 }
 0x3d0   : > { %6018 = vmatpush3.bf16.msra.mxu1 %v2081_v31  ;;  %v6462_v31 = vld [vmem:[%s6987_s25 + $0x8] ss:$16 sps:$4 sm:$0xff]  }
 0x3d1   : > { %v6729_v36 = vpop.eup %6728  ;;  %v2088_v45 = vpack.c.bf16 %v2042_v30, %v2041_v63 }
 0x3d2   : > { %v6731_v50 = vpop.eup %6730  ;;  %v1975_v5 = vadd.f32 1.0, %v6729_v36 }
 0x3d3   : > { %v1976_v0 = vadd.f32 1.0, %v6731_v50  ;;  %6019 = vmatprep.subr.bf16.mxu1 %v2088_v45 }
 0x3d4   : > { %6020 = vmatpush3.bf16.msra.mxu1 %v2080_v51  ;;  %v2039_v9 = vmul.f32 %v1975_v5, %v1527_v39  ;;  %v659_v51 = vld [vmem:[%s6972_s15 + $0x8] sm:$0xff] }
 0x3d5   : > { %v2040_v3 = vmul.f32 %v1976_v0, %v1528_v16 }
 0x3d7   : > { %v2087_v62 = vpack.c.bf16 %v2040_v3, %v2039_v9 }
 0x3d9   : > { %6021 = vmatprep.subr.bf16.mxu1 %v2087_v62 }
 0x3da   : > { %6022 = vmatpush3.bf16.msra.mxu1 %v2079_v22 }
 0x3dd   : > { %2217 = vmatmul.mubr.bf16.vlgmr.msra.gmra.mxu1 %v6462_v31 }
 0x3de   : > { %2224 = vmatprep.mubr.bf16.mxu1 %v6465_v21 }
 0x3e5   : > { %2225 = vmatmul.mubr.bf16.gmra.mxu1 %v6467_v28 }
 0x471   : > { %v5995_v43 = vpop.f32.mrf.mxu1 }
 0x473   : > { %v5996_v23 = vpop.f32.mrf.mxu1 }
 0x474   : > { %v5997_v49 = vadd.f32 %v5996_v23, %v5995_v43 }
 0x475   : > { %v5998_v34 = vpop.f32.mrf.mxu1 }
 0x476   : > { %v2170_v13 = vadd.f32 %v5997_v49, %v658_v10  ;;  %v2301_v10 = vld [vmem:[%s6992_s28 + $0x40] sm:$0xff] }
 0x477   : > { %v5999_v54 = vpop.f32.mrf.mxu1 }
 0x478   : > { %v6000_v48 = vadd.f32 %v5999_v54, %v5998_v34 }
 0x479   : > { %v6001_v52 = vpop.f32.mrf.mxu1 }
 0x47a   : > { %v2173_v11 = vadd.f32 %v6000_v48, %v659_v51 }
 0x47b   : > { %v6002_v44 = vpop.f32.mrf.mxu1 }
 0x47c   : > { %v6003_v7 = vadd.f32 %v6002_v44, %v6001_v52  ;;  %v2303_v52 = vld [vmem:[%s6992_s28 + $0x80] sm:$0xff] }
 0x47d   : > { %v6004_v15 = vpop.f32.mrf.mxu1  ;;  %v2305_v44 = vld [vmem:[%s6992_s28 + $0xc0] sm:$0xff] }
 0x47e   : > { %v2178_v56 = vadd.f32 %v6003_v7, %v660_v59  ;;  %v5576_v49 = vcombine.high %v2303_v52, %v2305_v44  ;;  %v6471_v7 = vld [vmem:[%s7002_s4 + $0x130] sm:$0xff]   ;;  %v6475_v59 = vld [vmem:[%s7002_s4 + $0x120] sm:$0xff]  }
 0x47f   : > { %v6005_v61 = vpop.f32.mrf.mxu1 }
 0x480   : > { %v6006_v6 = vadd.f32 %v6005_v61, %v6004_v15  ;;  %v2299_v15 = vld [vmem:[%s6992_s28] sm:$0xff]  ;;  %v5575_v61 = vcombine.low %v2303_v52, %v2305_v44  ;;  %2387 = vmatprep.subr.bf16.mxu1 %v5576_v49 }
 0x481   : > { %v5572_v48 = vcombine.high %v2299_v15, %v2301_v10  ;;  %v5571_v51 = vcombine.low %v2299_v15, %v2301_v10  ;;  %v2697_v15 = vld [vmem:[%s6992_s28 + $0x10] sm:$0xff] }
 0x482   : > { %v2181_v47 = vadd.f32 %v6006_v6, %v661_v41  ;;  %2388 = vmatpush1.bf16.msra.mxu1 %v5575_v61  ;;  %v2699_v61 = vld [vmem:[%s6992_s28 + $0x50] sm:$0xff] }
 0x483   : > { %2389 = vmatprep.subr.bf16.mxu1 %v5572_v48  ;;  %v5584_v10 = vcombine.high %v2697_v15, %v2699_v61  ;;  %v5583_v48 = vcombine.low %v2697_v15, %v2699_v61 }
 0x486   : > { %2390 = vmatpush1.bf16.msra.mxu1 %v5571_v51  ;;  %v2698_v51 = vld [vmem:[%s6992_s28 + $0x18] sm:$0xff] }
 0x49d   : > { %v6023_v17 = vpop.f32.mrf.mxu1 }
 0x49f   : > { %v6024_v20 = vpop.f32.mrf.mxu1 }
 0x4a0   : > { %v6025_v53 = vadd.f32 %v6024_v20, %v6023_v17  ;;  %v9309_v17 = vmov 0   ;;  %v8177_v20 = vld [vmem:[%s6992_s28 + $0x88] sm:$0xff] }
 0x4a1   : > { %v6026_v58 = vpop.f32.mrf.mxu1  ;;  %2407 = vmatprep.mubr.bf16.mxu1 %v9309_v17 }
 0x4a2   : > { %v2219_v14 = vadd.f32 %v6025_v53, %v2170_v13  ;;  %v8180_v13 = vld [vmem:[%s6992_s28 + $0xc8] sm:$0xff] }
 0x4a3   : > { %v6027_v57 = vpop.f32.mrf.mxu1  ;;  %v5577_v53 = vcombine.low %v8177_v20, %v8180_v13 }
 0x4a4   : > { %v6028_v29 = vadd.f32 %v6027_v57, %v6026_v58  ;;  %v2233_v19 = vadd.f32 %v2219_v14, %v9500_v25  ;;  %v5578_v58 = vcombine.high %v8177_v20, %v8180_v13  ;;  %v6468_v14 = vld [vmem:[%s7002_s4 + $0x178] sm:$0xff]   ;;  %v6473_v25 = vld [vmem:[%s7002_s4 + $0x128] sm:$0xff]  }
 0x4a5   : > { %v6029_v12 = vpop.f32.mrf.mxu1  ;;  %v6469_v57 = vld [vmem:[%s7002_s4 + $0x138] sm:$0xff]   ;;  %6035 = vmatprep.subr.bf16.mxu0 %v6468_v14 }
 0x4a6   : > { %v2222_v35 = vadd.f32 %v6028_v29, %v2173_v11  ;;  %v2237_v18 = vsel %vm678_vm1, %v2233_v19, 0.0  ;;  %2440 = vmatprep.subr.bf16.mxu1 %v5578_v58  ;;  %v6470_v11 = vld [vmem:[%s7002_s4 + $0x170] sm:$0xff]   ;;  %6036 = vmatpush3.bf16.msra.mxu0 %v6469_v57  ;;  %v6472_v29 = vld [vmem:[%s7002_s4 + $0x168] sm:$0xff]   ;;  %v2702_v20 = vld [vmem:[%s6992_s28 + $0x98] sm:$0xff] }
 0x4a7   : > { %v6030_v55 = vpop.f32.mrf.mxu1  ;;  %2238 = vadd.xlane.f32.xlu0 %v2237_v18  ;;  %6037 = vmatprep.subr.bf16.mxu0 %v6470_v11  ;;  %v2704_v13 = vld [vmem:[%s6992_s28 + $0xd8] sm:$0xff] }
 0x4a8   : > { %v6031_v27 = vadd.f32 %v6030_v55, %v6029_v12  ;;  %v2234_v8 = vadd.f32 %v2222_v35, %v9501_v38  ;;  %v2700_v58 = vld [vmem:[%s6992_s28 + $0x58] sm:$0xff]  ;;  %v5589_v14 = vcombine.low %v2702_v20, %v2704_v13 }
 0x4a9   : > { %v6032_v22 = vpop.f32.mrf.mxu1  ;;  %v5586_v57 = vcombine.high %v2698_v51, %v2700_v58  ;;  %v5585_v11 = vcombine.low %v2698_v51, %v2700_v58 }
 0x4aa   : > { %v2227_v2 = vadd.f32 %v6031_v27, %v2178_v56  ;;  %v2240_v42 = vsel %vm678_vm1, %v2234_v8, 0.0  ;;  %6038 = vmatpush3.bf16.msra.mxu0 %v6471_v7  ;;  %v6476_v7 = vld [vmem:[%s7002_s4 + $0x158] sm:$0xff]  }
 0x4ab   : > { %v6033_v24 = vpop.f32.mrf.mxu1  ;;  %2241 = vadd.xlane.f32.xlu1 %v2240_v42  ;;  %6039 = vmatprep.subr.bf16.mxu0 %v6472_v29  ;;  %v6477_v29 = vld [vmem:[%s7002_s4 + $0x118] sm:$0xff]  }
 0x4ac   : > { %v6034_v33 = vadd.f32 %v6033_v24, %v6032_v22  ;;  %v2235_v60 = vadd.f32 %v2227_v2, %v9502_v37 }
 0x4ae   : > { %v2230_v32 = vadd.f32 %v6034_v33, %v2181_v47  ;;  %v2243_v46 = vsel %vm678_vm1, %v2235_v60, 0.0  ;;  %6040 = vmatpush3.bf16.msra.mxu0 %v6473_v25  ;;  %v6868_v33 = vld [vmem:[%s6972_s15 + $0x20] sm:$0xff]  ;;  %v6478_v25 = vld [vmem:[%s7002_s4 + $0x150] sm:$0xff]  }
 0x4af   : > { %2244 = vadd.xlane.f32.xlu0 %v2243_v46 }
 0x4b0   : > { %v2236_v1 = vadd.f32 %v2230_v32, %v9503_v26  ;;  %v6869_v32 = vld [vmem:[%s6972_s15 + $0x28] sm:$0xff] }
 0x4b2   : > { %v2246_v4 = vsel %vm678_vm1, %v2236_v1, 0.0 }
 0x4b3   : > { %2247 = vadd.xlane.f32.xlu1 %v2246_v4  ;;  %v2302_v4 = vld [vmem:[%s6992_s28 + $0x48] sm:$0xff] }
 0x530   : > { %v2239_v40 = vpop.xlane.xlu0 %2238 }
 0x531   : > { %v2249_v63 = vmul.f32 0.03125, %v2239_v40  ;;  %v6870_v40 = vld [vmem:[%s6972_s15 + $0x40] sm:$0xff] }
 0x533   : > { %v8151_v30 = vsub.f32 %v2233_v19, %v2249_v63  ;;  %v6474_v19 = vld [vmem:[%s7002_s4 + $0x160] sm:$0xff]  }
 0x534   : > { %v2242_v36 = vpop.xlane.xlu1 %2241  ;;  %6041 = vmatprep.subr.bf16.mxu0 %v6474_v19  ;;  %v6479_v19 = vld [vmem:[%s7002_s4 + $0x110] sm:$0xff]  }
 0x535   : > { %v2250_v50 = vmul.f32 0.03125, %v2242_v36  ;;  %v2257_v45 = vmul.f32 %v8151_v30, %v8151_v30  ;;  %6042 = vmatpush3.bf16.msra.mxu0 %v6475_v59  ;;  %v6871_v36 = vld [vmem:[%s6972_s15 + $0x48] sm:$0xff] }
 0x536   : > { %6043 = vmatprep.subr.bf16.mxu0 %v6476_v7  ;;  %v6480_v59 = vld [vmem:[%s7002_s4 + $0x148] sm:$0xff]  }
 0x537   : > { %v8155_v5 = vsub.f32 %v2234_v8, %v2250_v50  ;;  %v2261_v39 = vsel %vm678_vm1, %v2257_v45, 0.0 }
 0x538   : > { %2262 = vadd.xlane.f32.xlu0 %v2261_v39  ;;  %v2245_v16 = vpop.xlane.xlu0 %2244 }
 0x539   : > { %v2251_v0 = vmul.f32 0.03125, %v2245_v16  ;;  %v2258_v9 = vmul.f32 %v8155_v5, %v8155_v5  ;;  %v2701_v16 = vld [vmem:[%s6992_s28 + $0x90] sm:$0xff]  ;;  %6044 = vmatpush3.bf16.msra.mxu0 %v6477_v29 }
 0x53a   : > { %6045 = vmatprep.subr.bf16.mxu0 %v6478_v25 }
 0x53b   : > { %v8160_v3 = vsub.f32 %v2235_v60, %v2251_v0  ;;  %v2264_v62 = vsel %vm678_vm1, %v2258_v9, 0.0  ;;  %v2703_v0 = vld [vmem:[%s6992_s28 + $0xd0] sm:$0xff] }
 0x53c   : > { %2265 = vadd.xlane.f32.xlu1 %v2264_v62  ;;  %v2248_v31 = vpop.xlane.xlu1 %2247  ;;  %v6872_v9 = vld [vmem:[%s6972_s15 + $0x30] sm:$0xff]  ;;  %v5587_v49 = vcombine.low %v2701_v16, %v2703_v0 }
 0x53d   : > { %v2252_v21 = vmul.f32 0.03125, %v2248_v31  ;;  %v2259_v28 = vmul.f32 %v8160_v3, %v8160_v3  ;;  %6046 = vmatpush3.bf16.msra.mxu0 %v6479_v19 }
 0x53e   : > { %6047 = vmatprep.subr.bf16.mxu0 %v6480_v59 }
 0x53f   : > { %v8165_v43 = vsub.f32 %v2236_v1, %v2252_v21  ;;  %v2267_v23 = vsel %vm678_vm1, %v2259_v28, 0.0  ;;  %v2300_v1 = vld [vmem:[%s6992_s28 + $0x8] sm:$0xff]  ;;  %v6873_v21 = vld [vmem:[%s6972_s15 + $0x38] sm:$0xff] }
 0x540   : > { %2268 = vadd.xlane.f32.xlu0 %v2267_v23  ;;  %v5588_v23 = vcombine.high %v2701_v16, %v2703_v0 }
 0x541   : > { %v2260_v34 = vmul.f32 %v8165_v43, %v8165_v43 }
 0x543   : > { %v2270_v54 = vsel %vm678_vm1, %v2260_v34, 0.0  ;;  %v6874_v34 = vld [vmem:[%s6972_s15 + $0x50] sm:$0xff] }
 0x544   : > { %2271 = vadd.xlane.f32.xlu1 %v2270_v54  ;;  %v6875_v54 = vld [vmem:[%s6972_s15 + $0x58] sm:$0xff] }
 0x5c1   : > { %v2263_v12 = vpop.xlane.xlu0 %2262 }
 0x5c2   : > { %v2273_v35 = vmul.f32 0.03125, %v2263_v12  ;;  %v6481_v12 = vld [vmem:[%s7002_s4 + $0x108] sm:$0xff]  }
 0x5c3   : > { %6048 = vmatpush3.bf16.msra.mxu0 %v6481_v12 }
 0x5c4   : > { %v2277_v18 = vadd.f32 1e-05, %v2273_v35  ;;  %v6482_v35 = vld [vmem:[%s7002_s4 + $0x1f8] sm:$0xff]  }
 0x5c5   : > { %v2266_v55 = vpop.xlane.xlu1 %2265 }
 0x5c6   : > { %6732 = vrsqrt.f32 %v2277_v18  ;;  %v2274_v56 = vmul.f32 0.03125, %v2266_v55  ;;  %v6483_v18 = vld [vmem:[%s7002_s4 + $0x140] sm:$0xff]   ;;  %v6484_v55 = vld [vmem:[%s7002_s4 + $0x1b8] sm:$0xff]  }
 0x5c7   : > { %6049 = vmatprep.subr.bf16.mxu0 %v6483_v18 }
 0x5c8   : > { %v2278_v6 = vadd.f32 1e-05, %v2274_v56  ;;  %v6485_v56 = vld [vmem:[%s7002_s4 + $0x100] sm:$0xff]  }
 0x5c9   : > { %v2269_v27 = vpop.xlane.xlu0 %2268  ;;  %6050 = vmatpush3.bf16.msra.mxu0 %v6485_v56 }
 0x5ca   : > { %6734 = vrsqrt.f32 %v2278_v6  ;;  %v2275_v38 = vmul.f32 0.03125, %v2269_v27  ;;  %v6486_v6 = vld [vmem:[%s7002_s4 + $0x1f0] sm:$0xff]  }
 0x5cb   : > { %v6487_v27 = vld [vmem:[%s7002_s4 + $0x1b0] sm:$0xff]  }
 0x5cc   : > { %v2279_v8 = vadd.f32 1e-05, %v2275_v38  ;;  %v6488_v38 = vld [vmem:[%s7002_s4 + $0x1e8] sm:$0xff]  }
 0x5cd   : > { %v2272_v41 = vpop.xlane.xlu1 %2271 }
 0x5ce   : > { %6736 = vrsqrt.f32 %v2279_v8  ;;  %v2276_v22 = vmul.f32 0.03125, %v2272_v41  ;;  %v6489_v8 = vld [vmem:[%s7002_s4 + $0x1a8] sm:$0xff]   ;;  %v6493_v41 = vld [vmem:[%s7002_s4 + $0x78] sm:$0xff]  }
 0x5cf   : > { %6091 = vmatprep.subr.bf16.mxu0 %v6493_v41 }
 0x5d0   : > { %v2280_v2 = vadd.f32 1e-05, %v2276_v22  ;;  %v6490_v22 = vld [vmem:[%s7002_s4 + $0x1e0] sm:$0xff]  }
 0x5d2   : > { %6738 = vrsqrt.f32 %v2280_v2  ;;  %v6491_v2 = vld [vmem:[%s7002_s4 + $0x1a0] sm:$0xff]  }
 0x5d3   : > { %v6733_v42 = vpop.eup %6732 }
 0x5d4   : > { %v2285_v24 = vmul.f32 %v6733_v42, %v8151_v30  ;;  %v6492_v42 = vld [vmem:[%s7002_s4 + $0x1d8] sm:$0xff]  }
 0x5d6   : > { %v2289_v37 = vmul.f32 %v6868_v33, %v2285_v24  ;;  %v6494_v24 = vld [vmem:[%s7002_s4 + $0x198] sm:$0xff]   ;;  %v6498_v33 = vld [vmem:[%s7002_s4 + $0x190] sm:$0xff]  }
 0x5d7   : > { %v6735_v47 = vpop.eup %6734 }
 0x5d8   : > { %v2286_v60 = vmul.f32 %v6735_v47, %v8155_v5  ;;  %v8201_v63 = vadd.f32 %v6870_v40, %v2289_v37  ;;  %v5574_v5 = vcombine.high %v2300_v1, %v2302_v4  ;;  %v6496_v47 = vld [vmem:[%s7002_s4 + $0x1d0] sm:$0xff]   ;;  %v6500_v37 = vld [vmem:[%s7002_s4 + $0x1c8] sm:$0xff]  }
 0x5da   : > { %v2290_v46 = vmul.f32 %v6869_v32, %v2286_v60  ;;  %9504 = vst [vmem:[#allocation29_spill] sm:$0xff] %v8201_v63  ;;  %v6502_v60 = vld [vmem:[%s7002_s4 + $0x188] sm:$0xff]   ;;  %v6504_v32 = vld [vmem:[%s7002_s4 + $0x1c0] sm:$0xff]  }
 0x5db   : > { %v6737_v26 = vpop.eup %6736 }
 0x5dc   : > { %v8204_v50 = vadd.f32 %v6871_v36, %v2290_v46  ;;  %v2287_v30 = vmul.f32 %v6737_v26, %v8160_v3  ;;  %v5573_v3 = vcombine.low %v2300_v1, %v2302_v4  ;;  %v6506_v46 = vld [vmem:[%s7002_s4 + $0x180] sm:$0xff]   ;;  %v6509_v26 = vld [vmem:[%s7002_s4 + $0xf8] sm:$0xff]   ;;  %v2309_v1 = vlaneseq }
 0x5dd   : > { %v2307_v36 = vld [vmem:[%s6997_s3] sm:$0xf] }
 0x5de   : > { %9505 = vst [vmem:[#allocation11_spill] sm:$0xff] %v8204_v50  ;;  %v8209_v45 = vpack.c.bf16 %v8204_v50, %v8201_v63  ;;  %v2291_v62 = vmul.f32 %v6872_v9, %v2287_v30  ;;  %v2310_v4 = vshrl.u32 %v2309_v1, 7 }
 0x5df   : > { %v6739_v39 = vpop.eup %6738 }
 0x5e0   : > { %9506 = vst [vmem:[#allocation9_spill] sm:$0xff] %v8209_v45  ;;  %v2288_v31 = vmul.f32 %v6739_v39, %v8165_v43  ;;  %5579 = vmatmul.mubr.msk.bf16.vlgmr.msra.gmra.mxu1 %vm678_vm1, %v8209_v45  ;;  %v8223_v43 = vadd.f32 %v6874_v34, %v2291_v62  ;;  %v8284_v40 = vsub.s32 0, %v2310_v4  ;;  %v8287_v30 = vsub.s32 1, %v2310_v4 }
 0x5e1   : > { %2441 = vmatpush1.bf16.msra.mxu1 %v5577_v53  ;;  %2417 = vmatprep.mubr.bf16.mxu1 %v9309_v17  ;;  %v5590_v53 = vcombine.high %v2702_v20, %v2704_v13  ;;  %v8316_v7 = vsub.s32 3, %v2310_v4 }
 0x5e2   : > { %v2292_v28 = vmul.f32 %v6873_v21, %v2288_v31  ;;  %2442 = vmatprep.subr.bf16.mxu1 %v5574_v5  ;;  %9507 = vst [vmem:[#allocation17_spill] sm:$0xff] %v8223_v43  ;;  %9510 = vst [vmem:[#allocation23_spill] sm:$0xff] %v8284_v40  ;;  %v2312_v5 = vrot.slane %v2307_v36, %v8284_v40  ;;  %v2316_v39 = vrot.slane %v2307_v36, %v8287_v30 }
 0x5e3   : > { %9511 = vst [vmem:[#allocation15_spill] sm:$0xff] %v8287_v30  ;;  %9513 = vst [vmem:[#allocation27_spill] sm:$0xff] %v8316_v7 }
 0x5e4   : > { %v8226_v52 = vadd.f32 %v6875_v54, %v2292_v28 }
 0x5e5   : > { %2443 = vmatpush1.bf16.msra.mxu1 %v5573_v3 }
 0x5e6   : > { %9508 = vst [vmem:[#allocation22_spill] sm:$0xff] %v8226_v52  ;;  %v8230_v44 = vpack.c.bf16 %v8226_v52, %v8223_v43  ;;  %2779 = vmatprep.subr.bf16.mxu1 %v5588_v23 }
 0x5e8   : > { %9509 = vst [vmem:[#allocation19_spill] sm:$0xff] %v8230_v44  ;;  %5580 = vmatmul.mubr.msk.bf16.gmra.mxu1 %vm678_vm1, %v8230_v44 }
 0x5e9   : > { %2460 = vmatprep.mubr.bf16.mxu1 %v9309_v17 }
 0x5f0   : > { %5581 = vmatmul.mubr.msk.bf16.vlgmr.msra.gmra.mxu1 %vm678_vm1, %v8209_v45 }
 0x5f1   : > { %2780 = vmatpush1.bf16.msra.mxu1 %v5587_v49  ;;  %2470 = vmatprep.mubr.bf16.mxu1 %v9309_v17 }
 0x5f2   : > { %2781 = vmatprep.subr.bf16.mxu1 %v5584_v10  ;;  %v8304_v10 = vsub.s32 2, %v2310_v4 }
 0x5f4   : > { %9512 = vst [vmem:[#allocation24_spill] sm:$0xff] %v8304_v10 }
 0x5f5   : > { %2782 = vmatpush1.bf16.msra.mxu1 %v5583_v48 }
 0x5f6   : > { %2832 = vmatprep.subr.bf16.mxu1 %v5590_v53 }
 0x5f8   : > { %5582 = vmatmul.mubr.msk.bf16.gmra.mxu1 %vm678_vm1, %v8230_v44 }
 0x5f9   : > { %2799 = vmatprep.mubr.bf16.mxu1 %v9309_v17 }
 0x600   : > { %5591 = vmatmul.mubr.msk.bf16.vlgmr.msra.gmra.mxu1 %vm678_vm1, %v8209_v45 }
 0x601   : > { %2809 = vmatprep.mubr.bf16.mxu1 %v9309_v17  ;;  %2833 = vmatpush1.bf16.msra.mxu1 %v5589_v14 }
 0x602   : > { %2834 = vmatprep.subr.bf16.mxu1 %v5586_v57 }
 0x605   : > { %2835 = vmatpush1.bf16.msra.mxu1 %v5585_v11  ;;  %v8314_v11 = vrot.slane %v2307_v36, %v8304_v10 }
 0x606   : > { %6063 = vmatprep.subr.bf16.mxu1 %v6482_v35 }
 0x608   : > { %5592 = vmatmul.mubr.msk.bf16.gmra.mxu1 %vm678_vm1, %v8230_v44 }
 0x609   : > { %2852 = vmatprep.mubr.bf16.mxu1 %v9309_v17 }
 0x610   : > { %5593 = vmatmul.mubr.msk.bf16.vlgmr.msra.gmra.mxu1 %vm678_vm1, %v8209_v45 }
 0x611   : > { %2862 = vmatprep.mubr.bf16.mxu1 %v9309_v17  ;;  %6064 = vmatpush3.bf16.msra.mxu1 %v6484_v55 }
 0x612   : > { %6065 = vmatprep.subr.bf16.mxu1 %v6486_v6 }
 0x615   : > { %6066 = vmatpush3.bf16.msra.mxu1 %v6487_v27 }
 0x616   : > { %6067 = vmatprep.subr.bf16.mxu1 %v6488_v38 }
 0x618   : > { %5594 = vmatmul.mubr.msk.bf16.gmra.mxu1 %vm678_vm1, %v8230_v44 }
 0x619   : > { %6068 = vmatpush3.bf16.msra.mxu1 %v6489_v8  ;;  %v8327_v8 = vrot.slane %v2307_v36, %v8316_v7 }
 0x61a   : > { %6069 = vmatprep.subr.bf16.mxu1 %v6490_v22 }
 0x61d   : > { %6070 = vmatpush3.bf16.msra.mxu1 %v6491_v2 }
 0x61e   : > { %6071 = vmatprep.subr.bf16.mxu1 %v6492_v42 }
 0x621   : > { %6072 = vmatpush3.bf16.msra.mxu1 %v6494_v24 }
 0x622   : > { %6073 = vmatprep.subr.bf16.mxu1 %v6496_v47 }
 0x625   : > { %6074 = vmatpush3.bf16.msra.mxu1 %v6498_v33 }
 0x626   : > { %6075 = vmatprep.subr.bf16.mxu1 %v6500_v37 }
 0x629   : > { %6076 = vmatpush3.bf16.msra.mxu1 %v6502_v60 }
 0x62a   : > { %6077 = vmatprep.subr.bf16.mxu1 %v6504_v32 }
 0x62d   : > { %6078 = vmatpush3.bf16.msra.mxu1 %v6506_v46 }
 0x62e   : > { %6119 = vmatprep.subr.bf16.mxu1 %v6509_v26 }
 0x6a0   : > { %v2409_v16 = vpop.f32.mrf.mxu1 }
 0x6a1   : > { %v8291_v0 = vadd.f32 %v2409_v16, %v2312_v5  ;;  %v2705_v16 = vld [vmem:[%s6997_s3 + $0x4] sm:$0xf] }
 0x6a2   : > { %v2411_v9 = vpop.f32.mrf.mxu1 }
 0x6a3   : > { %v2497_v62 = vmul.f32 0.044715, %v8291_v0  ;;  %v8294_v31 = vadd.f32 %v2411_v9, %v2316_v39 }
 0x6a4   : > { %v2413_v3 = vpop.f32.mrf.mxu1 }
 0x6a5   : > { %v2513_v21 = vmul.f32 %v2497_v62, %v8291_v0  ;;  %v8297_v28 = vadd.f32 %v2413_v3, %v2312_v5  ;;  %v2498_v23 = vmul.f32 0.044715, %v8294_v31 }
 0x6a6   : > { %v2415_v34 = vpop.f32.mrf.mxu1 }
 0x6a7   : > { %v2529_v54 = vmul.f32 %v2513_v21, %v8291_v0  ;;  %v2501_v15 = vmul.f32 0.044715, %v8297_v28  ;;  %v8302_v61 = vadd.f32 %v2415_v34, %v2316_v39  ;;  %v2514_v53 = vmul.f32 %v2498_v23, %v8294_v31 }
 0x6a8   : > { %v2419_v49 = vpop.f32.mrf.mxu1 }
 0x6a9   : > { %v2545_v20 = vadd.f32 %v2529_v54, %v8291_v0  ;;  %v2517_v13 = vmul.f32 %v2501_v15, %v8297_v28  ;;  %v8308_v48 = vadd.f32 %v2419_v49, %v2312_v5  ;;  %v2502_v14 = vmul.f32 0.044715, %v8302_v61 }
 0x6aa   : > { %v2421_v51 = vpop.f32.mrf.mxu1  ;;  %v2530_v12 = vmul.f32 %v2514_v53, %v8294_v31  ;;  %v8354_v53 = vrot.slane %v2705_v16, %v8287_v30 }
 0x6ab   : > { %v2533_v58 = vmul.f32 %v2517_v13, %v8297_v28  ;;  %v2561_v29 = vmul.f32 0.7978846, %v2545_v20  ;;  %v2505_v19 = vmul.f32 0.044715, %v8308_v48  ;;  %v8320_v59 = vadd.f32 %v2421_v51, %v2316_v39 }
 0x6ac   : > { %v2423_v57 = vpop.f32.mrf.mxu1  ;;  %v2518_v56 = vmul.f32 %v2502_v14, %v8302_v61  ;;  %v2546_v24 = vadd.f32 %v2530_v12, %v8294_v31  ;;  %v8351_v13 = vrot.slane %v2705_v16, %v8284_v40  ;;  %v8357_v51 = vrot.slane %v2705_v16, %v8304_v10 }
 0x6ad   : > { %v2549_v25 = vadd.f32 %v2533_v58, %v8297_v28  ;;  %9514 = vst [vmem:[#allocation25_spill] sm:$0xff] %v8320_v59  ;;  %v2424_v35 = vadd.f32 %v2423_v57, %v2312_v5  ;;  %6740 = vtanh.f32 %v2561_v29  ;;  %v2521_v41 = vmul.f32 %v2505_v19, %v8308_v48 }
 0x6ae   : > { %v2425_v18 = vpop.f32.mrf.mxu1  ;;  %v2506_v22 = vmul.f32 0.044715, %v8320_v59  ;;  %v2534_v47 = vmul.f32 %v2518_v56, %v8302_v61  ;;  %v8360_v58 = vrot.slane %v2705_v16, %v8316_v7 }
 0x6af   : > { %v2565_v55 = vmul.f32 0.7978846, %v2549_v25  ;;  %v2509_v6 = vmul.f32 0.044715, %v2424_v35  ;;  %v8324_v27 = vadd.f32 %v2425_v18, %v2316_v39  ;;  %v2537_v26 = vmul.f32 %v2521_v41, %v8308_v48 }
 0x6b0   : > { %v2462_v38 = vpop.f32.mrf.mxu1  ;;  %v2522_v1 = vmul.f32 %v2506_v22, %v8320_v59  ;;  %v2562_v39 = vmul.f32 0.7978846, %v2546_v24  ;;  %v2550_v9 = vadd.f32 %v2534_v47, %v8302_v61  ;;  %v2481_v18 = vmul.f32 0.5, %v8291_v0 }
 0x6b1   : > { %v2463_v2 = vadd.f32 %v2462_v38, %v8314_v11  ;;  %6742 = vtanh.f32 %v2565_v55  ;;  %v2525_v37 = vmul.f32 %v2509_v6, %v2424_v35  ;;  %v2510_v60 = vmul.f32 0.044715, %v8324_v27 }
 0x6b2   : > { %v2464_v42 = vpop.f32.mrf.mxu1  ;;  %v2538_v34 = vmul.f32 %v2522_v1, %v8320_v59  ;;  %v2553_v54 = vadd.f32 %v2537_v26, %v8308_v48  ;;  %6744 = vtanh.f32 %v2562_v39  ;;  %v2566_v14 = vmul.f32 0.7978846, %v2550_v9 }
 0x6b3   : > { %v2499_v33 = vmul.f32 0.044715, %v2463_v2  ;;  %v8336_v32 = vadd.f32 %v2464_v42, %v8327_v8  ;;  %v2541_v62 = vmul.f32 %v2525_v37, %v2424_v35  ;;  %v2526_v3 = vmul.f32 %v2510_v60, %v8324_v27 }
 0x6b4   : > { %v2466_v46 = vpop.f32.mrf.mxu1  ;;  %v8371_v55 = vmul.f32 0.5, %v8294_v31  ;;  %v2554_v56 = vadd.f32 %v2538_v34, %v8320_v59  ;;  %v2569_v6 = vmul.f32 0.7978846, %v2553_v54  ;;  %v2485_v41 = vmul.f32 0.5, %v8297_v28 }
 0x6b5   : > { %v2515_v4 = vmul.f32 %v2499_v33, %v2463_v2  ;;  %v8341_v36 = vadd.f32 %v2466_v46, %v8314_v11  ;;  %v2500_v21 = vmul.f32 0.044715, %v8336_v32  ;;  %v2542_v57 = vmul.f32 %v2526_v3, %v8324_v27 }
 0x6b6   : > { %v2468_v5 = vpop.f32.mrf.mxu1  ;;  %v2557_v12 = vadd.f32 %v2541_v62, %v2424_v35  ;;  %v8379_v47 = vmul.f32 0.5, %v8302_v61  ;;  %6746 = vtanh.f32 %v2566_v14  ;;  %v8385_v31 = vmul.f32 0.5, %v8308_v48 }
 0x6b7   : > { %v2531_v15 = vmul.f32 %v2515_v4, %v2463_v2  ;;  %v2503_v49 = vmul.f32 0.044715, %v8341_v36  ;;  %v2516_v29 = vmul.f32 %v2500_v21, %v8336_v32  ;;  %v8365_v25 = vadd.f32 %v2468_v5, %v8327_v8 }
 0x6b8   : > { %v2472_v23 = vpop.f32.mrf.mxu1  ;;  %v8387_v37 = vmul.f32 0.5, %v2424_v35  ;;  %v2558_v26 = vadd.f32 %v2542_v57, %v8324_v27  ;;  %v2573_v1 = vmul.f32 0.7978846, %v2557_v12  ;;  %v8392_v61 = vmul.f32 0.5, %v2463_v2 }
 0x6b9   : > { %v2547_v22 = vadd.f32 %v2531_v15, %v2463_v2  ;;  %v2519_v42 = vmul.f32 %v2503_v49, %v8341_v36  ;;  %v8382_v0 = vadd.f32 %v2472_v23, %v8314_v11  ;;  %v2532_v28 = vmul.f32 %v2516_v29, %v8336_v32 }
 0x6ba   : > { %v2474_v20 = vpop.f32.mrf.mxu1  ;;  %v6741_v38 = vpop.eup %6740  ;;  %v2504_v60 = vmul.f32 0.044715, %v8365_v25  ;;  %v8397_v5 = vmul.f32 0.7978846, %v2554_v56  ;;  %6748 = vtanh.f32 %v2569_v6  ;;  %v8401_v62 = vmul.f32 0.5, %v8341_v36 }
 0x6bb   : > { %v2563_v48 = vmul.f32 0.7978846, %v2547_v22  ;;  %v2535_v35 = vmul.f32 %v2519_v42, %v8341_v36  ;;  %v2593_v16 = vadd.f32 1.0, %v6741_v38  ;;  %v2507_v3 = vmul.f32 0.044715, %v8382_v0 }
 0x6bc   : > { %v8367_v19 = vpop.f32.mrf.mxu1  ;;  %v2520_v23 = vmul.f32 %v2504_v60, %v8365_v25  ;;  %v2548_v54 = vadd.f32 %v2532_v28, %v8336_v32  ;;  %v8410_v15 = vmul.f32 0.7978846, %v2558_v26  ;;  %6750 = vtanh.f32 %v2573_v1 }
 0x6bd   : > { %v8413_v49 = vadd.f32 %v2474_v20, %v8327_v8  ;;  %6752 = vtanh.f32 %v2563_v48  ;;  %v2551_v12 = vadd.f32 %v2535_v35, %v8341_v36  ;;  %v8421_v6 = vmul.f32 %v2593_v16, %v2481_v18 }
 0x6be   : > { %v8376_v24 = vpop.f32.mrf.mxu1  ;;  %v6743_v33 = vpop.eup %6742  ;;  %v2523_v42 = vmul.f32 %v2507_v3, %v8382_v0  ;;  %v2536_v60 = vmul.f32 %v2520_v23, %v8365_v25  ;;  %v2564_v26 = vmul.f32 0.7978846, %v2548_v54  ;;  %v8443_v16 = vadd.f32 %v8367_v19, %v8314_v11 }
 0x6bf   : > { %v2597_v9 = vadd.f32 1.0, %v6743_v33  ;;  %9515 = vst [vmem:[#allocation16_spill] sm:$0xff] %v8421_v6  ;;  %v6745_v22 = vpop.eup %6744 }
 0x6c0   : > { %v2801_v46 = vpop.f32.mrf.mxu1  ;;  %6754 = vtanh.f32 %v2564_v26  ;;  %v8477_v26 = vadd.f32 %v8376_v24, %v8327_v8  ;;  %v8506_v17 = vmul.f32 0.044715, %v8443_v16 }
 0x6c1   : > { %v8395_v4 = vadd.f32 %v2801_v46, %v8351_v13  ;;  %v8423_v38 = vmul.f32 %v2597_v9, %v2485_v41 }
 0x6c2   : > { %v2803_v39 = vpop.f32.mrf.mxu1 }
 0x6c3   : > { %v2889_v2 = vmul.f32 0.044715, %v8395_v4  ;;  %v8406_v21 = vadd.f32 %v2803_v39, %v8354_v53  ;;  %9516 = vst [vmem:[#allocation13_spill] sm:$0xff] %v8423_v38  ;;  %v2567_v39 = vmul.f32 0.7978846, %v2551_v12  ;;  %v8456_v12 = vmul.f32 %v2523_v42, %v8382_v0  ;;  %v6495_v38 = vld [vmem:[%s7002_s4 + $0x38] sm:$0xff]  }
 0x6c4   : > { %v2805_v34 = vpop.f32.mrf.mxu1 }
 0x6c5   : > { %v2905_v14 = vmul.f32 %v2889_v2, %v8395_v4  ;;  %v2890_v57 = vmul.f32 0.044715, %v8406_v21  ;;  %v8418_v29 = vadd.f32 %v2805_v34, %v8351_v13  ;;  %v8446_v2 = vadd.f32 1.0, %v6745_v22 }
 0x6c6   : > { %v2807_v56 = vpop.f32.mrf.mxu1  ;;  %v2552_v22 = vadd.f32 %v2536_v60, %v8365_v25 }
 0x6c7   : > { %v2921_v20 = vmul.f32 %v2905_v14, %v8395_v4  ;;  %v2906_v33 = vmul.f32 %v2890_v57, %v8406_v21  ;;  %v2893_v28 = vmul.f32 0.044715, %v8418_v29  ;;  %v8431_v46 = vadd.f32 %v2807_v56, %v8354_v53  ;;  %v8453_v57 = vpop.eup %6746 }
 0x6c8   : > { %v2811_v36 = vpop.f32.mrf.mxu1 }
 0x6c9   : > { %v2937_v41 = vadd.f32 %v2921_v20, %v8395_v4  ;;  %v2922_v1 = vmul.f32 %v2906_v33, %v8406_v21  ;;  %v2909_v48 = vmul.f32 %v2893_v28, %v8418_v29  ;;  %v8439_v35 = vadd.f32 %v2811_v36, %v8351_v13  ;;  %v8464_v36 = vpop.eup %6748 }
 0x6ca   : > { %v2894_v9 = vmul.f32 0.044715, %v8431_v46  ;;  %v2813_v3 = vpop.f32.mrf.mxu1 }
 0x6cb   : > { %v2953_v23 = vmul.f32 0.7978846, %v2937_v41  ;;  %v2925_v34 = vmul.f32 %v2909_v48, %v8418_v29  ;;  %v2897_v54 = vmul.f32 0.044715, %v8439_v35  ;;  %v8451_v14 = vadd.f32 %v2813_v3, %v8354_v53 }
 0x6cc   : > { %v2910_v11 = vmul.f32 %v2894_v9, %v8431_v46  ;;  %v2815_v19 = vpop.f32.mrf.mxu1  ;;  %v2938_v56 = vadd.f32 %v2922_v1, %v8406_v21 }
 0x6cd   : > { %v2941_v20 = vadd.f32 %v2925_v34, %v8418_v29  ;;  %v2913_v33 = vmul.f32 %v2897_v54, %v8439_v35  ;;  %v2898_v28 = vmul.f32 0.044715, %v8451_v14  ;;  %6756 = vtanh.f32 %v2953_v23 }
 0x6ce   : > { %v2926_v42 = vmul.f32 %v2910_v11, %v8431_v46  ;;  %v8468_v41 = vadd.f32 %v2815_v19, %v8351_v13  ;;  %v2817_v48 = vpop.f32.mrf.mxu1  ;;  %v2954_v9 = vmul.f32 0.7978846, %v2938_v56  ;;  %v8481_v11 = vpop.eup %6750 }
 0x6cf   : > { %v2957_v1 = vmul.f32 0.7978846, %v2941_v20  ;;  %v2929_v60 = vmul.f32 %v2913_v33, %v8439_v35  ;;  %v2914_v3 = vmul.f32 %v2898_v28, %v8451_v14  ;;  %v8473_v34 = vadd.f32 %v2817_v48, %v8354_v53  ;;  %v8490_v48 = vpop.eup %6752 }
 0x6d0   : > { %v2901_v23 = vmul.f32 0.044715, %v8468_v41  ;;  %v2854_v54 = vpop.f32.mrf.mxu1  ;;  %v2942_v13 = vadd.f32 %v2926_v42, %v8431_v46  ;;  %6758 = vtanh.f32 %v2954_v9  ;;  %v2568_v28 = vmul.f32 0.7978846, %v2552_v22 }
 0x6d1   : > { %6760 = vtanh.f32 %v2957_v1  ;;  %v2930_v19 = vmul.f32 %v2914_v3, %v8451_v14  ;;  %v2902_v56 = vmul.f32 0.044715, %v8473_v34  ;;  %v8486_v53 = vadd.f32 %v2854_v54, %v8357_v51 }
 0x6d2   : > { %v2917_v20 = vmul.f32 %v2901_v23, %v8468_v41  ;;  %v2856_v8 = vpop.f32.mrf.mxu1  ;;  %v2958_v24 = vmul.f32 0.7978846, %v2942_v13  ;;  %v2945_v33 = vadd.f32 %v2929_v60, %v8439_v35  ;;  %6762 = vtanh.f32 %v2567_v39 }
 0x6d3   : > { %v2918_v42 = vmul.f32 %v2902_v56, %v8473_v34  ;;  %v2891_v9 = vmul.f32 0.044715, %v8486_v53  ;;  %v8495_v1 = vadd.f32 %v2856_v8, %v8360_v58  ;;  %v2946_v23 = vadd.f32 %v2930_v19, %v8451_v14 }
 0x6d4   : > { %v2933_v3 = vmul.f32 %v2917_v20, %v8468_v41  ;;  %v2858_v54 = vpop.f32.mrf.mxu1  ;;  %6764 = vtanh.f32 %v2958_v24  ;;  %v2961_v13 = vmul.f32 0.7978846, %v2945_v33 }
 0x6d5   : > { %v2934_v60 = vmul.f32 %v2918_v42, %v8473_v34  ;;  %v2907_v22 = vmul.f32 %v2891_v9, %v8486_v53  ;;  %v2892_v39 = vmul.f32 0.044715, %v8495_v1  ;;  %v8503_v56 = vadd.f32 %v2858_v54, %v8357_v51 }
 0x6d6   : > { %v2860_v8 = vpop.f32.mrf.mxu1  ;;  %v2962_v18 = vmul.f32 0.7978846, %v2946_v23  ;;  %v2949_v20 = vadd.f32 %v2933_v3, %v8468_v41  ;;  %6766 = vtanh.f32 %v2568_v28 }
 0x6d7   : > { %v2923_v19 = vmul.f32 %v2907_v22, %v8486_v53  ;;  %v2908_v24 = vmul.f32 %v2892_v39, %v8495_v1  ;;  %v2895_v33 = vmul.f32 0.044715, %v8503_v56  ;;  %6768 = vtanh.f32 %v2961_v13  ;;  %v8522_v39 = vpop.eup %6754 }
 0x6d8   : > { %v8513_v42 = vadd.f32 %v2860_v8, %v8360_v58  ;;  %v2864_v9 = vpop.f32.mrf.mxu1  ;;  %v2950_v54 = vadd.f32 %v2934_v60, %v8473_v34  ;;  %6770 = vtanh.f32 %v2962_v18  ;;  %v2965_v52 = vmul.f32 0.7978846, %v2949_v20 }
 0x6d9   : > { %v2939_v23 = vadd.f32 %v2923_v19, %v8486_v53  ;;  %v2924_v3 = vmul.f32 %v2908_v24, %v8495_v1  ;;  %v2911_v28 = vmul.f32 %v2895_v33, %v8503_v56  ;;  %v8520_v22 = vadd.f32 %v2864_v9, %v8357_v51 }
 0x6da   : > { %v2873_v13 = vmul.f32 0.5, %v8395_v4  ;;  %v2896_v8 = vmul.f32 0.044715, %v8513_v42  ;;  %v2866_v43 = vpop.f32.mrf.mxu1  ;;  %v2966_v50 = vmul.f32 0.7978846, %v2950_v54  ;;  %6772 = vtanh.f32 %v2965_v52  ;;  %v6757_v18 = vpop.eup %6756 }
 0x6db   : > { %v2955_v60 = vmul.f32 0.7978846, %v2939_v23  ;;  %v2927_v20 = vmul.f32 %v2911_v28, %v8503_v56  ;;  %v2899_v19 = vmul.f32 0.044715, %v8520_v22  ;;  %v8529_v24 = vadd.f32 %v2866_v43, %v8360_v58 }
 0x6dc   : > { %v2877_v33 = vmul.f32 0.5, %v8418_v29  ;;  %v2912_v9 = vmul.f32 %v2896_v8, %v8513_v42  ;;  %v2868_v63 = vpop.f32.mrf.mxu1  ;;  %v2874_v4 = vmul.f32 0.5, %v8406_v21  ;;  %6774 = vtanh.f32 %v2966_v50 }
 0x6dd   : > { %v6759_v7 = vpop.eup %6758  ;;  %v2943_v52 = vadd.f32 %v2927_v20, %v8503_v56  ;;  %v2900_v54 = vmul.f32 0.044715, %v8529_v24  ;;  %v2878_v23 = vmul.f32 0.5, %v8431_v46  ;;  %v2940_v28 = vadd.f32 %v2924_v3, %v8495_v1 }
 0x6de   : > { %v6761_v10 = vpop.eup %6760  ;;  %6776 = vtanh.f32 %v2955_v60  ;;  %v2928_v43 = vmul.f32 %v2912_v9, %v8513_v42  ;;  %v8540_v29 = vadd.f32 %v2868_v63, %v8357_v51  ;;  %v2870_v8 = vpop.f32.mrf.mxu1  ;;  %v2985_v30 = vadd.f32 1.0, %v6757_v18 }
 0x6df   : > { %v2959_v21 = vmul.f32 0.7978846, %v2943_v52  ;;  %v2915_v50 = vmul.f32 %v2899_v19, %v8520_v22  ;;  %v2916_v20 = vmul.f32 %v2900_v54, %v8529_v24  ;;  %v8545_v40 = vadd.f32 %v2870_v8, %v8360_v58  ;;  %v8547_v46 = vpop.eup %6762 }
 0x6e0   : > { %v2903_v3 = vmul.f32 0.044715, %v8540_v29  ;;  %v2986_v60 = vadd.f32 1.0, %v6759_v7  ;;  %v2989_v44 = vadd.f32 1.0, %v6761_v10  ;;  %v2944_v9 = vadd.f32 %v2928_v43, %v8513_v42 }
 0x6e1   : > { %v6765_v63 = vpop.eup %6764  ;;  %6778 = vtanh.f32 %v2959_v21  ;;  %v2932_v51 = vmul.f32 %v2916_v20, %v8529_v24  ;;  %v2904_v18 = vmul.f32 0.044715, %v8545_v40  ;;  %v2956_v19 = vmul.f32 0.7978846, %v2940_v28 }
 0x6e2   : > { %v2919_v52 = vmul.f32 %v2903_v3, %v8540_v29  ;;  %v2990_v54 = vadd.f32 1.0, %v6765_v63  ;;  %v3005_v58 = vmul.f32 %v2989_v44, %v2877_v33  ;;  %v2960_v8 = vmul.f32 0.7978846, %v2944_v9 }
 0x6e3   : > { %v8554_v45 = vpop.eup %6766  ;;  %v2527_v7 = vmul.f32 %v8506_v17, %v8443_v16  ;;  %v2931_v10 = vmul.f32 %v2915_v50, %v8520_v22  ;;  %v2920_v43 = vmul.f32 %v2904_v18, %v8545_v40  ;;  %6780 = vtanh.f32 %v2956_v19 }
 0x6e4   : > { %v6769_v21 = vpop.eup %6768  ;;  %v2935_v28 = vmul.f32 %v2919_v52, %v8540_v29  ;;  %v3002_v20 = vmul.f32 %v2986_v60, %v2874_v4  ;;  %v3006_v3 = vmul.f32 %v2990_v54, %v2878_v23  ;;  %v3001_v63 = vmul.f32 %v2985_v30, %v2873_v13  ;;  %v6497_v52 = vld [vmem:[%s7002_s4 + $0x70] sm:$0xff]  }
 0x6e5   : > { %v6771_v44 = vpop.eup %6770  ;;  %v2936_v33 = vmul.f32 %v2920_v43, %v8545_v40  ;;  %v2598_v9 = vadd.f32 1.0, %v8453_v57  ;;  %6782 = vtanh.f32 %v2960_v8  ;;  %v2948_v17 = vadd.f32 %v2932_v51, %v8529_v24  ;;  %v6499_v43 = vld [vmem:[%s7002_s4 + $0x30] sm:$0xff]  }
 0x6e6   : > { %v3018_v6 = vpack.c.bf16 %v3006_v3, %v3002_v20  ;;  %v3017_v50 = vpack.c.bf16 %v3005_v58, %v3001_v63  ;;  %v2601_v18 = vadd.f32 1.0, %v8464_v36  ;;  %v2605_v19 = vadd.f32 1.0, %v8481_v11 }
 0x6e7   : > { %v6773_v59 = vpop.eup %6772  ;;  %v2952_v4 = vadd.f32 %v2936_v33, %v8545_v40  ;;  %v2964_v30 = vmul.f32 0.7978846, %v2948_v17  ;;  %v2947_v13 = vadd.f32 %v2931_v10, %v8520_v22  ;;  %v2951_v57 = vadd.f32 %v2935_v28, %v8540_v29 }
 0x6e8   : > { %3313 = vmatprep.mubr.bf16.mxu0 %v3018_v6  ;;  %v2994_v23 = vadd.f32 1.0, %v6771_v44  ;;  %v2885_v60 = vmul.f32 0.5, %v8468_v41  ;;  %v2993_v51 = vadd.f32 1.0, %v6769_v21  ;;  %v2997_v54 = vadd.f32 1.0, %v6773_v59  ;;  %v6501_v59 = vld [vmem:[%s7002_s4 + $0x68] sm:$0xff]  }
 0x6e9   : > { %v6775_v36 = vpop.eup %6774  ;;  %3314 = vmatmul.mubr.bf16.vlgmr.msra.gmra.mxu0 %v3017_v50  ;;  %v2968_v11 = vmul.f32 0.7978846, %v2952_v4  ;;  %6784 = vtanh.f32 %v2964_v30  ;;  %v2963_v58 = vmul.f32 0.7978846, %v2947_v13  ;;  %v2967_v8 = vmul.f32 0.7978846, %v2951_v57 }
 0x6ea   : > { %6092 = vmatpush3.bf16.msra.mxu0 %v6495_v38  ;;  %v2882_v20 = vmul.f32 0.5, %v8451_v14  ;;  %v2886_v10 = vmul.f32 0.5, %v8473_v34  ;;  %v2998_v28 = vadd.f32 1.0, %v6775_v36  ;;  %v2881_v6 = vmul.f32 0.5, %v8439_v35 }
 0x6eb   : > { %v6777_v3 = vpop.eup %6776  ;;  %v2512_v41 = vmul.f32 0.044715, %v8477_v26  ;;  %6093 = vmatprep.subr.bf16.mxu0 %v6497_v52  ;;  %v3013_v21 = vmul.f32 %v2997_v54, %v2885_v60  ;;  %v2614_v63 = vmul.f32 %v2598_v9, %v8379_v47  ;;  %6786 = vtanh.f32 %v2968_v11  ;;  %v6503_v9 = vld [vmem:[%s7002_s4 + $0x28] sm:$0xff]   ;;  %v6508_v11 = vld [vmem:[%s7002_s4 + $0x58] sm:$0xff]  }
 0x6ec   : > { %v3010_v44 = vmul.f32 %v2994_v23, %v2882_v20  ;;  %v3014_v38 = vmul.f32 %v2998_v28, %v2886_v10  ;;  %v3009_v33 = vmul.f32 %v2993_v51, %v2881_v6  ;;  %6788 = vtanh.f32 %v2963_v58 }
 0x6ed   : > { %6790 = vtanh.f32 %v2967_v8  ;;  %v8580_v14 = vmul.f32 %v2601_v18, %v8385_v31  ;;  %v8583_v35 = vmul.f32 %v2605_v19, %v8387_v37  ;;  %v2595_v34 = vadd.f32 1.0, %v8490_v48  ;;  %v6505_v18 = vld [vmem:[%s7002_s4 + $0x60] sm:$0xff]  }
 0x6ee   : > { %v6779_v17 = vpop.eup %6778  ;;  %v2543_v50 = vmul.f32 %v2527_v7, %v8443_v16  ;;  %6094 = vmatpush3.bf16.msra.mxu0 %v6499_v43  ;;  %v3022_v47 = vpack.c.bf16 %v3014_v38, %v3010_v44  ;;  %v2610_v52 = vmul.f32 %v8446_v2, %v8371_v55  ;;  %v2599_v4 = vadd.f32 1.0, %v8547_v46  ;;  %v6513_v38 = vld [vmem:[%s7002_s4 + $0xf0] sm:$0xff]  }
 0x6ef   : > { %v2508_v30 = vmul.f32 0.044715, %v8413_v49  ;;  %6095 = vmatprep.subr.bf16.mxu0 %v6501_v59  ;;  %v3021_v31 = vpack.c.bf16 %v3013_v21, %v3009_v33  ;;  %6792 = vtanh.f32 %v8410_v15  ;;  %v2629_v37 = vpack.c.bf16 %v8583_v35, %v8580_v14  ;;  %v6511_v59 = vld [vmem:[%s7002_s4 + $0xb8] sm:$0xff]   ;;  %v9522_v14 = vld [vmem:[#allocation9_spill] sm:$0xff] }
 0x6f0   : > { %v6781_v48 = vpop.eup %6780  ;;  %3321 = vmatprep.mubr.bf16.mxu0 %v3022_v47  ;;  %v2626_v7 = vpack.c.bf16 %v2614_v63, %v2610_v52  ;;  %v2991_v19 = vadd.f32 1.0, %v6779_v17  ;;  %v8597_v13 = vmul.f32 %v2595_v34, %v8392_v61  ;;  %v8600_v55 = vmul.f32 %v2599_v4, %v8401_v62  ;;  %v6507_v61 = vld [vmem:[%s7002_s4 + $0x20] sm:$0xff]   ;;  %v6514_v4 = vld [vmem:[%s7002_s4 + $0x10] sm:$0xff]  }
 0x6f1   : > { %v2528_v2 = vmul.f32 %v2512_v41, %v8477_v26  ;;  %3322 = vmatmul.mubr.bf16.gmra.mxu0 %v3021_v31  ;;  %v2988_v46 = vadd.f32 1.0, %v6781_v48  ;;  %6794 = vtanh.f32 %v8397_v5  ;;  %v2555_v15 = vadd.f32 %v8456_v12, %v8382_v0 }
 0x6f2   : > { %v6783_v57 = vpop.eup %6782  ;;  %v2879_v23 = vmul.f32 0.5, %v8503_v56  ;;  %6096 = vmatpush3.bf16.msra.mxu0 %v6503_v9  ;;  %3603 = vmatprep.mubr.bf16.mxu0 %v2626_v7  ;;  %v2987_v60 = vadd.f32 1.0, %v6777_v3  ;;  %v2627_v62 = vpack.c.bf16 %v8600_v55, %v8597_v13  ;;  %v2559_v51 = vadd.f32 %v2543_v50, %v8443_v16  ;;  %v6533_v13 = vld [vmem:[%s7002_s4 + $0x238] sm:$0xff]   ;;  %v6534_v55 = vld [vmem:[%s7002_s4 + $0x270] sm:$0xff]  }
 0x6f3   : > { %v2524_v54 = vmul.f32 %v2508_v30, %v8413_v49  ;;  %6097 = vmatprep.subr.bf16.mxu0 %v6505_v18  ;;  %v2876_v5 = vmul.f32 0.5, %v8495_v1  ;;  %v2880_v12 = vmul.f32 0.5, %v8513_v42  ;;  %v2992_v36 = vadd.f32 1.0, %v6783_v57  ;;  %v6510_v1 = vld [vmem:[%s7002_s4 + $0x18] sm:$0xff]  }
 0x6f4   : > { %v2875_v56 = vmul.f32 0.5, %v8486_v53  ;;  %v3007_v58 = vmul.f32 %v2991_v19, %v2879_v23  ;;  %v2571_v8 = vmul.f32 0.7978846, %v2555_v15  ;;  %v2575_v43 = vmul.f32 0.7978846, %v2559_v51  ;;  %v6512_v53 = vld [vmem:[%s7002_s4 + $0x50] sm:$0xff]  }
 0x6f5   : > { %v2544_v20 = vmul.f32 %v2528_v2, %v8477_v26  ;;  %v3004_v10 = vmul.f32 %v2988_v46, %v2876_v5  ;;  %v3008_v28 = vmul.f32 %v2992_v36, %v2880_v12  ;;  %v2540_v42 = vmul.f32 %v2524_v54, %v8413_v49  ;;  %v6516_v46 = vld [vmem:[%s7002_s4 + $0x48] sm:$0xff]   ;;  %v6520_v36 = vld [vmem:[%s7002_s4 + $0x40] sm:$0xff]  }
 0x6f6   : > { %v6785_v6 = vpop.eup %6784  ;;  %6098 = vmatpush3.bf16.msra.mxu0 %v6507_v61  ;;  %v3003_v3 = vmul.f32 %v2987_v60, %v2875_v56  ;;  %6796 = vtanh.f32 %v2571_v8  ;;  %v2884_v33 = vmul.f32 0.5, %v8529_v24  ;;  %v2888_v17 = vmul.f32 0.5, %v8545_v40  ;;  %v6515_v40 = vld [vmem:[%s7002_s4 + $0xb0] sm:$0xff]   ;;  %v6518_v54 = vld [vmem:[%s7002_s4 + $0x8] sm:$0xff]   ;;  %v3673_v56 = vld [vmem:[%s6992_s28 + $0xa0] sm:$0xff] }
 0x6f7   : > { %v3020_v41 = vpack.c.bf16 %v3008_v28, %v3004_v10  ;;  %6099 = vmatprep.subr.bf16.mxu0 %v6508_v11  ;;  %v2996_v21 = vadd.f32 1.0, %v6785_v6  ;;  %6798 = vtanh.f32 %v2575_v43  ;;  %v2600_v47 = vadd.f32 1.0, %v8554_v45  ;;  %v6519_v5 = vld [vmem:[%s7002_s4 + $0xa8] sm:$0xff]   ;;  %v6521_v11 = vld [vmem:[%s7002_s4 + $0xe0] sm:$0xff]  }
 0x6f8   : > { %v6787_v63 = vpop.eup %6786  ;;  %v3019_v44 = vpack.c.bf16 %v3007_v58, %v3003_v3  ;;  %v2560_v9 = vadd.f32 %v2544_v20, %v8477_v26  ;;  %v2887_v30 = vmul.f32 0.5, %v8540_v29  ;;  %v2488_v24 = vmul.f32 0.5, %v8365_v25  ;;  %v6517_v29 = vld [vmem:[%s7002_s4 + $0xe8] sm:$0xff]   ;;  %v3675_v58 = vld [vmem:[%s6992_s28 + $0xe0] sm:$0xff] }
 0x6f9   : > { %v6789_v34 = vpop.eup %6788  ;;  %3362 = vmatprep.mubr.bf16.mxu1 %v3020_v41  ;;  %v3000_v50 = vadd.f32 1.0, %v6787_v63  ;;  %v2596_v18 = vadd.f32 1.0, %v8522_v39  ;;  %v3012_v48 = vmul.f32 %v2996_v21, %v2884_v33  ;;  %v2556_v19 = vadd.f32 %v2540_v42, %v8413_v49  ;;  %v6522_v20 = vld [vmem:[%s7002_s4] sm:$0xff]   ;;  %v6524_v41 = vld [vmem:[%s7002_s4 + $0xd8] sm:$0xff]  }
 0x6fa   : > { %v6791_v52 = vpop.eup %6790  ;;  %3363 = vmatmul.mubr.bf16.vlgmr.msra.gmra.mxu1 %v3019_v44  ;;  %6100 = vmatpush3.bf16.msra.mxu0 %v6510_v1  ;;  %v2995_v31 = vadd.f32 1.0, %v6789_v34  ;;  %v2883_v15 = vmul.f32 0.5, %v8520_v22  ;;  %v2484_v25 = vmul.f32 0.5, %v8336_v32  ;;  %v2616_v23 = vmul.f32 %v2600_v47, %v2488_v24  ;;  %v6523_v3 = vld [vmem:[%s7002_s4 + $0xa0] sm:$0xff]   ;;  %v6525_v47 = vld [vmem:[%s7002_s4 + $0x98] sm:$0xff]   ;;  %v3674_v24 = vld [vmem:[%s6992_s28 + $0xa8] sm:$0xff] }
 0x6fb   : > { %6120 = vmatpush3.bf16.msra.mxu1 %v6511_v59  ;;  %6101 = vmatprep.subr.bf16.mxu0 %v6512_v53  ;;  %v3016_v45 = vmul.f32 %v3000_v50, %v2888_v17  ;;  %v2999_v7 = vadd.f32 1.0, %v6791_v52  ;;  %v2576_v61 = vmul.f32 0.7978846, %v2560_v9  ;;  %v2572_v22 = vmul.f32 0.7978846, %v2556_v19  ;;  %v9517_v59 = vld [vmem:[#allocation25_spill] sm:$0xff] }
 0x6fc   : > { %v6793_v2 = vpop.eup %6792  ;;  %6121 = vmatprep.subr.bf16.mxu1 %v6513_v38  ;;  %v3011_v51 = vmul.f32 %v2995_v31, %v2883_v15  ;;  %v2612_v12 = vmul.f32 %v2596_v18, %v2484_v25  ;;  %v2494_v10 = vmul.f32 0.5, %v8324_v27  ;;  %v5664_v1 = vcombine.high %v3673_v56, %v3675_v58  ;;  %v3669_v63 = vld [vmem:[%s6992_s28 + $0x20] sm:$0xff]  ;;  %v6526_v31 = vld [vmem:[%s7002_s4 + $0xd0] sm:$0xff]   ;;  %v9518_v18 = vld [vmem:[#allocation13_spill] sm:$0xff] }
 0x6fd   : > { %v3024_v39 = vpack.c.bf16 %v3016_v45, %v3012_v48  ;;  %v3015_v57 = vmul.f32 %v2999_v7, %v2887_v30  ;;  %v2606_v8 = vadd.f32 1.0, %v6793_v2  ;;  %6800 = vtanh.f32 %v2576_v61  ;;  %v3671_v44 = vld [vmem:[%s6992_s28 + $0x60] sm:$0xff]  ;;  %v6527_v7 = vld [vmem:[%s7002_s4 + $0x90] sm:$0xff]   ;;  %v6528_v2 = vld [vmem:[%s7002_s4 + $0xc8] sm:$0xff]  }
 0x6fe   : > { %v6795_v60 = vpop.eup %6794  ;;  %6102 = vmatpush3.bf16.msra.mxu0 %v6514_v4  ;;  %v2628_v43 = vpack.c.bf16 %v2616_v23, %v2612_v12  ;;  %6802 = vtanh.f32 %v2572_v22  ;;  %v2490_v53 = vmul.f32 0.5, %v9517_v59  ;;  %v2491_v27 = vmul.f32 0.5, %v8382_v0  ;;  %v3676_v0 = vld [vmem:[%s6992_s28 + $0xe8] sm:$0xff]  ;;  %v6530_v25 = vld [vmem:[%s7002_s4 + $0xc0] sm:$0xff]  }
 0x6ff   : > { %6122 = vmatpush3.bf16.msra.mxu1 %v6515_v40  ;;  %3370 = vmatprep.mubr.bf16.mxu1 %v3024_v39  ;;  %v3023_v32 = vpack.c.bf16 %v3015_v57, %v3011_v51  ;;  %v2602_v28 = vadd.f32 1.0, %v6795_v60  ;;  %v2622_v21 = vmul.f32 %v2606_v8, %v2494_v10  ;;  %v2495_v33 = vmul.f32 0.5, %v8443_v16  ;;  %v9519_v16 = vld [vmem:[#allocation16_spill] sm:$0xff]  ;;  %v3672_v12 = vld [vmem:[%s6992_s28 + $0x68] sm:$0xff]  ;;  %v6543_v10 = vld [vmem:[%s7002_s4 + $0x2b8] sm:$0xff]  }
 0x700   : > { %6103 = vmatprep.subr.bf16.mxu0 %v6516_v46  ;;  %6123 = vmatprep.subr.bf16.mxu1 %v6517_v29  ;;  %v5663_v17 = vcombine.low %v3673_v56, %v3675_v58  ;;  %v5660_v9 = vcombine.high %v3669_v63, %v3671_v44  ;;  %v9520_v40 = vpack.c.bf16 %v9518_v18, %v9519_v16  ;;  %v6529_v29 = vld [vmem:[%s7002_s4 + $0x88] sm:$0xff]   ;;  %v9521_v57 = vmov 0   ;;  %v6531_v23 = vld [vmem:[%s7002_s4 + $0x80] sm:$0xff]   ;;  %v8730_v18 = vld [vmem:[%s6992_s28 + $0xf8] sm:$0xff] }
 0x701   : > { %v2618_v50 = vmul.f32 %v2602_v28, %v2490_v53  ;;  %v5659_v45 = vcombine.low %v3669_v63, %v3671_v44  ;;  %v5666_v19 = vcombine.high %v3674_v24, %v3676_v0  ;;  %v2496_v61 = vmul.f32 0.5, %v8477_v26  ;;  %v9523_v26 = vld [vmem:[#allocation19_spill] sm:$0xff]  ;;  %v6537_v56 = vld [vmem:[%s7002_s4 + $0x228] sm:$0xff]   ;;  %v6538_v58 = vld [vmem:[%s7002_s4 + $0x260] sm:$0xff]  }
 0x702   : > { %3371 = vmatmul.mubr.bf16.gmra.mxu1 %v3023_v32  ;;  %6104 = vmatpush3.bf16.msra.mxu0 %v6518_v54  ;;  %v2492_v51 = vmul.f32 0.5, %v8413_v49  ;;  %v6539_v8 = vld [vmem:[%s7002_s4 + $0x220] sm:$0xff]   ;;  %v6542_v28 = vld [vmem:[%s7002_s4 + $0x218] sm:$0xff]   ;;  %v6548_v59 = vld [vmem:[%s7002_s4 + $0x248] sm:$0xff]  }
 0x703   : > { %v6797_v6 = vpop.eup %6796  ;;  %6124 = vmatpush3.bf16.msra.mxu1 %v6519_v5  ;;  %3652 = vmatprep.mubr.bf16.mxu1 %v2628_v43  ;;  %v2630_v30 = vpack.c.bf16 %v2622_v21, %v2618_v50  ;;  %v3670_v5 = vld [vmem:[%s6992_s28 + $0x28] sm:$0xff]  ;;  %v6540_v43 = vld [vmem:[%s7002_s4 + $0x258] sm:$0xff]   ;;  %v6553_v21 = vld [vmem:[%s7002_s4 + $0x2e0] sm:$0xff]  }
 0x704   : > { %v6799_v42 = vpop.eup %6798  ;;  %6105 = vmatprep.subr.bf16.mxu0 %v6520_v36  ;;  %6125 = vmatprep.subr.bf16.mxu1 %v6521_v11  ;;  %v2603_v38 = vadd.f32 1.0, %v6797_v6  ;;  %v5665_v36 = vcombine.low %v3674_v24, %v3676_v0  ;;  %v5662_v32 = vcombine.high %v3670_v5, %v3672_v12  ;;  %v5661_v49 = vcombine.low %v3670_v5, %v3672_v12  ;;  %v6536_v11 = vld [vmem:[%s7002_s4 + $0x268] sm:$0xff]   ;;  %v6545_v6 = vld [vmem:[%s7002_s4 + $0x2f0] sm:$0xff]   ;;  %v6552_v44 = vld [vmem:[%s7002_s4 + $0x240] sm:$0xff]  }
 0x705   : > { %v2607_v34 = vadd.f32 1.0, %v6799_v42  ;;  %v6549_v42 = vld [vmem:[%s7002_s4 + $0x2e8] sm:$0xff]   ;;  %v8713_v50 = vld [vmem:[%s6992_s28 + $0xb0] sm:$0xff]  ;;  %v6562_v24 = vld [vmem:[%s7002_s4 + $0x2c0] sm:$0xff]  }
 0x706   : > { %6106 = vmatpush3.bf16.msra.mxu0 %v6522_v20  ;;  %v2619_v52 = vmul.f32 %v2603_v38, %v2491_v27  ;;  %v6541_v20 = vld [vmem:[%s7002_s4 + $0x2f8] sm:$0xff]   ;;  %v6551_v53 = vld [vmem:[%s7002_s4 + $0x2a8] sm:$0xff]   ;;  %v6555_v38 = vld [vmem:[%s7002_s4 + $0x2a0] sm:$0xff]  }
 0x707   : > { %6126 = vmatpush3.bf16.msra.mxu1 %v6523_v3  ;;  %3751 = vmatprep.subr.bf16.mxu0 %v5664_v1  ;;  %v2623_v4 = vmul.f32 %v2607_v34, %v2495_v33  ;;  %v6544_v3 = vld [vmem:[%s7002_s4 + $0x250] sm:$0xff]   ;;  %v6550_v63 = vld [vmem:[%s7002_s4 + $0x208] sm:$0xff]   ;;  %v6556_v27 = vld [vmem:[%s7002_s4 + $0x2d8] sm:$0xff]  }
 0x708   : > { %6127 = vmatprep.subr.bf16.mxu1 %v6524_v41  ;;  %v6547_v1 = vld [vmem:[%s7002_s4 + $0x2b0] sm:$0xff]   ;;  %v6554_v33 = vld [vmem:[%s7002_s4 + $0x200] sm:$0xff]   ;;  %v6557_v34 = vld [vmem:[%s7002_s4 + $0x298] sm:$0xff]  }
 0x709   : > { %3604 = vmatmul.mubr.bf16.vlgmr.msra.gmra.mxu0 %v9520_v40  ;;  %v2631_v48 = vpack.c.bf16 %v2623_v4, %v2619_v52  ;;  %v6546_v41 = vld [vmem:[%s7002_s4 + $0x210] sm:$0xff]   ;;  %v8727_v0 = vld [vmem:[%s6992_s28 + $0xb8] sm:$0xff]  ;;  %v6563_v16 = vld [vmem:[%s7002_s4 + $0x280] sm:$0xff]  }
 0x70a   : > { %3611 = vmatprep.mubr.bf16.mxu0 %v2630_v30  ;;  %3752 = vmatpush1.bf16.msra.mxu0 %v5663_v17  ;;  %v6801_v46 = vpop.eup %6800  ;;  %v6558_v17 = vld [vmem:[%s7002_s4 + $0x2d0] sm:$0xff]   ;;  %v6560_v30 = vld [vmem:[%s7002_s4 + $0x2c8] sm:$0xff]   ;;  %v5709_v40 = vcombine.low %v8727_v0, %v8730_v18 }
 0x70b   : > { %6128 = vmatpush3.bf16.msra.mxu1 %v6525_v47  ;;  %3753 = vmatprep.subr.bf16.mxu0 %v5660_v9  ;;  %v6803_v15 = vpop.eup %6802  ;;  %v2608_v39 = vadd.f32 1.0, %v6801_v46  ;;  %v8716_v47 = vld [vmem:[%s6992_s28 + $0xf0] sm:$0xff] }
 0x70c   : > { %6129 = vmatprep.subr.bf16.mxu1 %v6526_v31  ;;  %v2604_v60 = vadd.f32 1.0, %v6803_v15  ;;  %v6559_v9 = vld [vmem:[%s7002_s4 + $0x290] sm:$0xff]   ;;  %v5707_v52 = vcombine.low %v8713_v50, %v8716_v47  ;;  %v5708_v4 = vcombine.high %v8713_v50, %v8716_v47  ;;  %v6561_v31 = vld [vmem:[%s7002_s4 + $0x288] sm:$0xff]  }
 0x70d   : > { %v2624_v54 = vmul.f32 %v2608_v39, %v2496_v61 }
 0x70e   : > { %3754 = vmatpush1.bf16.msra.mxu0 %v5659_v45  ;;  %v2620_v22 = vmul.f32 %v2604_v60, %v2492_v51 }
 0x70f   : > { %6130 = vmatpush3.bf16.msra.mxu1 %v6527_v7  ;;  %3804 = vmatprep.subr.bf16.mxu0 %v5666_v19 }
 0x710   : > { %6131 = vmatprep.subr.bf16.mxu1 %v6528_v2  ;;  %v2632_v35 = vpack.c.bf16 %v2624_v54, %v2620_v22 }
 0x711   : > { %3612 = vmatmul.mubr.bf16.gmra.mxu0 %v2629_v37  ;;  %v6532_v37 = vld [vmem:[%s7002_s4 + $0x278] sm:$0xff]  }
 0x712   : > { %3771 = vmatprep.mubr.bf16.mxu0 %v9521_v57 }
 0x713   : > { %6132 = vmatpush3.bf16.msra.mxu1 %v6529_v29 }
 0x714   : > { %6133 = vmatprep.subr.bf16.mxu1 %v6530_v25 }
 0x717   : > { %6134 = vmatpush3.bf16.msra.mxu1 %v6531_v23 }
 0x718   : > { %6147 = vmatprep.subr.bf16.mxu1 %v6532_v37 }
 0x719   : > { %5667 = vmatmul.mubr.msk.bf16.vlgmr.msra.gmra.mxu0 %vm678_vm1, %v9522_v14 }
 0x71a   : > { %3653 = vmatmul.mubr.bf16.vlgmr.msra.gmra.mxu1 %v2627_v62  ;;  %3805 = vmatpush1.bf16.msra.mxu0 %v5665_v36  ;;  %v6535_v62 = vld [vmem:[%s7002_s4 + $0x230] sm:$0xff]  }
 0x71b   : > { %3660 = vmatprep.mubr.bf16.mxu1 %v2632_v35  ;;  %3781 = vmatprep.mubr.bf16.mxu0 %v9521_v57 }
 0x71c   : > { %3806 = vmatprep.subr.bf16.mxu0 %v5662_v32  ;;  %6148 = vmatpush3.bf16.msra.mxu1 %v6533_v13 }
 0x71d   : > { %6149 = vmatprep.subr.bf16.mxu1 %v6534_v55 }
 0x71e   : > { %3807 = vmatpush1.bf16.msra.mxu0 %v5661_v49 }
 0x71f   : > { %6175 = vmatprep.subr.bf16.mxu0 %v6541_v20 }
 0x720   : > { %6150 = vmatpush3.bf16.msra.mxu1 %v6535_v62 }
 0x721   : > { %5668 = vmatmul.mubr.msk.bf16.gmra.mxu0 %vm678_vm1, %v9523_v26  ;;  %6151 = vmatprep.subr.bf16.mxu1 %v6536_v11 }
 0x722   : > { %3661 = vmatmul.mubr.bf16.gmra.mxu1 %v2631_v48  ;;  %3824 = vmatprep.mubr.bf16.mxu0 %v9521_v57  ;;  %v5710_v48 = vcombine.high %v8727_v0, %v8730_v18  ;;  %v6564_v0 = vld [vmem:[%s7002_s4 + $0x378] sm:$0xff]  }
 0x723   : > { %v6565_v18 = vld [vmem:[%s7002_s4 + $0x338] sm:$0xff]  }
 0x724   : > { %6152 = vmatpush3.bf16.msra.mxu1 %v6537_v56 }
 0x725   : > { %6153 = vmatprep.subr.bf16.mxu1 %v6538_v58 }
 0x728   : > { %6154 = vmatpush3.bf16.msra.mxu1 %v6539_v8 }
 0x729   : > { %5669 = vmatmul.mubr.msk.bf16.vlgmr.msra.gmra.mxu0 %vm678_vm1, %v9522_v14  ;;  %6155 = vmatprep.subr.bf16.mxu1 %v6540_v43 }
 0x72a   : > { %3834 = vmatprep.mubr.bf16.mxu0 %v9521_v57  ;;  %6176 = vmatpush3.bf16.msra.mxu0 %v6543_v10 }
 0x72b   : > { %6177 = vmatprep.subr.bf16.mxu0 %v6545_v6 }
 0x72c   : > { %6156 = vmatpush3.bf16.msra.mxu1 %v6542_v28 }
 0x72d   : > { %6157 = vmatprep.subr.bf16.mxu1 %v6544_v3 }
 0x72e   : > { %6178 = vmatpush3.bf16.msra.mxu0 %v6547_v1 }
 0x72f   : > { %6179 = vmatprep.subr.bf16.mxu0 %v6549_v42 }
 0x730   : > { %6158 = vmatpush3.bf16.msra.mxu1 %v6546_v41 }
 0x731   : > { %5670 = vmatmul.mubr.msk.bf16.gmra.mxu0 %vm678_vm1, %v9523_v26  ;;  %6159 = vmatprep.subr.bf16.mxu1 %v6548_v59  ;;  %v8738_v59 = vld [vmem:[%s6997_s3 + $0x8] sm:$0xf] }
 0x732   : > { %6180 = vmatpush3.bf16.msra.mxu0 %v6551_v53 }
 0x733   : > { %6181 = vmatprep.subr.bf16.mxu0 %v6553_v21 }
 0x734   : > { %6160 = vmatpush3.bf16.msra.mxu1 %v6550_v63 }
 0x735   : > { %6161 = vmatprep.subr.bf16.mxu1 %v6552_v44  ;;  %v9524_v44 = vld [vmem:[#allocation23_spill] sm:$0xff] }
 0x736   : > { %6182 = vmatpush3.bf16.msra.mxu0 %v6555_v38  ;;  %v3682_v38 = vrot.slane %v8738_v59, %v9524_v44 }
 0x737   : > { %6183 = vmatprep.subr.bf16.mxu0 %v6556_v27 }
 0x738   : > { %6162 = vmatpush3.bf16.msra.mxu1 %v6554_v33 }
 0x739   : > { %4437 = vmatprep.subr.bf16.mxu1 %v5708_v4 }
 0x73a   : > { %6184 = vmatpush3.bf16.msra.mxu0 %v6557_v34  ;;  %v9525_v34 = vld [vmem:[#allocation15_spill] sm:$0xff] }
 0x73b   : > { %6185 = vmatprep.subr.bf16.mxu0 %v6558_v17  ;;  %v3686_v17 = vrot.slane %v8738_v59, %v9525_v34 }
 0x73e   : > { %6186 = vmatpush3.bf16.msra.mxu0 %v6559_v9 }
 0x73f   : > { %6187 = vmatprep.subr.bf16.mxu0 %v6560_v30 }
 0x742   : > { %6188 = vmatpush3.bf16.msra.mxu0 %v6561_v31 }
 0x743   : > { %6189 = vmatprep.subr.bf16.mxu0 %v6562_v24 }
 0x746   : > { %6190 = vmatpush3.bf16.msra.mxu0 %v6563_v16 }
 0x747   : > { %4490 = vmatprep.subr.bf16.mxu0 %v5710_v48 }
 0x7a9   : > { %v6051_v45 = vpop.f32.mrf.mxu0 }
 0x7ab   : > { %v6052_v7 = vpop.f32.mrf.mxu0 }
 0x7ac   : > { %v6053_v19 = vadd.f32 %v6052_v7, %v6051_v45 }
 0x7ad   : > { %v6054_v2 = vpop.f32.mrf.mxu0 }
 0x7af   : > { %v6055_v46 = vpop.f32.mrf.mxu0 }
 0x7b0   : > { %v6056_v29 = vadd.f32 %v6055_v46, %v6054_v2 }
 0x7b1   : > { %v6057_v15 = vpop.f32.mrf.mxu0 }
 0x7b3   : > { %v6058_v25 = vpop.f32.mrf.mxu0 }
 0x7b4   : > { %v6059_v39 = vadd.f32 %v6058_v25, %v6057_v15 }
 0x7b5   : > { %v6060_v23 = vpop.f32.mrf.mxu0 }
 0x7b7   : > { %v6061_v61 = vpop.f32.mrf.mxu0 }
 0x7b8   : > { %v6062_v60 = vadd.f32 %v6061_v61, %v6060_v23 }
 0x7ba   : > { %v6079_v51 = vpop.f32.mrf.mxu1 }
 0x7bc   : > { %v6080_v54 = vpop.f32.mrf.mxu1 }
 0x7bd   : > { %v6081_v5 = vadd.f32 %v6080_v54, %v6079_v51 }
 0x7be   : > { %v6082_v12 = vpop.f32.mrf.mxu1 }
 0x7bf   : > { %v3365_v36 = vadd.f32 %v6081_v5, %v6053_v19 }
 0x7c0   : > { %v6083_v22 = vpop.f32.mrf.mxu1 }
 0x7c1   : > { %v6084_v32 = vadd.f32 %v6083_v22, %v6082_v12 }
 0x7c2   : > { %v6085_v35 = vpop.f32.mrf.mxu1 }
 0x7c3   : > { %v3368_v49 = vadd.f32 %v6084_v32, %v6056_v29 }
 0x7c4   : > { %v6086_v37 = vpop.f32.mrf.mxu1 }
 0x7c5   : > { %v6087_v13 = vadd.f32 %v6086_v37, %v6085_v35 }
 0x7c6   : > { %v6088_v55 = vpop.f32.mrf.mxu1 }
 0x7c7   : > { %v3373_v62 = vadd.f32 %v6087_v13, %v6059_v39 }
 0x7c8   : > { %v6089_v11 = vpop.f32.mrf.mxu1 }
 0x7c9   : > { %v6090_v56 = vadd.f32 %v6089_v11, %v6088_v55  ;;  %v6107_v58 = vpop.f32.mrf.mxu0 }
 0x7cb   : > { %v3376_v8 = vadd.f32 %v6090_v56, %v6062_v60  ;;  %v6108_v43 = vpop.f32.mrf.mxu0 }
 0x7cc   : > { %v6109_v20 = vadd.f32 %v6108_v43, %v6107_v58 }
 0x7cd   : > { %v6110_v10 = vpop.f32.mrf.mxu0 }
 0x7ce   : > { %v3606_v28 = vadd.f32 %v6109_v20, %v3365_v36 }
 0x7cf   : > { %v6111_v6 = vpop.f32.mrf.mxu0 }
 0x7d0   : > { %v6112_v3 = vadd.f32 %v6111_v6, %v6110_v10 }
 0x7d1   : > { %v6113_v1 = vpop.f32.mrf.mxu0 }
 0x7d2   : > { %v3609_v42 = vadd.f32 %v6112_v3, %v3368_v49 }
 0x7d3   : > { %v6114_v41 = vpop.f32.mrf.mxu0 }
 0x7d4   : > { %v6115_v53 = vadd.f32 %v6114_v41, %v6113_v1 }
 0x7d5   : > { %v6116_v21 = vpop.f32.mrf.mxu0 }
 0x7d6   : > { %v3614_v63 = vadd.f32 %v6115_v53, %v3373_v62 }
 0x7d7   : > { %v6117_v27 = vpop.f32.mrf.mxu0 }
 0x7d8   : > { %v6118_v33 = vadd.f32 %v6117_v27, %v6116_v21 }
 0x7d9   : > { %v3773_v9 = vpop.f32.mrf.mxu0 }
 0x7da   : > { %v8744_v4 = vadd.f32 %v6118_v33, %v3376_v8  ;;  %v6135_v30 = vpop.f32.mrf.mxu1  ;;  %v8746_v31 = vadd.f32 %v3773_v9, %v3682_v38 }
 0x7db   : > { %v3775_v24 = vpop.f32.mrf.mxu0 }
 0x7dc   : > { %v3861_v16 = vmul.f32 0.044715, %v8746_v31  ;;  %v6136_v48 = vpop.f32.mrf.mxu1  ;;  %v8749_v45 = vadd.f32 %v3775_v24, %v3686_v17 }
 0x7dd   : > { %v6137_v7 = vadd.f32 %v6136_v48, %v6135_v30  ;;  %v3777_v19 = vpop.f32.mrf.mxu0 }
 0x7de   : > { %v3877_v2 = vmul.f32 %v3861_v16, %v8746_v31  ;;  %v3862_v46 = vmul.f32 0.044715, %v8749_v45  ;;  %v6138_v29 = vpop.f32.mrf.mxu1  ;;  %v8753_v15 = vadd.f32 %v3777_v19, %v3682_v38  ;;  %v9527_v19 = vld [vmem:[#allocation27_spill] sm:$0xff] }
 0x7df   : > { %v8755_v25 = vadd.f32 %v6137_v7, %v3606_v28  ;;  %v3779_v39 = vpop.f32.mrf.mxu0  ;;  %v9526_v28 = vld [vmem:[#allocation24_spill] sm:$0xff] }
 0x7e0   : > { %v3893_v23 = vmul.f32 %v3877_v2, %v8746_v31  ;;  %v3878_v61 = vmul.f32 %v3862_v46, %v8749_v45  ;;  %v3865_v60 = vmul.f32 0.044715, %v8753_v15  ;;  %v6139_v51 = vpop.f32.mrf.mxu1  ;;  %v8760_v5 = vadd.f32 %v3779_v39, %v3686_v17 }
 0x7e1   : > { %v6140_v54 = vadd.f32 %v6139_v51, %v6138_v29  ;;  %v3783_v12 = vpop.f32.mrf.mxu0  ;;  %v8777_v6 = vrot.slane %v8738_v59, %v9526_v28  ;;  %v8793_v2 = vrot.slane %v8738_v59, %v9527_v19 }
 0x7e2   : > { %v3909_v36 = vadd.f32 %v3893_v23, %v8746_v31  ;;  %v3894_v22 = vmul.f32 %v3878_v61, %v8749_v45  ;;  %v3881_v32 = vmul.f32 %v3865_v60, %v8753_v15  ;;  %v6141_v35 = vpop.f32.mrf.mxu1  ;;  %v8765_v49 = vadd.f32 %v3783_v12, %v3682_v38 }
 0x7e3   : > { %v8767_v37 = vadd.f32 %v6140_v54, %v3609_v42  ;;  %v3866_v13 = vmul.f32 0.044715, %v8760_v5  ;;  %v3785_v55 = vpop.f32.mrf.mxu0 }
 0x7e4   : > { %v3925_v62 = vmul.f32 0.7978846, %v3909_v36  ;;  %v3897_v11 = vmul.f32 %v3881_v32, %v8753_v15  ;;  %v3869_v56 = vmul.f32 0.044715, %v8765_v49  ;;  %v6142_v58 = vpop.f32.mrf.mxu1  ;;  %v8772_v8 = vadd.f32 %v3785_v55, %v3686_v17 }
 0x7e5   : > { %v3882_v43 = vmul.f32 %v3866_v13, %v8760_v5  ;;  %v6143_v20 = vadd.f32 %v6142_v58, %v6141_v35  ;;  %v3787_v10 = vpop.f32.mrf.mxu0  ;;  %v3910_v3 = vadd.f32 %v3894_v22, %v8749_v45 }
 0x7e6   : > { %6804 = vtanh.f32 %v3925_v62  ;;  %v3913_v1 = vadd.f32 %v3897_v11, %v8753_v15  ;;  %v3885_v42 = vmul.f32 %v3869_v56, %v8765_v49  ;;  %v3870_v41 = vmul.f32 0.044715, %v8772_v8  ;;  %v6144_v53 = vpop.f32.mrf.mxu1 }
 0x7e7   : > { %v3898_v21 = vmul.f32 %v3882_v43, %v8760_v5  ;;  %v8784_v27 = vadd.f32 %v6143_v20, %v3614_v63  ;;  %v8786_v33 = vadd.f32 %v3787_v10, %v3682_v38  ;;  %v3789_v9 = vpop.f32.mrf.mxu0  ;;  %v3926_v30 = vmul.f32 0.7978846, %v3910_v3 }
 0x7e8   : > { %v3929_v24 = vmul.f32 0.7978846, %v3913_v1  ;;  %v3886_v16 = vmul.f32 %v3870_v41, %v8772_v8  ;;  %v6145_v48 = vpop.f32.mrf.mxu1  ;;  %v8789_v7 = vadd.f32 %v3789_v9, %v3686_v17  ;;  %v3901_v17 = vmul.f32 %v3885_v42, %v8765_v49 }
 0x7e9   : > { %v3873_v46 = vmul.f32 0.044715, %v8786_v33  ;;  %v6146_v29 = vadd.f32 %v6145_v48, %v6144_v53  ;;  %v3826_v39 = vpop.f32.mrf.mxu0  ;;  %v3914_v63 = vadd.f32 %v3898_v21, %v8760_v5  ;;  %6806 = vtanh.f32 %v3926_v30 }
 0x7ea   : > { %6808 = vtanh.f32 %v3929_v24  ;;  %v3902_v38 = vmul.f32 %v3886_v16, %v8772_v8  ;;  %v3874_v23 = vmul.f32 0.044715, %v8789_v7  ;;  %v8800_v61 = vadd.f32 %v3826_v39, %v8777_v6 }
 0x7eb   : > { %v3889_v59 = vmul.f32 %v3873_v46, %v8786_v33  ;;  %v8805_v60 = vadd.f32 %v6146_v29, %v8744_v4  ;;  %v3828_v51 = vpop.f32.mrf.mxu0  ;;  %v3930_v54 = vmul.f32 0.7978846, %v3914_v63  ;;  %v3917_v43 = vadd.f32 %v3901_v17, %v8765_v49 }
 0x7ec   : > { %v3890_v12 = vmul.f32 %v3874_v23, %v8789_v7  ;;  %v3863_v36 = vmul.f32 0.044715, %v8800_v61  ;;  %v8810_v22 = vadd.f32 %v3828_v51, %v8793_v2  ;;  %v3918_v13 = vadd.f32 %v3902_v38, %v8772_v8 }
 0x7ed   : > { %v3905_v32 = vmul.f32 %v3889_v59, %v8786_v33  ;;  %v3830_v35 = vpop.f32.mrf.mxu0  ;;  %6810 = vtanh.f32 %v3930_v54  ;;  %v3933_v53 = vmul.f32 0.7978846, %v3917_v43  ;;  %v3845_v48 = vmul.f32 0.5, %v8746_v31 }
 0x7ee   : > { %v3906_v55 = vmul.f32 %v3890_v12, %v8789_v7  ;;  %v3879_v4 = vmul.f32 %v3863_v36, %v8800_v61  ;;  %v3864_v62 = vmul.f32 0.044715, %v8810_v22  ;;  %v8818_v11 = vadd.f32 %v3830_v35, %v8777_v6 }
 0x7ef   : > { %v3832_v56 = vpop.f32.mrf.mxu0  ;;  %v3934_v58 = vmul.f32 0.7978846, %v3918_v13  ;;  %v3921_v3 = vadd.f32 %v3905_v32, %v8786_v33  ;;  %v3846_v54 = vmul.f32 0.5, %v8749_v45  ;;  %v3849_v36 = vmul.f32 0.5, %v8753_v15 }
 0x7f0   : > { %v3895_v20 = vmul.f32 %v3879_v4, %v8800_v61  ;;  %v3867_v10 = vmul.f32 0.044715, %v8818_v11  ;;  %v8825_v1 = vadd.f32 %v3832_v56, %v8793_v2  ;;  %v3922_v41 = vadd.f32 %v3906_v55, %v8789_v7 }
 0x7f1   : > { %v3836_v42 = vpop.f32.mrf.mxu0  ;;  %6812 = vtanh.f32 %v3934_v58  ;;  %v3880_v9 = vmul.f32 %v3864_v62, %v8810_v22  ;;  %v3937_v31 = vmul.f32 0.7978846, %v3921_v3 }
 0x7f2   : > { %v3911_v21 = vadd.f32 %v3895_v20, %v8800_v61  ;;  %v3883_v30 = vmul.f32 %v3867_v10, %v8818_v11  ;;  %v8832_v24 = vadd.f32 %v3836_v42, %v8777_v6  ;;  %v3868_v46 = vmul.f32 0.044715, %v8825_v1 }
 0x7f3   : > { %v6805_v16 = vpop.eup %6804  ;;  %v3838_v29 = vpop.f32.mrf.mxu0  ;;  %v3938_v39 = vmul.f32 0.7978846, %v3922_v41  ;;  %6814 = vtanh.f32 %v3933_v53  ;;  %v3896_v32 = vmul.f32 %v3880_v9, %v8810_v22 }
 0x7f4   : > { %v3927_v63 = vmul.f32 0.7978846, %v3911_v21  ;;  %v3899_v38 = vmul.f32 %v3883_v30, %v8818_v11  ;;  %v3871_v23 = vmul.f32 0.044715, %v8832_v24  ;;  %v8839_v17 = vadd.f32 %v3838_v29, %v8793_v2 }
 0x7f5   : > { %v3884_v59 = vmul.f32 %v3868_v46, %v8825_v1  ;;  %v3840_v51 = vpop.f32.mrf.mxu0  ;;  %6816 = vtanh.f32 %v3938_v39  ;;  %v3957_v45 = vadd.f32 1.0, %v6805_v16  ;;  %v3850_v21 = vmul.f32 0.5, %v8760_v5 }
 0x7f6   : > { %v6807_v12 = vpop.eup %6806  ;;  %v3915_v35 = vadd.f32 %v3899_v38, %v8818_v11  ;;  %v3872_v13 = vmul.f32 0.044715, %v8839_v17  ;;  %6818 = vtanh.f32 %v3927_v63  ;;  %v3887_v4 = vmul.f32 %v3871_v23, %v8832_v24  ;;  %v4355_v63 = vld [vmem:[%s6992_s28 + $0x30] sm:$0xff] }
 0x7f7   : > { %v6809_v55 = vpop.eup %6808  ;;  %v8849_v62 = vadd.f32 %v3840_v51, %v8777_v6  ;;  %v3842_v56 = vpop.f32.mrf.mxu0  ;;  %v3900_v43 = vmul.f32 %v3884_v59, %v8825_v1  ;;  %v3958_v3 = vadd.f32 1.0, %v6807_v12  ;;  %6820 = vtanh.f32 %v3937_v31  ;;  %v4357_v38 = vld [vmem:[%s6992_s28 + $0x70] sm:$0xff] }
 0x7f8   : > { %v3931_v58 = vmul.f32 0.7978846, %v3915_v35  ;;  %v3888_v15 = vmul.f32 %v3872_v13, %v8839_v17  ;;  %v8854_v20 = vadd.f32 %v3842_v56, %v8793_v2  ;;  %v3961_v42 = vadd.f32 1.0, %v6809_v55 }
 0x7f9   : > { %v3875_v10 = vmul.f32 0.044715, %v8849_v62  ;;  %v3912_v16 = vadd.f32 %v3896_v32, %v8810_v22  ;;  %v3903_v46 = vmul.f32 %v3887_v4, %v8832_v24  ;;  %v3973_v39 = vmul.f32 %v3957_v45, %v3845_v48 }
 0x7fa   : > { %v6811_v41 = vpop.eup %6810  ;;  %6822 = vtanh.f32 %v3931_v58  ;;  %v3904_v6 = vmul.f32 %v3888_v15, %v8839_v17  ;;  %v3876_v53 = vmul.f32 0.044715, %v8854_v20  ;;  %v3977_v2 = vmul.f32 %v3961_v42, %v3849_v36 }
 0x7fb   : > { %v3891_v9 = vmul.f32 %v3875_v10, %v8849_v62  ;;  %v3962_v30 = vadd.f32 1.0, %v6811_v41  ;;  %v3916_v23 = vadd.f32 %v3900_v43, %v8825_v1  ;;  %v3974_v51 = vmul.f32 %v3958_v3, %v3846_v54 }
 0x7fc   : > { %v3892_v29 = vmul.f32 %v3876_v53, %v8854_v20  ;;  %v3928_v5 = vmul.f32 0.7978846, %v3912_v16  ;;  %v3920_v32 = vadd.f32 %v3904_v6, %v8839_v17  ;;  %v3989_v55 = vpack.c.bf16 %v3977_v2, %v3973_v39 }
 0x7fd   : > { %v3907_v59 = vmul.f32 %v3891_v9, %v8849_v62  ;;  %v3978_v31 = vmul.f32 %v3962_v30, %v3850_v21  ;;  %v3932_v36 = vmul.f32 0.7978846, %v3916_v23  ;;  %v5704_v4 = vcombine.high %v4355_v63, %v4357_v38 }
 0x7fe   : > { %v6813_v12 = vpop.eup %6812  ;;  %v3908_v35 = vmul.f32 %v3892_v29, %v8854_v20  ;;  %6824 = vtanh.f32 %v3928_v5  ;;  %v3936_v45 = vmul.f32 0.7978846, %v3920_v32  ;;  %v3919_v58 = vadd.f32 %v3903_v46, %v8832_v24 }
 0x7ff   : > { %v3990_v13 = vpack.c.bf16 %v3978_v31, %v3974_v51  ;;  %6826 = vtanh.f32 %v3932_v36  ;;  %v3966_v54 = vadd.f32 1.0, %v6813_v12  ;;  %v3923_v43 = vadd.f32 %v3907_v59, %v8849_v62 }
 0x800   : > { %v6815_v48 = vpop.eup %6814  ;;  %v3924_v56 = vadd.f32 %v3908_v35, %v8854_v20  ;;  %v5703_v10 = vcombine.low %v4355_v63, %v4357_v38  ;;  %6828 = vtanh.f32 %v3936_v45  ;;  %v3935_v42 = vmul.f32 0.7978846, %v3919_v58 }
 0x801   : > { %4285 = vmatprep.mubr.bf16.mxu1 %v3990_v13  ;;  %v3854_v41 = vmul.f32 0.5, %v8772_v8  ;;  %v3858_v6 = vmul.f32 0.5, %v8789_v7  ;;  %v3939_v21 = vmul.f32 0.7978846, %v3923_v43  ;;  %v3965_v16 = vadd.f32 1.0, %v6815_v48  ;;  %v4356_v48 = vld [vmem:[%s6992_s28 + $0x38] sm:$0xff] }
 0x802   : > { %v6817_v15 = vpop.eup %6816  ;;  %4286 = vmatmul.mubr.bf16.vlgmr.msra.gmra.mxu1 %v3989_v55  ;;  %v3940_v3 = vmul.f32 0.7978846, %v3924_v56  ;;  %v3853_v8 = vmul.f32 0.5, %v8765_v49  ;;  %v3857_v7 = vmul.f32 0.5, %v8786_v33  ;;  %v3851_v51 = vmul.f32 0.5, %v8818_v11  ;;  %v4358_v56 = vld [vmem:[%s6992_s28 + $0x78] sm:$0xff] }
 0x803   : > { %v3970_v53 = vadd.f32 1.0, %v6817_v15  ;;  %4438 = vmatpush1.bf16.msra.mxu1 %v5707_v52  ;;  %v6819_v9 = vpop.eup %6818  ;;  %v3982_v30 = vmul.f32 %v3966_v54, %v3854_v41  ;;  %v3848_v49 = vmul.f32 0.5, %v8810_v22  ;;  %v3852_v33 = vmul.f32 0.5, %v8825_v1 }
 0x804   : > { %4439 = vmatprep.subr.bf16.mxu1 %v5704_v4  ;;  %6830 = vtanh.f32 %v3940_v3  ;;  %v6821_v46 = vpop.eup %6820  ;;  %v3981_v50 = vmul.f32 %v3965_v16, %v3853_v8  ;;  %v3959_v5 = vadd.f32 1.0, %v6819_v9  ;;  %v3847_v36 = vmul.f32 0.5, %v8800_v61  ;;  %v6572_v16 = vld [vmem:[%s7002_s4 + $0x358] sm:$0xff]  }
 0x805   : > { %v3986_v2 = vmul.f32 %v3970_v53, %v3858_v6  ;;  %6832 = vtanh.f32 %v3935_v42  ;;  %v3969_v63 = vadd.f32 1.0, %v6821_v46  ;;  %v3856_v22 = vmul.f32 0.5, %v8839_v17  ;;  %v6573_v46 = vld [vmem:[%s7002_s4 + $0x3f8] sm:$0xff]  }
 0x806   : > { %6834 = vtanh.f32 %v3939_v21  ;;  %v3975_v45 = vmul.f32 %v3959_v5, %v3847_v36  ;;  %v3860_v1 = vmul.f32 0.5, %v8854_v20  ;;  %v5706_v3 = vcombine.high %v4356_v48, %v4358_v56  ;;  %v6574_v8 = vld [vmem:[%s7002_s4 + $0x318] sm:$0xff]   ;;  %v6592_v36 = vld [vmem:[%s7002_s4 + $0x3c8] sm:$0xff]  }
 0x807   : > { %v6823_v29 = vpop.eup %6822  ;;  %v3994_v39 = vpack.c.bf16 %v3986_v2, %v3982_v30  ;;  %4440 = vmatpush1.bf16.msra.mxu1 %v5703_v10  ;;  %v3985_v47 = vmul.f32 %v3969_v63, %v3857_v7  ;;  %v3859_v6 = vmul.f32 0.5, %v8849_v62  ;;  %v5705_v20 = vcombine.low %v4356_v48, %v4358_v56  ;;  %v6569_v2 = vld [vmem:[%s7002_s4 + $0x328] sm:$0xff]   ;;  %v6576_v7 = vld [vmem:[%s7002_s4 + $0x350] sm:$0xff]   ;;  %v6588_v5 = vld [vmem:[%s7002_s4 + $0x3d8] sm:$0xff]  }
 0x808   : > { %v3963_v38 = vadd.f32 1.0, %v6823_v29  ;;  %v3855_v21 = vmul.f32 0.5, %v8832_v24  ;;  %6203 = vmatprep.subr.bf16.mxu1 %v6564_v0  ;;  %v6567_v24 = vld [vmem:[%s7002_s4 + $0x330] sm:$0xff]   ;;  %v6575_v29 = vld [vmem:[%s7002_s4 + $0x3b8] sm:$0xff]  }
 0x809   : > { %4293 = vmatprep.mubr.bf16.mxu1 %v3994_v39  ;;  %v3993_v52 = vpack.c.bf16 %v3985_v47, %v3981_v50  ;;  %v6577_v39 = vld [vmem:[%s7002_s4 + $0x3f0] sm:$0xff]   ;;  %v6581_v50 = vld [vmem:[%s7002_s4 + $0x3e8] sm:$0xff]  }
 0x80a   : > { %v3979_v32 = vmul.f32 %v3963_v38, %v3851_v51  ;;  %v6579_v63 = vld [vmem:[%s7002_s4 + $0x3b0] sm:$0xff]   ;;  %v6583_v38 = vld [vmem:[%s7002_s4 + $0x3a8] sm:$0xff]   ;;  %v6584_v51 = vld [vmem:[%s7002_s4 + $0x340] sm:$0xff]  }
 0x80b   : > { %v6825_v23 = vpop.eup %6824  ;;  %4294 = vmatmul.mubr.bf16.gmra.mxu1 %v3993_v52  ;;  %v6578_v47 = vld [vmem:[%s7002_s4 + $0x310] sm:$0xff]   ;;  %v6580_v52 = vld [vmem:[%s7002_s4 + $0x348] sm:$0xff]  }
 0x80c   : > { %v6827_v59 = vpop.eup %6826  ;;  %v3960_v31 = vadd.f32 1.0, %v6825_v23  ;;  %4457 = vmatprep.mubr.bf16.mxu1 %v9521_v57  ;;  %v3991_v10 = vpack.c.bf16 %v3979_v32, %v3975_v45  ;;  %v6585_v23 = vld [vmem:[%s7002_s4 + $0x3e0] sm:$0xff]   ;;  %v6593_v32 = vld [vmem:[%s7002_s4 + $0x388] sm:$0xff]  }
 0x80d   : > { %v3964_v12 = vadd.f32 1.0, %v6827_v59  ;;  %v6829_v35 = vpop.eup %6828  ;;  %v6582_v59 = vld [vmem:[%s7002_s4 + $0x308] sm:$0xff]  }
 0x80e   : > { %v3976_v13 = vmul.f32 %v3960_v31, %v3848_v49  ;;  %v3968_v4 = vadd.f32 1.0, %v6829_v35  ;;  %v6587_v31 = vld [vmem:[%s7002_s4 + $0x3a0] sm:$0xff]   ;;  %v6591_v35 = vld [vmem:[%s7002_s4 + $0x390] sm:$0xff]  }
 0x80f   : > { %v3980_v55 = vmul.f32 %v3964_v12, %v3852_v33  ;;  %v6586_v49 = vld [vmem:[%s7002_s4 + $0x300] sm:$0xff]   ;;  %v6589_v33 = vld [vmem:[%s7002_s4 + $0x398] sm:$0xff]   ;;  %v6590_v12 = vld [vmem:[%s7002_s4 + $0x3d0] sm:$0xff]  }
 0x810   : > { %v3984_v61 = vmul.f32 %v3968_v4, %v3856_v22 }
 0x811   : > { %v6831_v11 = vpop.eup %6830  ;;  %v3992_v54 = vpack.c.bf16 %v3980_v55, %v3976_v13  ;;  %v6594_v13 = vld [vmem:[%s7002_s4 + $0x3c0] sm:$0xff]  }
 0x812   : > { %v6833_v58 = vpop.eup %6832  ;;  %v3972_v43 = vadd.f32 1.0, %v6831_v11  ;;  %v6595_v55 = vld [vmem:[%s7002_s4 + $0x380] sm:$0xff]  }
 0x813   : > { %v6835_v15 = vpop.eup %6834  ;;  %4334 = vmatprep.mubr.bf16.mxu0 %v3992_v54  ;;  %5711 = vmatmul.mubr.msk.bf16.vlgmr.msra.gmra.mxu1 %vm678_vm1, %v9522_v14  ;;  %v3967_v53 = vadd.f32 1.0, %v6833_v58 }
 0x814   : > { %v3988_v42 = vmul.f32 %v3972_v43, %v3860_v1  ;;  %v3971_v41 = vadd.f32 1.0, %v6835_v15  ;;  %4335 = vmatmul.mubr.bf16.vlgmr.msra.gmra.mxu0 %v3991_v10  ;;  %4467 = vmatprep.mubr.bf16.mxu1 %v9521_v57  ;;  %v8938_v1 = vld [vmem:[%s6997_s3 + $0xc] sm:$0xf] }
 0x815   : > { %4491 = vmatpush1.bf16.msra.mxu0 %v5709_v40  ;;  %v3983_v30 = vmul.f32 %v3967_v53, %v3855_v21  ;;  %v6566_v40 = vld [vmem:[%s7002_s4 + $0x370] sm:$0xff]   ;;  %6204 = vmatpush3.bf16.msra.mxu1 %v6565_v18  ;;  %v4368_v10 = vrot.slane %v8938_v1, %v9524_v44 }
 0x816   : > { %v3996_v17 = vpack.c.bf16 %v3988_v42, %v3984_v61  ;;  %v3987_v9 = vmul.f32 %v3971_v41, %v3859_v6  ;;  %4492 = vmatprep.subr.bf16.mxu0 %v5706_v3  ;;  %6205 = vmatprep.subr.bf16.mxu1 %v6566_v40  ;;  %v4372_v42 = vrot.slane %v8938_v1, %v9525_v34 }
 0x818   : > { %4342 = vmatprep.mubr.bf16.mxu0 %v3996_v17  ;;  %v3995_v62 = vpack.c.bf16 %v3987_v9, %v3983_v30 }
 0x819   : > { %4493 = vmatpush1.bf16.msra.mxu0 %v5705_v20  ;;  %6206 = vmatpush3.bf16.msra.mxu1 %v6567_v24 }
 0x81a   : > { %6231 = vmatprep.subr.bf16.mxu0 %v6573_v46 }
 0x81b   : > { %5712 = vmatmul.mubr.msk.bf16.gmra.mxu1 %vm678_vm1, %v9523_v26 }
 0x81c   : > { %4343 = vmatmul.mubr.bf16.gmra.mxu0 %v3995_v62 }
 0x81d   : > { %4510 = vmatprep.mubr.bf16.mxu0 %v9521_v57 }
 0x824   : > { %5713 = vmatmul.mubr.msk.bf16.vlgmr.msra.gmra.mxu0 %vm678_vm1, %v9522_v14  ;;  %v6568_v14 = vld [vmem:[%s7002_s4 + $0x368] sm:$0xff]  }
 0x825   : > { %4520 = vmatprep.mubr.bf16.mxu0 %v9521_v57  ;;  %6207 = vmatprep.subr.bf16.mxu1 %v6568_v14  ;;  %v6570_v57 = vld [vmem:[%s7002_s4 + $0x360] sm:$0xff]  }
 0x826   : > { %6208 = vmatpush3.bf16.msra.mxu1 %v6569_v2  ;;  %6232 = vmatpush3.bf16.msra.mxu0 %v6575_v29 }
 0x827   : > { %6209 = vmatprep.subr.bf16.mxu1 %v6570_v57  ;;  %6233 = vmatprep.subr.bf16.mxu0 %v6577_v39 }
 0x82a   : > { %6234 = vmatpush3.bf16.msra.mxu0 %v6579_v63 }
 0x82b   : > { %6235 = vmatprep.subr.bf16.mxu0 %v6581_v50 }
 0x82c   : > { %5714 = vmatmul.mubr.msk.bf16.gmra.mxu0 %vm678_vm1, %v9523_v26  ;;  %v6571_v26 = vld [vmem:[%s7002_s4 + $0x320] sm:$0xff]  }
 0x82d   : > { %6210 = vmatpush3.bf16.msra.mxu1 %v6571_v26 }
 0x82e   : > { %6211 = vmatprep.subr.bf16.mxu1 %v6572_v16  ;;  %6236 = vmatpush3.bf16.msra.mxu0 %v6583_v38 }
 0x82f   : > { %6237 = vmatprep.subr.bf16.mxu0 %v6585_v23 }
 0x831   : > { %6212 = vmatpush3.bf16.msra.mxu1 %v6574_v8 }
 0x832   : > { %6213 = vmatprep.subr.bf16.mxu1 %v6576_v7  ;;  %6238 = vmatpush3.bf16.msra.mxu0 %v6587_v31 }
 0x833   : > { %6239 = vmatprep.subr.bf16.mxu0 %v6588_v5 }
 0x835   : > { %6214 = vmatpush3.bf16.msra.mxu1 %v6578_v47 }
 0x836   : > { %6215 = vmatprep.subr.bf16.mxu1 %v6580_v52  ;;  %6240 = vmatpush3.bf16.msra.mxu0 %v6589_v33 }
 0x837   : > { %6241 = vmatprep.subr.bf16.mxu0 %v6590_v12 }
 0x839   : > { %6216 = vmatpush3.bf16.msra.mxu1 %v6582_v59 }
 0x83a   : > { %6217 = vmatprep.subr.bf16.mxu1 %v6584_v51  ;;  %6242 = vmatpush3.bf16.msra.mxu0 %v6591_v35 }
 0x83b   : > { %6243 = vmatprep.subr.bf16.mxu0 %v6592_v36 }
 0x83d   : > { %6218 = vmatpush3.bf16.msra.mxu1 %v6586_v49 }
 0x83e   : > { %6244 = vmatpush3.bf16.msra.mxu0 %v6593_v32 }
 0x83f   : > { %6245 = vmatprep.subr.bf16.mxu0 %v6594_v13 }
 0x842   : > { %6246 = vmatpush3.bf16.msra.mxu0 %v6595_v55 }
 0x8c2   : > { %v6163_v4 = vpop.f32.mrf.mxu1 }
 0x8c4   : > { %v6164_v48 = vpop.f32.mrf.mxu1 }
 0x8c5   : > { %v6165_v56 = vadd.f32 %v6164_v48, %v6163_v4  ;;  %v8981_v4 = vrot.slane %v8938_v1, %v9526_v28 }
 0x8c6   : > { %v6166_v11 = vpop.f32.mrf.mxu1 }
 0x8c8   : > { %v6167_v45 = vpop.f32.mrf.mxu1 }
 0x8c9   : > { %v6168_v58 = vadd.f32 %v6167_v45, %v6166_v11 }
 0x8cb   : > { %v6169_v54 = vpop.f32.mrf.mxu1 }
 0x8cd   : > { %v6170_v22 = vpop.f32.mrf.mxu1 }
 0x8ce   : > { %v6171_v43 = vadd.f32 %v6170_v22, %v6169_v54 }
 0x8cf   : > { %v6172_v15 = vpop.f32.mrf.mxu1 }
 0x8d1   : > { %v6173_v3 = vpop.f32.mrf.mxu1 }
 0x8d2   : > { %v8942_v61 = vadd.f32 %v6173_v3, %v6172_v15 }
 0x8d3   : > { %v4459_v6 = vpop.f32.mrf.mxu1 }
 0x8d4   : > { %v6191_v41 = vpop.f32.mrf.mxu0  ;;  %v8946_v53 = vadd.f32 %v4459_v6, %v4368_v10 }
 0x8d5   : > { %v4461_v20 = vpop.f32.mrf.mxu1 }
 0x8d6   : > { %v6192_v17 = vpop.f32.mrf.mxu0  ;;  %v4547_v21 = vmul.f32 0.044715, %v8946_v53  ;;  %v8949_v30 = vadd.f32 %v4461_v20, %v4372_v42 }
 0x8d7   : > { %v6193_v9 = vadd.f32 %v6192_v17, %v6191_v41  ;;  %v4463_v0 = vpop.f32.mrf.mxu1 }
 0x8d8   : > { %v6194_v62 = vpop.f32.mrf.mxu0  ;;  %v4563_v44 = vmul.f32 %v4547_v21, %v8946_v53  ;;  %v4548_v40 = vmul.f32 0.044715, %v8949_v30  ;;  %v8953_v24 = vadd.f32 %v4463_v0, %v4368_v10 }
 0x8d9   : > { %v4337_v18 = vadd.f32 %v6193_v9, %v6165_v56  ;;  %v4465_v14 = vpop.f32.mrf.mxu1 }
 0x8da   : > { %v6195_v34 = vpop.f32.mrf.mxu0  ;;  %v4579_v2 = vmul.f32 %v4563_v44, %v8946_v53  ;;  %v4564_v26 = vmul.f32 %v4548_v40, %v8949_v30  ;;  %v4551_v16 = vmul.f32 0.044715, %v8953_v24  ;;  %v8961_v29 = vadd.f32 %v4465_v14, %v4372_v42 }
 0x8db   : > { %v8957_v57 = vadd.f32 %v4337_v18, %v8755_v25  ;;  %v6196_v46 = vadd.f32 %v6195_v34, %v6194_v62  ;;  %v4469_v8 = vpop.f32.mrf.mxu1 }
 0x8dc   : > { %v6197_v39 = vpop.f32.mrf.mxu0  ;;  %v4595_v7 = vadd.f32 %v4579_v2, %v8946_v53  ;;  %v4580_v63 = vmul.f32 %v4564_v26, %v8949_v30  ;;  %v8965_v50 = vadd.f32 %v4469_v8, %v4368_v10  ;;  %v4567_v47 = vmul.f32 %v4551_v16, %v8953_v24 }
 0x8dd   : > { %v4340_v52 = vadd.f32 %v6196_v46, %v6168_v58  ;;  %v4552_v25 = vmul.f32 0.044715, %v8961_v29  ;;  %v4471_v23 = vpop.f32.mrf.mxu1 }
 0x8de   : > { %v6198_v38 = vpop.f32.mrf.mxu0  ;;  %v4611_v59 = vmul.f32 0.7978846, %v4595_v7  ;;  %v4555_v51 = vmul.f32 0.044715, %v8965_v50  ;;  %v8970_v5 = vadd.f32 %v4471_v23, %v4372_v42  ;;  %v4583_v49 = vmul.f32 %v4567_v47, %v8953_v24 }
 0x8df   : > { %v6199_v31 = vadd.f32 %v6198_v38, %v6197_v39  ;;  %v8974_v33 = vadd.f32 %v4340_v52, %v8767_v37  ;;  %v4568_v12 = vmul.f32 %v4552_v25, %v8961_v29  ;;  %v4473_v36 = vpop.f32.mrf.mxu1  ;;  %v4596_v32 = vadd.f32 %v4580_v63, %v8949_v30 }
 0x8e0   : > { %v6200_v35 = vpop.f32.mrf.mxu0  ;;  %6836 = vtanh.f32 %v4611_v59  ;;  %v4556_v55 = vmul.f32 0.044715, %v8970_v5  ;;  %v4599_v48 = vadd.f32 %v4583_v49, %v8953_v24  ;;  %v8985_v37 = vadd.f32 %v4473_v36, %v4368_v10 }
 0x8e1   : > { %v4345_v13 = vadd.f32 %v6199_v31, %v6171_v43  ;;  %v4584_v56 = vmul.f32 %v4568_v12, %v8961_v29  ;;  %v4475_v45 = vpop.f32.mrf.mxu1  ;;  %v4612_v58 = vmul.f32 0.7978846, %v4596_v32  ;;  %v4571_v54 = vmul.f32 %v4555_v51, %v8965_v50 }
 0x8e2   : > { %v6201_v11 = vpop.f32.mrf.mxu0  ;;  %v4572_v43 = vmul.f32 %v4556_v55, %v8970_v5  ;;  %v4615_v3 = vmul.f32 0.7978846, %v4599_v48  ;;  %v4559_v28 = vmul.f32 0.044715, %v8985_v37  ;;  %v8993_v41 = vadd.f32 %v4475_v45, %v4372_v42 }
 0x8e3   : > { %v8989_v22 = vadd.f32 %v4345_v13, %v8784_v27  ;;  %v6202_v15 = vadd.f32 %v6201_v11, %v6200_v35  ;;  %v4600_v10 = vadd.f32 %v4584_v56, %v8961_v29  ;;  %v4380_v27 = vrot.slane %v8938_v1, %v9527_v19 }
 0x8e4   : > { %v4512_v6 = vpop.f32.mrf.mxu0  ;;  %6838 = vtanh.f32 %v4612_v58  ;;  %v4588_v21 = vmul.f32 %v4572_v43, %v8970_v5  ;;  %v4560_v9 = vmul.f32 0.044715, %v8993_v41  ;;  %v4575_v0 = vmul.f32 %v4559_v28, %v8985_v37 }
 0x8e5   : > { %v4348_v17 = vadd.f32 %v6202_v15, %v8942_v61  ;;  %v8998_v20 = vadd.f32 %v4512_v6, %v8981_v4  ;;  %6840 = vtanh.f32 %v4615_v3  ;;  %v4616_v42 = vmul.f32 0.7978846, %v4600_v10 }
 0x8e6   : > { %v4514_v62 = vpop.f32.mrf.mxu0  ;;  %v4587_v18 = vmul.f32 %v4571_v54, %v8965_v50  ;;  %v4576_v40 = vmul.f32 %v4560_v9, %v8993_v41  ;;  %v4591_v16 = vmul.f32 %v4575_v0, %v8985_v37  ;;  %v4531_v51 = vmul.f32 0.5, %v8946_v53 }
 0x8e7   : > { %v9006_v44 = vadd.f32 %v4348_v17, %v8805_v60  ;;  %v4549_v61 = vmul.f32 0.044715, %v8998_v20  ;;  %6842 = vtanh.f32 %v4616_v42  ;;  %v9012_v34 = vadd.f32 %v4514_v62, %v4380_v27 }
 0x8e8   : > { %v4516_v19 = vpop.f32.mrf.mxu0  ;;  %v4592_v2 = vmul.f32 %v4576_v40, %v8993_v41  ;;  %v4604_v60 = vadd.f32 %v4588_v21, %v8970_v5  ;;  %v4603_v47 = vadd.f32 %v4587_v18, %v8965_v50  ;;  %v4607_v13 = vadd.f32 %v4591_v16, %v8985_v37 }
 0x8e9   : > { %v4565_v1 = vmul.f32 %v4549_v61, %v8998_v20  ;;  %v9015_v14 = vadd.f32 %v4516_v19, %v8981_v4  ;;  %v4550_v25 = vmul.f32 0.044715, %v9012_v34  ;;  %v4535_v55 = vmul.f32 0.5, %v8953_v24 }
 0x8ea   : > { %v4518_v26 = vpop.f32.mrf.mxu0  ;;  %v4608_v7 = vadd.f32 %v4592_v2, %v8993_v41  ;;  %v4620_v63 = vmul.f32 0.7978846, %v4604_v60  ;;  %v4532_v56 = vmul.f32 0.5, %v8949_v30  ;;  %v4619_v53 = vmul.f32 0.7978846, %v4603_v47 }
 0x8eb   : > { %v4553_v46 = vmul.f32 0.044715, %v9015_v14  ;;  %v9021_v39 = vadd.f32 %v4518_v26, %v4380_v27  ;;  %v4581_v52 = vmul.f32 %v4565_v1, %v8998_v20  ;;  %v4566_v45 = vmul.f32 %v4550_v25, %v9012_v34 }
 0x8ec   : > { %v4522_v8 = vpop.f32.mrf.mxu0  ;;  %v4624_v12 = vmul.f32 0.7978846, %v4608_v7  ;;  %6844 = vtanh.f32 %v4620_v63  ;;  %v4536_v28 = vmul.f32 0.5, %v8961_v29  ;;  %v4623_v9 = vmul.f32 0.7978846, %v4607_v13 }
 0x8ed   : > { %v4569_v38 = vmul.f32 %v4553_v46, %v9015_v14  ;;  %v9029_v23 = vadd.f32 %v4522_v8, %v8981_v4  ;;  %v6837_v59 = vpop.eup %6836  ;;  %v4554_v31 = vmul.f32 0.044715, %v9021_v39  ;;  %v4597_v11 = vadd.f32 %v4581_v52, %v8998_v20 }
 0x8ee   : > { %v4524_v49 = vpop.f32.mrf.mxu0  ;;  %6846 = vtanh.f32 %v4624_v12  ;;  %v4643_v30 = vadd.f32 1.0, %v6837_v59  ;;  %v4582_v18 = vmul.f32 %v4566_v45, %v9012_v34  ;;  %v4540_v45 = vmul.f32 0.5, %v8970_v5 }
 0x8ef   : > { %v4585_v35 = vmul.f32 %v4569_v38, %v9015_v14  ;;  %v4557_v36 = vmul.f32 0.044715, %v9029_v23  ;;  %v9035_v32 = vadd.f32 %v4524_v49, %v4380_v27  ;;  %v4570_v58 = vmul.f32 %v4554_v31, %v9021_v39 }
 0x8f0   : > { %v4526_v48 = vpop.f32.mrf.mxu0  ;;  %6848 = vtanh.f32 %v4619_v53  ;;  %v4659_v16 = vmul.f32 %v4643_v30, %v4531_v51  ;;  %v4598_v52 = vadd.f32 %v4582_v18, %v9012_v34  ;;  %v4543_v5 = vmul.f32 0.5, %v8985_v37 }
 0x8f1   : > { %v4558_v54 = vmul.f32 0.044715, %v9035_v32  ;;  %v6839_v43 = vpop.eup %6838  ;;  %v4601_v15 = vadd.f32 %v4585_v35, %v9015_v14  ;;  %v9046_v3 = vadd.f32 %v4526_v48, %v8981_v4  ;;  %v4573_v10 = vmul.f32 %v4557_v36, %v9029_v23 }
 0x8f2   : > { %v4528_v24 = vpop.f32.mrf.mxu0  ;;  %v6841_v6 = vpop.eup %6840  ;;  %v4644_v42 = vadd.f32 1.0, %v6839_v43  ;;  %v4613_v4 = vmul.f32 0.7978846, %v4597_v11  ;;  %v4586_v29 = vmul.f32 %v4570_v58, %v9021_v39  ;;  %6850 = vtanh.f32 %v4623_v9 }
 0x8f3   : > { %v4574_v17 = vmul.f32 %v4558_v54, %v9035_v32  ;;  %v9051_v21 = vadd.f32 %v4528_v24, %v4380_v27  ;;  %v4561_v62 = vmul.f32 0.044715, %v9046_v3  ;;  %v4647_v0 = vadd.f32 1.0, %v6841_v6 }
 0x8f4   : > { %v6843_v61 = vpop.eup %6842  ;;  %v4617_v19 = vmul.f32 0.7978846, %v4601_v15  ;;  %v4589_v46 = vmul.f32 %v4573_v10, %v9029_v23  ;;  %v4660_v7 = vmul.f32 %v4644_v42, %v4532_v56  ;;  %v4602_v25 = vadd.f32 %v4586_v29, %v9021_v39 }
 0x8f5   : > { %v4562_v40 = vmul.f32 0.044715, %v9051_v21  ;;  %v4577_v1 = vmul.f32 %v4561_v62, %v9046_v3  ;;  %v4648_v2 = vadd.f32 1.0, %v6843_v61  ;;  %v4663_v27 = vmul.f32 %v4647_v0, %v4535_v55 }
 0x8f6   : > { %v4590_v26 = vmul.f32 %v4574_v17, %v9035_v32  ;;  %6852 = vtanh.f32 %v4617_v19  ;;  %v4614_v51 = vmul.f32 0.7978846, %v4598_v52  ;;  %v4618_v12 = vmul.f32 0.7978846, %v4602_v25 }
 0x8f7   : > { %v4578_v60 = vmul.f32 %v4562_v40, %v9051_v21  ;;  %v4593_v8 = vmul.f32 %v4577_v1, %v9046_v3  ;;  %v4664_v63 = vmul.f32 %v4648_v2, %v4536_v28  ;;  %v4675_v31 = vpack.c.bf16 %v4663_v27, %v4659_v16 }
 0x8f8   : > { %v4606_v35 = vadd.f32 %v4590_v26, %v9035_v32  ;;  %6854 = vtanh.f32 %v4613_v4  ;;  %v4605_v13 = vadd.f32 %v4589_v46, %v9029_v23  ;;  %v4544_v58 = vmul.f32 0.5, %v8993_v41 }
 0x8f9   : > { %v4594_v47 = vmul.f32 %v4578_v60, %v9051_v21  ;;  %v4609_v38 = vadd.f32 %v4593_v8, %v9046_v3  ;;  %v4676_v59 = vpack.c.bf16 %v4664_v63, %v4660_v7  ;;  %v6845_v49 = vpop.eup %6844  ;;  %6856 = vtanh.f32 %v4614_v51 }
 0x8fa   : > { %v4652_v55 = vadd.f32 1.0, %v6845_v49  ;;  %v4622_v56 = vmul.f32 0.7978846, %v4606_v35  ;;  %6858 = vtanh.f32 %v4618_v12  ;;  %v4621_v43 = vmul.f32 0.7978846, %v4605_v13 }
 0x8fb   : > { %v4610_v36 = vadd.f32 %v4594_v47, %v9051_v21  ;;  %4971 = vmatprep.mubr.bf16.mxu1 %v4676_v59  ;;  %v6847_v48 = vpop.eup %6846  ;;  %v4625_v11 = vmul.f32 0.7978846, %v4609_v38  ;;  %v4539_v17 = vmul.f32 0.5, %v8965_v50  ;;  %v4537_v1 = vmul.f32 0.5, %v9015_v14 }
 0x8fc   : > { %4972 = vmatmul.mubr.bf16.vlgmr.msra.gmra.mxu1 %v4675_v31  ;;  %v4656_v54 = vadd.f32 1.0, %v6847_v48  ;;  %v4668_v15 = vmul.f32 %v4652_v55, %v4540_v45  ;;  %6860 = vtanh.f32 %v4622_v56  ;;  %v4534_v27 = vmul.f32 0.5, %v9012_v34 }
 0x8fd   : > { %v4626_v53 = vmul.f32 0.7978846, %v4610_v36  ;;  %v6849_v28 = vpop.eup %6848  ;;  %v4538_v50 = vmul.f32 0.5, %v9021_v39  ;;  %v4533_v60 = vmul.f32 0.5, %v8998_v20  ;;  %v4542_v46 = vmul.f32 0.5, %v9035_v32 }
 0x8fe   : > { %v4672_v24 = vmul.f32 %v4656_v54, %v4544_v58  ;;  %v4651_v6 = vadd.f32 1.0, %v6849_v28  ;;  %v4546_v52 = vmul.f32 0.5, %v9051_v21  ;;  %v4545_v20 = vmul.f32 0.5, %v9046_v3 }
 0x8ff   : > { %6862 = vtanh.f32 %v4626_v53  ;;  %v6851_v10 = vpop.eup %6850  ;;  %v4541_v12 = vmul.f32 0.5, %v9029_v23 }
 0x900   : > { %6864 = vtanh.f32 %v4625_v11  ;;  %v4680_v30 = vpack.c.bf16 %v4672_v24, %v4668_v15  ;;  %v4655_v9 = vadd.f32 1.0, %v6851_v10  ;;  %v4667_v62 = vmul.f32 %v4651_v6, %v4539_v17  ;;  %v670_v10 = vld [vmem:[%s6972_s15 + $0x60] sm:$0xff] }
 0x901   : > { %6866 = vtanh.f32 %v4621_v43 }
 0x902   : > { %4979 = vmatprep.mubr.bf16.mxu1 %v4680_v30  ;;  %v4671_v42 = vmul.f32 %v4655_v9, %v4543_v5  ;;  %v9528_v5 = vld [vmem:[#allocation29_spill] sm:$0xff] }
 0x903   : > { %v6853_v41 = vpop.eup %6852 }
 0x904   : > { %v4679_v61 = vpack.c.bf16 %v4671_v42, %v4667_v62  ;;  %v4649_v18 = vadd.f32 1.0, %v6853_v41 }
 0x905   : > { %v6855_v0 = vpop.eup %6854 }
 0x906   : > { %v6857_v4 = vpop.eup %6856  ;;  %4980 = vmatmul.mubr.bf16.gmra.mxu1 %v4679_v61  ;;  %v4645_v19 = vadd.f32 1.0, %v6855_v0  ;;  %v4665_v16 = vmul.f32 %v4649_v18, %v4537_v1 }
 0x907   : > { %v4646_v29 = vadd.f32 1.0, %v6857_v4  ;;  %v6859_v40 = vpop.eup %6858 }
 0x908   : > { %v4650_v37 = vadd.f32 1.0, %v6859_v40  ;;  %v4661_v14 = vmul.f32 %v4645_v19, %v4533_v60  ;;  %v672_v60 = vld [vmem:[%s6972_s15 + $0x70] sm:$0xff] }
 0x909   : > { %v6861_v2 = vpop.eup %6860  ;;  %v4662_v63 = vmul.f32 %v4646_v29, %v4534_v27  ;;  %v671_v29 = vld [vmem:[%s6972_s15 + $0x68] sm:$0xff] }
 0x90a   : > { %v4654_v8 = vadd.f32 1.0, %v6861_v2  ;;  %v4666_v47 = vmul.f32 %v4650_v37, %v4538_v50  ;;  %v4677_v39 = vpack.c.bf16 %v4665_v16, %v4661_v14 }
 0x90c   : > { %v6863_v26 = vpop.eup %6862  ;;  %v4678_v59 = vpack.c.bf16 %v4666_v47, %v4662_v63  ;;  %v4670_v34 = vmul.f32 %v4654_v8, %v4542_v46  ;;  %v673_v63 = vld [vmem:[%s6972_s15 + $0x78] sm:$0xff]  ;;  %v9531_v47 = vld [vmem:[#allocation22_spill] sm:$0xff] }
 0x90d   : > { %v6865_v7 = vpop.eup %6864  ;;  %v4658_v25 = vadd.f32 1.0, %v6863_v26 }
 0x90e   : > { %v6867_v38 = vpop.eup %6866  ;;  %v4657_v49 = vadd.f32 1.0, %v6865_v7  ;;  %5020 = vmatprep.mubr.bf16.mxu0 %v4678_v59 }
 0x90f   : > { %v4674_v31 = vmul.f32 %v4658_v25, %v4546_v52  ;;  %5021 = vmatmul.mubr.bf16.vlgmr.msra.gmra.mxu0 %v4677_v39  ;;  %v4653_v32 = vadd.f32 1.0, %v6867_v38 }
 0x910   : > { %v4673_v35 = vmul.f32 %v4657_v49, %v4545_v20 }
 0x911   : > { %v4682_v51 = vpack.c.bf16 %v4674_v31, %v4670_v34  ;;  %v4669_v36 = vmul.f32 %v4653_v32, %v4541_v12 }
 0x913   : > { %5028 = vmatprep.mubr.bf16.mxu0 %v4682_v51  ;;  %v4681_v21 = vpack.c.bf16 %v4673_v35, %v4669_v36 }
 0x917   : > { %5029 = vmatmul.mubr.bf16.gmra.mxu0 %v4681_v21 }
 0x9bc   : > { %v6219_v13 = vpop.f32.mrf.mxu1 }
 0x9be   : > { %v6220_v55 = vpop.f32.mrf.mxu1 }
 0x9bf   : > { %v6221_v58 = vadd.f32 %v6220_v55, %v6219_v13 }
 0x9c0   : > { %v6222_v48 = vpop.f32.mrf.mxu1 }
 0x9c2   : > { %v6223_v56 = vpop.f32.mrf.mxu1 }
 0x9c3   : > { %v6224_v23 = vadd.f32 %v6223_v56, %v6222_v48 }
 0x9c6   : > { %v6225_v53 = vpop.f32.mrf.mxu1 }
 0x9c8   : > { %v6226_v43 = vpop.f32.mrf.mxu1 }
 0x9c9   : > { %v6227_v42 = vadd.f32 %v6226_v43, %v6225_v53 }
 0x9ca   : > { %v6228_v6 = vpop.f32.mrf.mxu1 }
 0x9cc   : > { %v6229_v18 = vpop.f32.mrf.mxu1 }
 0x9cd   : > { %v6230_v27 = vadd.f32 %v6229_v18, %v6228_v6 }
 0x9cf   : > { %v6247_v11 = vpop.f32.mrf.mxu0 }
 0x9d1   : > { %v6248_v45 = vpop.f32.mrf.mxu0 }
 0x9d2   : > { %v6249_v54 = vadd.f32 %v6248_v45, %v6247_v11 }
 0x9d3   : > { %v6250_v3 = vpop.f32.mrf.mxu0 }
 0x9d4   : > { %v5023_v15 = vadd.f32 %v6249_v54, %v6221_v58 }
 0x9d5   : > { %v6251_v24 = vpop.f32.mrf.mxu0 }
 0x9d6   : > { %v5037_v28 = vadd.f32 %v5023_v15, %v8957_v57  ;;  %v6252_v30 = vadd.f32 %v6251_v24, %v6250_v3  ;;  %v9529_v57 = vld [vmem:[#allocation11_spill] sm:$0xff] }
 0x9d7   : > { %v6253_v17 = vpop.f32.mrf.mxu0 }
 0x9d8   : > { %v5041_v9 = vadd.f32 %v5037_v28, %v9528_v5  ;;  %v5026_v41 = vadd.f32 %v6252_v30, %v6224_v23 }
 0x9d9   : > { %v6254_v62 = vpop.f32.mrf.mxu0 }
 0x9da   : > { %v5045_v0 = vadd.f32 %v5041_v9, %v670_v10  ;;  %v5038_v61 = vadd.f32 %v5026_v41, %v8974_v33  ;;  %v6255_v4 = vadd.f32 %v6254_v62, %v6253_v17  ;;  %v9530_v33 = vld [vmem:[#allocation17_spill] sm:$0xff] }
 0x9db   : > { %v6256_v40 = vpop.f32.mrf.mxu0 }
 0x9dc   : > { %5049 = vst.msk [vmem:[#allocation2] sm:$0xff] %vm678_vm1, %v5045_v0  ;;  %v5042_v19 = vadd.f32 %v5038_v61, %v9529_v57  ;;  %v5031_v1 = vadd.f32 %v6255_v4, %v6227_v42 }
 0x9dd   : > { %v6257_v2 = vpop.f32.mrf.mxu0 }
 0x9de   : > { %v5046_v50 = vadd.f32 %v5042_v19, %v671_v29  ;;  %v5039_v37 = vadd.f32 %v5031_v1, %v8989_v22  ;;  %v6258_v26 = vadd.f32 %v6257_v2, %v6256_v40 }
 0x9e0   : > { %5050 = vst.msk [vmem:[#allocation2 + $0x8] sm:$0xff] %vm678_vm1, %v5046_v50  ;;  %v5043_v16 = vadd.f32 %v5039_v37, %v9530_v33  ;;  %v5034_v46 = vadd.f32 %v6258_v26, %v6230_v27 }
 0x9e2   : > { %v5047_v8 = vadd.f32 %v5043_v16, %v672_v60  ;;  %v5040_v7 = vadd.f32 %v5034_v46, %v9006_v44 }
 0x9e4   : > { %5051 = vst.msk [vmem:[#allocation2 + $0x10] sm:$0xff] %vm678_vm1, %v5047_v8  ;;  %v5044_v52 = vadd.f32 %v5040_v7, %v9531_v47  ;;  %5056 = sbr.rel (%p5747_p5) target bundleno = 3152 (0xc50), region = 80 }
 0x9e6   : > { %v5048_v25 = vadd.f32 %v5044_v52, %v673_v63 }
 0x9e8   : > { %5052 = vst.msk [vmem:[#allocation2 + $0x18] sm:$0xff] %vm678_vm1, %v5048_v25 }
 0x9e9   : > { %v5064_v22 = vld [vmem:[%s9265_s9 + $0x38] sm:$0xff]  ;;  %v5063_v14 = vld [vmem:[%s9265_s9 + $0x30] sm:$0xff]  ;;  %v5062_v44 = vld [vmem:[%s9265_s9 + $0x28] sm:$0xff]  ;;  %v6885_v59 = vmov 0.0   ;;  %vm6886_vm2 = vmmov 0  }
 0x9ea   : > { %5109 = vmatprep.subr.mxu0 %v5064_v22  ;;  %v5061_v38 = vld [vmem:[%s9265_s9 + $0x20] sm:$0xff]  ;;  %5149 = vmatprep.mubr.f32.mxu0 %v6885_v59  ;;  %v5060_v34 = vld [vmem:[%s9265_s9 + $0x18] sm:$0xff]  ;;  %v5059_v39 = vld [vmem:[%s9265_s9 + $0x10] sm:$0xff] }
 0x9eb   : > { %5110 = vmatpush1.msra.mxu0 %v5063_v14  ;;  %5214 = vmatprep.subr.mxu1 %v6885_v59  ;;  %v5197_v31 = vld [vmem:[%s9266_s10 + $0x78] sm:$0xff]  ;;  %v5196_v49 = vld [vmem:[%s9266_s10 + $0x70] sm:$0xff]  ;;  %v5058_v51 = vld [vmem:[%s9265_s9 + $0x8] sm:$0xff] }
 0x9ec   : > { %5111 = vmatprep.subr.mxu0 %v5062_v44  ;;  %5215 = vmatpush1.msra.mxu1 %v5197_v31  ;;  %v5195_v20 = vld [vmem:[%s9266_s10 + $0x68] sm:$0xff]  ;;  %v5057_v32 = vld [vmem:[%s9265_s9] sm:$0xff]  ;;  %v5193_v35 = vld [vmem:[%s9266_s10 + $0x58] sm:$0xff] }
 0x9ed   : > { %5112 = vmatpush1.msra.mxu0 %v5061_v38  ;;  %5216 = vmatprep.subr.mxu1 %v6885_v59  ;;  %v5194_v12 = vld [vmem:[%s9266_s10 + $0x60] sm:$0xff]  ;;  %v5192_v36 = vld [vmem:[%s9266_s10 + $0x50] sm:$0xff]  ;;  %v5191_v21 = vld [vmem:[%s9266_s10 + $0x48] sm:$0xff] }
 0x9ee   : > { %5113 = vmatprep.subr.mxu0 %v5060_v34  ;;  %5217 = vmatpush1.msra.mxu1 %v5196_v49  ;;  %v5190_v13 = vld [vmem:[%s9266_s10 + $0x40] sm:$0xff]  ;;  %v5189_v55 = vld [vmem:[%s9266_s10 + $0x38] sm:$0xff]  ;;  %v5188_v48 = vld [vmem:[%s9266_s10 + $0x30] sm:$0xff] }
 0x9ef   : > { %5114 = vmatpush1.msra.mxu0 %v5059_v39  ;;  %5218 = vmatprep.subr.mxu1 %v6885_v59  ;;  %v5187_v56 = vld [vmem:[%s9266_s10 + $0x28] sm:$0xff]  ;;  %v5186_v53 = vld [vmem:[%s9266_s10 + $0x20] sm:$0xff]  ;;  %v5185_v11 = vld [vmem:[%s9266_s10 + $0x18] sm:$0xff] }
 0x9f0   : > { %5115 = vmatprep.subr.mxu0 %v5058_v51  ;;  %5219 = vmatpush1.msra.mxu1 %v5195_v20  ;;  %v5184_v45 = vld [vmem:[%s9266_s10 + $0x10] sm:$0xff]  ;;  %v5183_v58 = vld [vmem:[%s9266_s10 + $0x8] sm:$0xff]  ;;  %v5182_v54 = vld [vmem:[%s9266_s10] sm:$0xff] }
 0x9f1   : > { %5116 = vmatpush1.msra.mxu0 %v5057_v32  ;;  %5220 = vmatprep.subr.mxu1 %v6885_v59  ;;  %v5201_v43 = vld [vmem:[%s9266_s10 + $0x98] sm:$0xff]  ;;  %v5200_v3 = vld [vmem:[%s9266_s10 + $0x90] sm:$0xff]  ;;  %v5199_v15 = vld [vmem:[%s9266_s10 + $0x88] sm:$0xff] }
 0x9f2   : > { %5748 = vmatmul.mubr.msk.f32.vlgmr.msra.gmra.mxu0 %vm678_vm1, %v5045_v0  ;;  %5221 = vmatpush1.msra.mxu1 %v5194_v12  ;;  %v5198_v24 = vld [vmem:[%s9266_s10 + $0x80] sm:$0xff]  ;;  %v5066_v28 = vld [vmem:[%s9265_s9 + $0x48] sm:$0xff]  ;;  %v5068_v9 = vld [vmem:[%s9265_s9 + $0x58] sm:$0xff] }
 0x9f3   : > { %5155 = vmatprep.mubr.f32.mxu0 %v6885_v59  ;;  %5222 = vmatprep.subr.mxu1 %v6885_v59  ;;  %v5065_v30 = vld [vmem:[%s9265_s9 + $0x40] sm:$0xff]  ;;  %v5067_v41 = vld [vmem:[%s9265_s9 + $0x50] sm:$0xff]  ;;  %v5070_v4 = vld [vmem:[%s9265_s9 + $0x68] sm:$0xff] }
 0x9f4   : > { %5223 = vmatpush1.msra.mxu1 %v5193_v35  ;;  %6370 = vmatprep.subr.mxu0 %v6885_v59  ;;  %v5069_v18 = vld [vmem:[%s9265_s9 + $0x60] sm:$0xff]  ;;  %v5072_v1 = vld [vmem:[%s9265_s9 + $0x78] sm:$0xff]  ;;  %v5071_v2 = vld [vmem:[%s9265_s9 + $0x70] sm:$0xff] }
 0x9f5   : > { %5224 = vmatprep.subr.mxu1 %v6885_v59  ;;  %v5299_v47 = vld [vmem:[%s9267_s11] sm:$0xff] }
 0x9f6   : > { %5749 = vmatmul.mubr.msk.f32.gmra.mxu0 %vm678_vm1, %v5046_v50  ;;  %5225 = vmatpush1.msra.mxu1 %v5192_v36  ;;  %v5756_v52 = vld [vmem:[%s9268_s12] ss:$0 sm:$0xff] }
 0x9f7   : > { %5161 = vmatprep.mubr.f32.mxu0 %v6885_v59  ;;  %5226 = vmatprep.subr.mxu1 %v6885_v59 }
 0x9f8   : > { %5227 = vmatpush1.msra.mxu1 %v5191_v21 }
 0x9f9   : > { %5228 = vmatprep.subr.mxu1 %v6885_v59 }
 0x9fa   : > { %5750 = vmatmul.mubr.msk.f32.gmra.mxu0 %vm678_vm1, %v5047_v8  ;;  %5229 = vmatpush1.msra.mxu1 %v5190_v13 }
 0x9fb   : > { %5167 = vmatprep.mubr.f32.mxu0 %v6885_v59  ;;  %5230 = vmatprep.subr.mxu1 %v6885_v59 }
 0x9fc   : > { %5231 = vmatpush1.msra.mxu1 %v5189_v55 }
 0x9fd   : > { %5232 = vmatprep.subr.mxu1 %v6885_v59 }
 0x9fe   : > { %5751 = vmatmul.mubr.msk.f32.gmra.mxu0 %vm678_vm1, %v5048_v25  ;;  %5233 = vmatpush1.msra.mxu1 %v5188_v48 }
 0x9ff   : > { %5234 = vmatprep.subr.mxu1 %v6885_v59  ;;  %6378 = vmatprep.mubr.msk.f32.mxu0 %vm6886_vm2, %v6885_v59 }
 0xa00   : > { %5235 = vmatpush1.msra.mxu1 %v5187_v56 }
 0xa01   : > { %5236 = vmatprep.subr.mxu1 %v6885_v59 }
 0xa02   : > { %5237 = vmatpush1.msra.mxu1 %v5186_v53 }
 0xa03   : > { %5238 = vmatprep.subr.mxu1 %v6885_v59 }
 0xa04   : > { %5239 = vmatpush1.msra.mxu1 %v5185_v11 }
 0xa05   : > { %5240 = vmatprep.subr.mxu1 %v6885_v59 }
 0xa06   : > { %5241 = vmatpush1.msra.mxu1 %v5184_v45 }
 0xa07   : > { %5242 = vmatprep.subr.mxu1 %v6885_v59 }
 0xa08   : > { %5243 = vmatpush1.msra.mxu1 %v5183_v58 }
 0xa09   : > { %5244 = vmatprep.subr.mxu1 %v6885_v59 }
 0xa0a   : > { %5245 = vmatpush1.msra.mxu1 %v5182_v54 }
 0xa0b   : > { %5270 = vmatprep.subr.mxu1 %v6885_v59 }
 0xa0c   : > { %5271 = vmatpush2.msra.mxu1 %v5201_v43 }
 0xa0d   : > { %5272 = vmatprep.subr.mxu1 %v6885_v59 }
 0xa0e   : > { %5273 = vmatpush2.msra.mxu1 %v5200_v3 }
 0xa0f   : > { %5274 = vmatprep.subr.mxu1 %v6885_v59 }
 0xa10   : > { %5275 = vmatpush2.msra.mxu1 %v5199_v15 }
 0xa11   : > { %5276 = vmatprep.subr.mxu1 %v6885_v59 }
 0xa12   : > { %5277 = vmatpush2.msra.mxu1 %v5198_v24 }
 0xab2   : > { %v5151_v23 = vpop.f32.mrf.mxu0 }
 0xab3   : > { %v5174_v17 = vmul.f32 %v5151_v23, %v5065_v30 }
 0xab4   : > { %v5153_v6 = vpop.f32.mrf.mxu0 }
 0xab5   : > { %v5175_v10 = vmul.f32 %v5153_v6, %v5066_v28 }
 0xab6   : > { %v5157_v5 = vpop.f32.mrf.mxu0 }
 0xab7   : > { %5752 = vmatprep.mubr.msk.f32.mxu1 %vm678_vm1, %v5175_v10  ;;  %v5176_v0 = vmul.f32 %v5157_v5, %v5067_v41 }
 0xab8   : > { %v5159_v62 = vpop.f32.mrf.mxu0  ;;  %5279 = vmatmul.mubr.f32.vlgmr.msra.gmra.mxu1 %v5174_v17 }
 0xab9   : > { %v5177_v42 = vmul.f32 %v5159_v62, %v5068_v9 }
 0xaba   : > { %v5163_v61 = vpop.f32.mrf.mxu0 }
 0xabb   : > { %5753 = vmatprep.mubr.msk.f32.mxu1 %vm678_vm1, %v5177_v42  ;;  %v5178_v57 = vmul.f32 %v5163_v61, %v5069_v18 }
 0xabc   : > { %v5165_v29 = vpop.f32.mrf.mxu0  ;;  %5284 = vmatmul.mubr.f32.gmra.mxu1 %v5176_v0 }
 0xabd   : > { %v5179_v40 = vmul.f32 %v5165_v29, %v5070_v4 }
 0xabe   : > { %v5169_v19 = vpop.f32.mrf.mxu0 }
 0xabf   : > { %5754 = vmatprep.mubr.msk.f32.mxu1 %vm678_vm1, %v5179_v40  ;;  %v5180_v37 = vmul.f32 %v5169_v19, %v5071_v2 }
 0xac0   : > { %v5171_v27 = vpop.f32.mrf.mxu0  ;;  %5289 = vmatmul.mubr.f32.gmra.mxu1 %v5178_v57 }
 0xac1   : > { %v5181_v50 = vmul.f32 %v5171_v27, %v5072_v1 }
 0xac3   : > { %5755 = vmatprep.mubr.msk.f32.mxu1 %vm678_vm1, %v5181_v50 }
 0xac4   : > { %5294 = vmatmul.mubr.f32.gmra.mxu1 %v5180_v37 }
 0xb78   : > { %v5280_v26 = vpop.f32.mrf.mxu1 }
 0xb7a   : > { %v5282_v60 = vpop.f32.mrf.mxu1 }
 0xb7c   : > { %v5285_v33 = vpop.f32.mrf.mxu1 }
 0xb7e   : > { %v5287_v16 = vpop.f32.mrf.mxu1 }
 0xb80   : > { %v5290_v46 = vpop.f32.mrf.mxu1 }
 0xb82   : > { %v5292_v8 = vpop.f32.mrf.mxu1 }
 0xb84   : > { %v5295_v7 = vpop.f32.mrf.mxu1 }
 0xb85   : > { %6371 = vmatpush3.msra.mxu0 %v5295_v7 }
 0xb86   : > { %v5297_v63 = vpop.f32.mrf.mxu1  ;;  %6372 = vmatprep.subr.mxu0 %v6885_v59 }
 0xb87   : > { %6373 = vmatpush3.msra.mxu0 %v5290_v46 }
 0xb88   : > { %6374 = vmatprep.subr.mxu0 %v6885_v59 }
 0xb89   : > { %6375 = vmatpush3.msra.mxu0 %v5285_v33 }
 0xb8a   : > { %6376 = vmatprep.subr.mxu0 %v6885_v59 }
 0xb8b   : > { %6377 = vmatpush3.msra.mxu0 %v5280_v26 }
 0xb8c   : > { %6379 = vmatmul.mubr.msk.f32.vlgmr.msra.gmra.mxu0 %vm678_vm1, %v5299_v47 }
 0xc4c   : > { %v5376_v25 = vpop.f32.mrf.mxu0 }
 0xc4d   : > { %v5377_v22 = vadd.f32 %v5756_v52, %v5376_v25 }
 0xc4e   : > { %v6380_v14 = vpop.f32.mrf.mxu0 }
 0xc4f   : > { %5380 = vst [vmem:[%s9532_s14] sm:$0xff] %v5377_v22 }
 0xc50 PF: > { %s9533_s16 = sld [smem:[#allocation3_spill]] }
 0xc56   : > { %s23_s25 = sadd.s32 1, %s9533_s16  }
 0xc57   : > { %p20_p6 = scmp.ge.s32.totalorder %s23_s25, 4  }
 0xc59   :  { %22 = sbr.rel (!%p20_p6) target bundleno = 5 (0x5), region = 124 }

</bundles_post_ra>
